<compile_context>
chip_gen: v6e
topology: v6e:2x2x1
jax: 0.10.0
libtpu: 0.0.40
codegen_flags: <defaults>
</compile_context>

<pallas_src>
import functools

import jax
import jax.numpy as jnp
from jax.experimental import pallas as pl
from jax.experimental.pallas import tpu as pltpu


def _round_up(x, m):
    return (x + m - 1) // m * m


# ---------------------------------------------------------------------------
# Pallas kernel: one (tile_m, K) @ (K, Cout) matmul + bias (+ ReLU)
# ---------------------------------------------------------------------------
def _matmul_bias_act_kernel(x_ref, w_ref, b_ref, o_ref, *, apply_relu):
    """x_ref: (tm, K) bf16, w_ref: (K, Cout) bf16, b_ref: (1, Cout) f32,
    o_ref: (tm, Cout) f32."""
    acc = jnp.dot(x_ref[...], w_ref[...], preferred_element_type=jnp.float32)
    acc = acc + b_ref[...]
    if apply_relu:
        acc = jnp.maximum(acc, 0.0)
    o_ref[...] = acc.astype(o_ref.dtype)


def conv2d_im2col_pallas(x_nhwc, w, b, *, pad, relu, tile_m=1024):
    """Same-padded conv2d.

    x_nhwc: (N,H,W,Cin) f32; w: (KH,KW,Cin,Cout) f32; b: (Cout,) f32.
    Returns (N,H,W,Cout) f32.
    """
    N, H, W, Cin = x_nhwc.shape
    KH, KW, _, Cout = w.shape
    M = N * H * W
    K = KH * KW * Cin

    # --- im2col glue (pure JAX): (M, KH*KW*Cin), ordered (kh, kw, cin) ------
    xp = jnp.pad(x_nhwc, ((0, 0), (pad, pad), (pad, pad), (0, 0)))
    cols = jnp.concatenate(
        [xp[:, kh:kh + H, kw:kw + W, :] for kh in range(KH) for kw in range(KW)],
        axis=-1,
    ).reshape(M, K)

    # --- tile the M dimension ----------------------------------------------
    tm = min(tile_m, _round_up(M, 16))
    tm = _round_up(tm, 16)
    Mp = _round_up(M, tm)
    if Mp != M:
        cols = jnp.pad(cols, ((0, Mp - M), (0, 0)))

    lhs = cols.astype(jnp.bfloat16)                       # MXU bf16 input
    rhs = w.reshape(K, Cout).astype(jnp.bfloat16)         # (K, Cout) bf16
    bias = b.reshape(1, Cout).astype(jnp.float32)

    grid = (Mp // tm,)
    kernel = functools.partial(_matmul_bias_act_kernel, apply_relu=relu)
    cost = pl.CostEstimate(
        flops=2 * Mp * K * Cout,
        transcendentals=0,
        bytes_accessed=Mp * K * 2 + K * Cout * 2 + Mp * Cout * 4,
    )

    out = pl.pallas_call(
        kernel,
        out_shape=jax.ShapeDtypeStruct((Mp, Cout), jnp.float32),
        grid=grid,
        in_specs=[
            pl.BlockSpec((tm, K), lambda i: (i, 0)),      # streamed activations
            pl.BlockSpec((K, Cout), lambda i: (0, 0)),    # weights: VMEM-resident
            pl.BlockSpec((1, Cout), lambda i: (0, 0)),    # bias:    VMEM-resident
        ],
        out_specs=pl.BlockSpec((tm, Cout), lambda i: (i, 0)),
        compiler_params=pltpu.CompilerParams(
            dimension_semantics=("parallel",),
        ),
        cost_estimate=cost,
    )(lhs, rhs, bias)

    if Mp != M:
        out = out[:M]
    return out.reshape(N, H, W, Cout)


# ---------------------------------------------------------------------------
# ESPCN forward
# ---------------------------------------------------------------------------
def make_espcn_params(scale_factor=3, seed=0):
    """Deterministic synthetic parameters, shapes matching the torch module."""
    key = jax.random.PRNGKey(seed)
    specs = [
        ("conv1", 3, 64, 5),
        ("conv2", 64, 64, 3),
        ("conv3", 64, 32, 3),
        ("conv4", 32, scale_factor ** 2 * 3, 3),
    ]
    params = {}
    for name, cin, cout, k in specs:
        key, kw_, kb_ = jax.random.split(key, 3)
        # torch layout (Cout, Cin, KH, KW) -> kernel layout (KH, KW, Cin, Cout)
        w_torch = jax.random.normal(kw_, (cout, cin, k, k), jnp.float32) * 0.05
        b = jax.random.normal(kb_, (cout,), jnp.float32) * 0.01
        params[name] = (jnp.transpose(w_torch, (2, 3, 1, 0)), b)
    return params


def pixel_shuffle_nchw(x_nchw, r):
    """Exact torch.nn.PixelShuffle semantics on NCHW input."""
    N, C, H, W = x_nchw.shape
    Cout = C // (r * r)
    x = x_nchw.reshape(N, Cout, r, r, H, W)
    x = jnp.transpose(x, (0, 1, 4, 2, 5, 3))  # (N, Cout, H, r, W, r)
    return x.reshape(N, Cout, H * r, W * r)


def espcn_forward(x_nchw, params, scale_factor=3):
    """x_nchw: (N, 3, H, W) float32  ->  (N, 3, H*r, W*r) float32."""
    x = jnp.transpose(x_nchw, (0, 2, 3, 1))  # NCHW -> NHWC for the conv kernels

    w1, b1 = params["conv1"]
    w2, b2 = params["conv2"]
    w3, b3 = params["conv3"]
    w4, b4 = params["conv4"]

    x = conv2d_im2col_pallas(x, w1, b1, pad=2, relu=True)
    x = conv2d_im2col_pallas(x, w2, b2, pad=1, relu=True)
    x = conv2d_im2col_pallas(x, w3, b3, pad=1, relu=True)

    # conv4: pad Cout (r^2*3 = 27) up to a multiple of 8 for better store
    # alignment, slice back afterwards (zero weights -> identical result).
    c4 = w4.shape[-1]
    c4p = _round_up(c4, 8)
    if c4p != c4:
        w4 = jnp.pad(w4, ((0, 0), (0, 0), (0, 0), (0, c4p - c4)))
        b4 = jnp.pad(b4, (0, c4p - c4))
    x = conv2d_im2col_pallas(x, w4, b4, pad=1, relu=False)[..., :c4]

    x = jnp.transpose(x, (0, 3, 1, 2))  # back to NCHW: (N, r^2*3, H, W)
    return pixel_shuffle_nchw(x, scale_factor)


# ---------------------------------------------------------------------------
if __name__ == "__main__":
    scale_factor = 3
    N, C, H, W = 2, 3, 16, 16

    key = jax.random.PRNGKey(0)
    x = jax.random.normal(key, (N, C, H, W), jnp.float32)

    params = make_espcn_params(scale_factor=scale_factor, seed=0)

    fwd = jax.jit(functools.partial(espcn_forward, scale_factor=scale_factor))
    out = fwd(x, params)
    jax.block_until_ready(out)

    expected_shape = (N, 3, H * scale_factor, W * scale_factor)
    assert out.shape == expected_shape, (out.shape, expected_shape)
    assert out.dtype == jnp.float32
    assert bool(jnp.all(jnp.isfinite(out)))

    print("KERNEL_OK")
</pallas_src>

<mosaic_0001>
module attributes {stable_mosaic.version = 11 : i64} {
  func.func @_matmul_bias_act_kernel(%arg0: i32, %arg1: memref<512x75xbf16, #tpu.memory_space<vmem>>, %arg2: memref<75x64xbf16, #tpu.memory_space<vmem>>, %arg3: memref<1x64xf32, #tpu.memory_space<vmem>>, %arg4: memref<512x64xf32, #tpu.memory_space<vmem>>) attributes {dimension_semantics = [#tpu.dimension_semantics<parallel>], iteration_bounds = array<i64: 1>, scalar_prefetch = 0 : i64, scratch_operands = 0 : i64, tpu.core_type = #tpu.core_type<tc>, window_params = [{transform_indices = @transform_0, window_bounds = array<i64: 512, 75>}, {pipeline_mode = #tpu.pipeline_mode<synchronous>, transform_indices = @transform_1, window_bounds = array<i64: 75, 64>}, {pipeline_mode = #tpu.pipeline_mode<synchronous>, transform_indices = @transform_2, window_bounds = array<i64: 1, 64>}, {transform_indices = @transform_3, window_bounds = array<i64: 512, 64>}]} {
    %c0 = arith.constant 0 : index
    %c0_0 = arith.constant 0 : index
    %0 = vector.load %arg1[%c0, %c0_0] : memref<512x75xbf16, #tpu.memory_space<vmem>>, vector<512x75xbf16>
    %c0_1 = arith.constant 0 : index
    %c0_2 = arith.constant 0 : index
    %1 = vector.load %arg2[%c0_1, %c0_2] : memref<75x64xbf16, #tpu.memory_space<vmem>>, vector<75x64xbf16>
    %cst = arith.constant dense<0.000000e+00> : vector<512x64xf32>
    %2 = tpu.matmul %0, %1, %cst {dimension_numbers = #tpu.dot_dimension_numbers<[1], [0], [0], [1], [0, 0, 1, 1], [], []>} : vector<512x75xbf16>, vector<75x64xbf16>, vector<512x64xf32> -> vector<512x64xf32>
    %c0_3 = arith.constant 0 : index
    %c0_4 = arith.constant 0 : index
    %3 = vector.load %arg3[%c0_3, %c0_4] : memref<1x64xf32, #tpu.memory_space<vmem>>, vector<1x64xf32>
    %4 = vector.broadcast %3 : vector<1x64xf32> to vector<512x64xf32>
    %5 = arith.addf %2, %4 : vector<512x64xf32>
    %cst_5 = arith.constant 0.000000e+00 : f32
    %6 = vector.broadcast %cst_5 : f32 to vector<512x64xf32>
    %7 = arith.maximumf %5, %6 : vector<512x64xf32>
    %c0_6 = arith.constant 0 : index
    %c0_7 = arith.constant 0 : index
    %8 = vector.load %arg4[%c0_6, %c0_7] : memref<512x64xf32, #tpu.memory_space<vmem>>, vector<512x64xf32>
    tpu.vector_store %arg4[%c0_6, %c0_7], %7 {strides = array<i32>} : memref<512x64xf32, #tpu.memory_space<vmem>>, vector<512x64xf32>,
    return
  }
  func.func @transform_0(%arg0: i32) -> (i32, i32) {
    %c0_i32 = arith.constant 0 : i32
    %c0_i32_0 = arith.constant 0 : i32
    return %arg0, %c0_i32 : i32, i32
  }
  func.func @transform_1(%arg0: i32) -> (i32, i32) {
    %c0_i32 = arith.constant 0 : i32
    %c0_i32_0 = arith.constant 0 : i32
    %c0_i32_1 = arith.constant 0 : i32
    return %c0_i32, %c0_i32_0 : i32, i32
  }
  func.func @transform_2(%arg0: i32) -> (i32, i32) {
    %c0_i32 = arith.constant 0 : i32
    %c0_i32_0 = arith.constant 0 : i32
    %c0_i32_1 = arith.constant 0 : i32
    return %c0_i32, %c0_i32_0 : i32, i32
  }
  func.func @transform_3(%arg0: i32) -> (i32, i32) {
    %c0_i32 = arith.constant 0 : i32
    %c0_i32_0 = arith.constant 0 : i32
    return %arg0, %c0_i32 : i32, i32
  }
}

module attributes {stable_mosaic.version = 11 : i64} {
  func.func @_matmul_bias_act_kernel(%arg0: i32, %arg1: memref<512x576xbf16, #tpu.memory_space<vmem>>, %arg2: memref<576x64xbf16, #tpu.memory_space<vmem>>, %arg3: memref<1x64xf32, #tpu.memory_space<vmem>>, %arg4: memref<512x64xf32, #tpu.memory_space<vmem>>) attributes {dimension_semantics = [#tpu.dimension_semantics<parallel>], iteration_bounds = array<i64: 1>, scalar_prefetch = 0 : i64, scratch_operands = 0 : i64, tpu.core_type = #tpu.core_type<tc>, window_params = [{transform_indices = @transform_0, window_bounds = array<i64: 512, 576>}, {pipeline_mode = #tpu.pipeline_mode<synchronous>, transform_indices = @transform_1, window_bounds = array<i64: 576, 64>}, {pipeline_mode = #tpu.pipeline_mode<synchronous>, transform_indices = @transform_2, window_bounds = array<i64: 1, 64>}, {transform_indices = @transform_3, window_bounds = array<i64: 512, 64>}]} {
    %c0 = arith.constant 0 : index
    %c0_0 = arith.constant 0 : index
    %0 = vector.load %arg1[%c0, %c0_0] : memref<512x576xbf16, #tpu.memory_space<vmem>>, vector<512x576xbf16>
    %c0_1 = arith.constant 0 : index
    %c0_2 = arith.constant 0 : index
    %1 = vector.load %arg2[%c0_1, %c0_2] : memref<576x64xbf16, #tpu.memory_space<vmem>>, vector<576x64xbf16>
    %cst = arith.constant dense<0.000000e+00> : vector<512x64xf32>
    %2 = tpu.matmul %0, %1, %cst {dimension_numbers = #tpu.dot_dimension_numbers<[1], [0], [0], [1], [0, 0, 1, 1], [], []>} : vector<512x576xbf16>, vector<576x64xbf16>, vector<512x64xf32> -> vector<512x64xf32>
    %c0_3 = arith.constant 0 : index
    %c0_4 = arith.constant 0 : index
    %3 = vector.load %arg3[%c0_3, %c0_4] : memref<1x64xf32, #tpu.memory_space<vmem>>, vector<1x64xf32>
    %4 = vector.broadcast %3 : vector<1x64xf32> to vector<512x64xf32>
    %5 = arith.addf %2, %4 : vector<512x64xf32>
    %cst_5 = arith.constant 0.000000e+00 : f32
    %6 = vector.broadcast %cst_5 : f32 to vector<512x64xf32>
    %7 = arith.maximumf %5, %6 : vector<512x64xf32>
    %c0_6 = arith.constant 0 : index
    %c0_7 = arith.constant 0 : index
    %8 = vector.load %arg4[%c0_6, %c0_7] : memref<512x64xf32, #tpu.memory_space<vmem>>, vector<512x64xf32>
    tpu.vector_store %arg4[%c0_6, %c0_7], %7 {strides = array<i32>} : memref<512x64xf32, #tpu.memory_space<vmem>>, vector<512x64xf32>,
    return
  }
  func.func @transform_0(%arg0: i32) -> (i32, i32) {
    %c0_i32 = arith.constant 0 : i32
    %c0_i32_0 = arith.constant 0 : i32
    return %arg0, %c0_i32 : i32, i32
  }
  func.func @transform_1(%arg0: i32) -> (i32, i32) {
    %c0_i32 = arith.constant 0 : i32
    %c0_i32_0 = arith.constant 0 : i32
    %c0_i32_1 = arith.constant 0 : i32
    return %c0_i32, %c0_i32_0 : i32, i32
  }
  func.func @transform_2(%arg0: i32) -> (i32, i32) {
    %c0_i32 = arith.constant 0 : i32
    %c0_i32_0 = arith.constant 0 : i32
    %c0_i32_1 = arith.constant 0 : i32
    return %c0_i32, %c0_i32_0 : i32, i32
  }
  func.func @transform_3(%arg0: i32) -> (i32, i32) {
    %c0_i32 = arith.constant 0 : i32
    %c0_i32_0 = arith.constant 0 : i32
    return %arg0, %c0_i32 : i32, i32
  }
}

module attributes {stable_mosaic.version = 11 : i64} {
  func.func @_matmul_bias_act_kernel(%arg0: i32, %arg1: memref<512x576xbf16, #tpu.memory_space<vmem>>, %arg2: memref<576x32xbf16, #tpu.memory_space<vmem>>, %arg3: memref<1x32xf32, #tpu.memory_space<vmem>>, %arg4: memref<512x32xf32, #tpu.memory_space<vmem>>) attributes {dimension_semantics = [#tpu.dimension_semantics<parallel>], iteration_bounds = array<i64: 1>, scalar_prefetch = 0 : i64, scratch_operands = 0 : i64, tpu.core_type = #tpu.core_type<tc>, window_params = [{transform_indices = @transform_0, window_bounds = array<i64: 512, 576>}, {pipeline_mode = #tpu.pipeline_mode<synchronous>, transform_indices = @transform_1, window_bounds = array<i64: 576, 32>}, {pipeline_mode = #tpu.pipeline_mode<synchronous>, transform_indices = @transform_2, window_bounds = array<i64: 1, 32>}, {transform_indices = @transform_3, window_bounds = array<i64: 512, 32>}]} {
    %c0 = arith.constant 0 : index
    %c0_0 = arith.constant 0 : index
    %0 = vector.load %arg1[%c0, %c0_0] : memref<512x576xbf16, #tpu.memory_space<vmem>>, vector<512x576xbf16>
    %c0_1 = arith.constant 0 : index
    %c0_2 = arith.constant 0 : index
    %1 = vector.load %arg2[%c0_1, %c0_2] : memref<576x32xbf16, #tpu.memory_space<vmem>>, vector<576x32xbf16>
    %cst = arith.constant dense<0.000000e+00> : vector<512x32xf32>
    %2 = tpu.matmul %0, %1, %cst {dimension_numbers = #tpu.dot_dimension_numbers<[1], [0], [0], [1], [0, 0, 1, 1], [], []>} : vector<512x576xbf16>, vector<576x32xbf16>, vector<512x32xf32> -> vector<512x32xf32>
    %c0_3 = arith.constant 0 : index
    %c0_4 = arith.constant 0 : index
    %3 = vector.load %arg3[%c0_3, %c0_4] : memref<1x32xf32, #tpu.memory_space<vmem>>, vector<1x32xf32>
    %4 = vector.broadcast %3 : vector<1x32xf32> to vector<512x32xf32>
    %5 = arith.addf %2, %4 : vector<512x32xf32>
    %cst_5 = arith.constant 0.000000e+00 : f32
    %6 = vector.broadcast %cst_5 : f32 to vector<512x32xf32>
    %7 = arith.maximumf %5, %6 : vector<512x32xf32>
    %c0_6 = arith.constant 0 : index
    %c0_7 = arith.constant 0 : index
    %8 = vector.load %arg4[%c0_6, %c0_7] : memref<512x32xf32, #tpu.memory_space<vmem>>, vector<512x32xf32>
    tpu.vector_store %arg4[%c0_6, %c0_7], %7 {strides = array<i32>} : memref<512x32xf32, #tpu.memory_space<vmem>>, vector<512x32xf32>,
    return
  }
  func.func @transform_0(%arg0: i32) -> (i32, i32) {
    %c0_i32 = arith.constant 0 : i32
    %c0_i32_0 = arith.constant 0 : i32
    return %arg0, %c0_i32 : i32, i32
  }
  func.func @transform_1(%arg0: i32) -> (i32, i32) {
    %c0_i32 = arith.constant 0 : i32
    %c0_i32_0 = arith.constant 0 : i32
    %c0_i32_1 = arith.constant 0 : i32
    return %c0_i32, %c0_i32_0 : i32, i32
  }
  func.func @transform_2(%arg0: i32) -> (i32, i32) {
    %c0_i32 = arith.constant 0 : i32
    %c0_i32_0 = arith.constant 0 : i32
    %c0_i32_1 = arith.constant 0 : i32
    return %c0_i32, %c0_i32_0 : i32, i32
  }
  func.func @transform_3(%arg0: i32) -> (i32, i32) {
    %c0_i32 = arith.constant 0 : i32
    %c0_i32_0 = arith.constant 0 : i32
    return %arg0, %c0_i32 : i32, i32
  }
}

module attributes {stable_mosaic.version = 11 : i64} {
  func.func @_matmul_bias_act_kernel(%arg0: i32, %arg1: memref<512x288xbf16, #tpu.memory_space<vmem>>, %arg2: memref<288x32xbf16, #tpu.memory_space<vmem>>, %arg3: memref<1x32xf32, #tpu.memory_space<vmem>>, %arg4: memref<512x32xf32, #tpu.memory_space<vmem>>) attributes {dimension_semantics = [#tpu.dimension_semantics<parallel>], iteration_bounds = array<i64: 1>, scalar_prefetch = 0 : i64, scratch_operands = 0 : i64, tpu.core_type = #tpu.core_type<tc>, window_params = [{transform_indices = @transform_0, window_bounds = array<i64: 512, 288>}, {pipeline_mode = #tpu.pipeline_mode<synchronous>, transform_indices = @transform_1, window_bounds = array<i64: 288, 32>}, {pipeline_mode = #tpu.pipeline_mode<synchronous>, transform_indices = @transform_2, window_bounds = array<i64: 1, 32>}, {transform_indices = @transform_3, window_bounds = array<i64: 512, 32>}]} {
    %c0 = arith.constant 0 : index
    %c0_0 = arith.constant 0 : index
    %0 = vector.load %arg1[%c0, %c0_0] : memref<512x288xbf16, #tpu.memory_space<vmem>>, vector<512x288xbf16>
    %c0_1 = arith.constant 0 : index
    %c0_2 = arith.constant 0 : index
    %1 = vector.load %arg2[%c0_1, %c0_2] : memref<288x32xbf16, #tpu.memory_space<vmem>>, vector<288x32xbf16>
    %cst = arith.constant dense<0.000000e+00> : vector<512x32xf32>
    %2 = tpu.matmul %0, %1, %cst {dimension_numbers = #tpu.dot_dimension_numbers<[1], [0], [0], [1], [0, 0, 1, 1], [], []>} : vector<512x288xbf16>, vector<288x32xbf16>, vector<512x32xf32> -> vector<512x32xf32>
    %c0_3 = arith.constant 0 : index
    %c0_4 = arith.constant 0 : index
    %3 = vector.load %arg3[%c0_3, %c0_4] : memref<1x32xf32, #tpu.memory_space<vmem>>, vector<1x32xf32>
    %4 = vector.broadcast %3 : vector<1x32xf32> to vector<512x32xf32>
    %5 = arith.addf %2, %4 : vector<512x32xf32>
    %c0_5 = arith.constant 0 : index
    %c0_6 = arith.constant 0 : index
    %6 = vector.load %arg4[%c0_5, %c0_6] : memref<512x32xf32, #tpu.memory_space<vmem>>, vector<512x32xf32>
    tpu.vector_store %arg4[%c0_5, %c0_6], %5 {strides = array<i32>} : memref<512x32xf32, #tpu.memory_space<vmem>>, vector<512x32xf32>,
    return
  }
  func.func @transform_0(%arg0: i32) -> (i32, i32) {
    %c0_i32 = arith.constant 0 : i32
    %c0_i32_0 = arith.constant 0 : i32
    return %arg0, %c0_i32 : i32, i32
  }
  func.func @transform_1(%arg0: i32) -> (i32, i32) {
    %c0_i32 = arith.constant 0 : i32
    %c0_i32_0 = arith.constant 0 : i32
    %c0_i32_1 = arith.constant 0 : i32
    return %c0_i32, %c0_i32_0 : i32, i32
  }
  func.func @transform_2(%arg0: i32) -> (i32, i32) {
    %c0_i32 = arith.constant 0 : i32
    %c0_i32_0 = arith.constant 0 : i32
    %c0_i32_1 = arith.constant 0 : i32
    return %c0_i32, %c0_i32_0 : i32, i32
  }
  func.func @transform_3(%arg0: i32) -> (i32, i32) {
    %c0_i32 = arith.constant 0 : i32
    %c0_i32_0 = arith.constant 0 : i32
    return %arg0, %c0_i32 : i32, i32
  }
}

</mosaic_0001>

<bundles_post_ra>
// kernel: espcn_forward.4
= control target key start
LH: loop header
LB: loop body
LE: loop exit
PB: predicated region body
PF: predicated region fallthrough
CT: control target
= control target key end

     0   :  { %vm382_vm0 = vcmask 1044480   ;;  %vm383_vm1 = vcmask 1045504   ;;  %v1040_v1 = vmov 65535   ;;  %vm285_vm2 = vcmask 613376   ;;  %s1529_s1 = inlined_call_operand.vmem [shape: bf16[75,64], index: 1, kind: input, shape index: {}]   ;;  %s1530_s0 = inlined_call_operand.vmem [shape: bf16[512,75], index: 0, kind: input, shape index: {}]   ;;  %s1531_s2 = inlined_call_operand.vmem [shape: f32[1,64], index: 2, kind: input, shape index: {}]   ;;  %s1532_s3 = inlined_call_operand.vmem [shape: f32[512,64], index: 3, kind: output, shape index: {}]  }
   0x1   :  { %v1003_v0 = vld [vmem:[%s1529_s1 + $0x20] sm:$0x3f]   ;;  %v384_v2 = vsel %vm382_vm0, 4294967295, %v1040_v1  ;;  %v1004_v5 = vld [vmem:[%s1529_s1 + $0x18] sm:$0xff]   ;;  %v1005_v8 = vld [vmem:[%s1529_s1 + $0x10] sm:$0xff]   ;;  %vm742_vm3 = vcmask 523264  }
   0x2   :  { %v385_v3 = vsel %vm383_vm1, %v384_v2, 0  ;;  %v1008_v6 = vld [vmem:[%s1530_s0] sm:$0xff]   ;;  %v1006_v9 = vld [vmem:[%s1529_s1 + $0x8] sm:$0xff]   ;;  %v1012_v13 = vld [vmem:[%s1530_s0 + $0x10] sm:$0xff]  }
   0x3   :  { %v387_v4 = vand.u32 %v1003_v0, %v385_v3  ;;  %v1009_v7 = vld [vmem:[%s1530_s0 + $0x80] sm:$0xff]   ;;  %928 = vmatprep.mubr.msk.bf16.mxu0 %vm285_vm2, %v1008_v6  ;;  %v1010_v11 = vld [vmem:[%s1530_s0 + $0x8] sm:$0xff]   ;;  %v1013_v14 = vld [vmem:[%s1530_s0 + $0x90] sm:$0xff]  }
   0x4   :  { %960 = vmatprep.mubr.msk.bf16.mxu1 %vm285_vm2, %v1009_v7  ;;  %v1007_v10 = vld [vmem:[%s1529_s1] sm:$0xff]   ;;  %v1011_v12 = vld [vmem:[%s1530_s0 + $0x88] sm:$0xff]   ;;  %v1014_v15 = vld [vmem:[%s1530_s0 + $0x18] sm:$0xff]  }
   0x5   :  { %918 = vmatprep.subr.bf16.mxu0 %v387_v4  ;;  %992 = vmatprep.subr.bf16.mxu1 %v387_v4  ;;  %v1015_v16 = vld [vmem:[%s1530_s0 + $0x98] sm:$0xff]   ;;  %v1016_v17 = vld [vmem:[%s1530_s0 + $0x20] sm:$0xff]   ;;  %v1018_v19 = vld [vmem:[%s1530_s0 + $0x28] sm:$0xff]  }
   0x6   :  { %919 = vmatpush3.bf16.msra.mxu0 %v387_v4  ;;  %997 = vmatpush3.bf16.msra.mxu1 %v387_v4  ;;  %v1017_v18 = vld [vmem:[%s1530_s0 + $0xa0] sm:$0xff]   ;;  %v1019_v20 = vld [vmem:[%s1530_s0 + $0xa8] sm:$0xff]   ;;  %v1020_v21 = vld [vmem:[%s1530_s0 + $0x30] sm:$0xff]  }
   0x7   :  { %920 = vmatprep.subr.bf16.mxu0 %v1004_v5  ;;  %993 = vmatprep.subr.bf16.mxu1 %v1004_v5  ;;  %v1021_v22 = vld [vmem:[%s1530_s0 + $0xb0] sm:$0xff]   ;;  %v1022_v23 = vld [vmem:[%s1530_s0 + $0x38] sm:$0xff]   ;;  %v1024_v25 = vld [vmem:[%s1530_s0 + $0x40] sm:$0xff]  }
   0x8   :  { %v1023_v24 = vld [vmem:[%s1530_s0 + $0xb8] sm:$0xff]   ;;  %v1025_v26 = vld [vmem:[%s1530_s0 + $0xc0] sm:$0xff]   ;;  %v1026_v27 = vld [vmem:[%s1530_s0 + $0x48] sm:$0xff]  }
   0x9   :  { %v1027_v28 = vld [vmem:[%s1530_s0 + $0xc8] sm:$0xff]   ;;  %v1028_v29 = vld [vmem:[%s1530_s0 + $0x50] sm:$0xff]   ;;  %v1030_v31 = vld [vmem:[%s1530_s0 + $0x58] sm:$0xff]  }
   0xa   :  { %921 = vmatpush3.bf16.msra.mxu0 %v1004_v5  ;;  %998 = vmatpush3.bf16.msra.mxu1 %v1004_v5  ;;  %v1029_v30 = vld [vmem:[%s1530_s0 + $0xd0] sm:$0xff]   ;;  %v1031_v32 = vld [vmem:[%s1530_s0 + $0xd8] sm:$0xff]   ;;  %v1032_v33 = vld [vmem:[%s1530_s0 + $0x60] sm:$0xff]  }
   0xb   :  { %922 = vmatprep.subr.bf16.mxu0 %v1005_v8  ;;  %994 = vmatprep.subr.bf16.mxu1 %v1005_v8  ;;  %v1033_v34 = vld [vmem:[%s1530_s0 + $0xe0] sm:$0xff]   ;;  %v1034_v35 = vld [vmem:[%s1530_s0 + $0x68] sm:$0xff]   ;;  %v1036_v37 = vld [vmem:[%s1530_s0 + $0x70] sm:$0xff]  }
   0xc   :  { %v1035_v36 = vld [vmem:[%s1530_s0 + $0xe8] sm:$0xff]   ;;  %v1037_v38 = vld [vmem:[%s1530_s0 + $0xf0] sm:$0xff]   ;;  %v1038_v39 = vld [vmem:[%s1530_s0 + $0x78] sm:$0xff]  }
   0xd   :  { %v1039_v40 = vld [vmem:[%s1530_s0 + $0xf8] sm:$0xff]   ;;  %v1207_v41 = vld [vmem:[%s1531_s2] ss:$0 sm:$0xff] }
   0xe   :  { %923 = vmatpush3.bf16.msra.mxu0 %v1005_v8  ;;  %999 = vmatpush3.bf16.msra.mxu1 %v1005_v8 }
   0xf   :  { %924 = vmatprep.subr.bf16.mxu0 %v1006_v9  ;;  %995 = vmatprep.subr.bf16.mxu1 %v1006_v9 }
  0x12   :  { %925 = vmatpush3.bf16.msra.mxu0 %v1006_v9  ;;  %1000 = vmatpush3.bf16.msra.mxu1 %v1006_v9 }
  0x13   :  { %926 = vmatprep.subr.bf16.mxu0 %v1007_v10  ;;  %996 = vmatprep.subr.bf16.mxu1 %v1007_v10 }
  0x16   :  { %927 = vmatpush3.bf16.msra.mxu0 %v1007_v10  ;;  %1001 = vmatpush3.bf16.msra.mxu1 %v1007_v10 }
  0x19   :  { %929 = vmatmul.mubr.msk.bf16.vlgmr.msra.gmra.mxu0 %vm285_vm2, %v1010_v11  ;;  %961 = vmatmul.mubr.msk.bf16.vlgmr.msra.gmra.mxu1 %vm285_vm2, %v1011_v12 }
  0x1a   :  { %932 = vmatprep.mubr.msk.bf16.mxu0 %vm285_vm2, %v1012_v13  ;;  %964 = vmatprep.mubr.msk.bf16.mxu1 %vm285_vm2, %v1013_v14 }
  0x21   :  { %933 = vmatmul.mubr.msk.bf16.gmra.mxu0 %vm285_vm2, %v1014_v15  ;;  %965 = vmatmul.mubr.msk.bf16.gmra.mxu1 %vm285_vm2, %v1015_v16 }
  0x22   :  { %936 = vmatprep.mubr.msk.bf16.mxu0 %vm285_vm2, %v1016_v17  ;;  %968 = vmatprep.mubr.msk.bf16.mxu1 %vm285_vm2, %v1017_v18 }
  0x29   :  { %937 = vmatmul.mubr.msk.bf16.gmra.mxu0 %vm285_vm2, %v1018_v19  ;;  %969 = vmatmul.mubr.msk.bf16.gmra.mxu1 %vm285_vm2, %v1019_v20 }
  0x2a   :  { %940 = vmatprep.mubr.msk.bf16.mxu0 %vm285_vm2, %v1020_v21  ;;  %972 = vmatprep.mubr.msk.bf16.mxu1 %vm285_vm2, %v1021_v22 }
  0x31   :  { %941 = vmatmul.mubr.msk.bf16.gmra.mxu0 %vm285_vm2, %v1022_v23  ;;  %973 = vmatmul.mubr.msk.bf16.gmra.mxu1 %vm285_vm2, %v1023_v24 }
  0x32   :  { %944 = vmatprep.mubr.msk.bf16.mxu0 %vm285_vm2, %v1024_v25  ;;  %976 = vmatprep.mubr.msk.bf16.mxu1 %vm285_vm2, %v1025_v26 }
  0x39   :  { %945 = vmatmul.mubr.msk.bf16.gmra.mxu0 %vm285_vm2, %v1026_v27  ;;  %977 = vmatmul.mubr.msk.bf16.gmra.mxu1 %vm285_vm2, %v1027_v28 }
  0x3a   :  { %948 = vmatprep.mubr.msk.bf16.mxu0 %vm285_vm2, %v1028_v29  ;;  %980 = vmatprep.mubr.msk.bf16.mxu1 %vm285_vm2, %v1029_v30 }
  0x41   :  { %949 = vmatmul.mubr.msk.bf16.gmra.mxu0 %vm285_vm2, %v1030_v31  ;;  %981 = vmatmul.mubr.msk.bf16.gmra.mxu1 %vm285_vm2, %v1031_v32 }
  0x42   :  { %952 = vmatprep.mubr.msk.bf16.mxu0 %vm285_vm2, %v1032_v33  ;;  %984 = vmatprep.mubr.msk.bf16.mxu1 %vm285_vm2, %v1033_v34 }
  0x49   :  { %953 = vmatmul.mubr.msk.bf16.gmra.mxu0 %vm285_vm2, %v1034_v35  ;;  %985 = vmatmul.mubr.msk.bf16.gmra.mxu1 %vm285_vm2, %v1035_v36 }
  0x4a   :  { %956 = vmatprep.mubr.msk.bf16.mxu0 %vm285_vm2, %v1036_v37  ;;  %988 = vmatprep.mubr.msk.bf16.mxu1 %vm285_vm2, %v1037_v38 }
  0x51   :  { %957 = vmatmul.mubr.msk.bf16.gmra.mxu0 %vm285_vm2, %v1038_v39  ;;  %989 = vmatmul.mubr.msk.bf16.gmra.mxu1 %vm285_vm2, %v1039_v40 }
  0xd9   :  { %v930_v42 = vpop.f32.mrf.mxu0  ;;  %v962_v43 = vpop.f32.mrf.mxu1 }
  0xda   :  { %v432_v44 = vadd.f32 %v930_v42, %v1207_v41  ;;  %v560_v45 = vadd.f32 %v962_v43, %v1207_v41 }
  0xdb   :  { %v423_v46 = vpop.f32.mrf.mxu0  ;;  %v551_v47 = vpop.f32.mrf.mxu1 }
  0xdc   :  { %v680_v48 = vmax.f32 %v432_v44, 0.0  ;;  %v712_v49 = vmax.f32 %v560_v45, 0.0  ;;  %v424_v50 = vadd.f32 %v1207_v41, %v423_v46  ;;  %v552_v51 = vadd.f32 %v1207_v41, %v551_v47 }
  0xdd   :  { %v931_v52 = vpop.f32.mrf.mxu0  ;;  %v963_v53 = vpop.f32.mrf.mxu1 }
  0xde   :  { %745 = vst.msk [vmem:[%s1532_s3 + $0x10] sm:$0xff] %vm742_vm3, %v680_v48  ;;  %777 = vst.msk [vmem:[%s1532_s3 + $0x110] sm:$0xff] %vm742_vm3, %v712_v49  ;;  %v678_v54 = vmax.f32 %v424_v50, 0.0  ;;  %v710_v55 = vmax.f32 %v552_v51, 0.0  ;;  %v435_v56 = vadd.f32 %v931_v52, %v1207_v41  ;;  %v563_v57 = vadd.f32 %v963_v53, %v1207_v41 }
  0xdf   :  { %v426_v58 = vpop.f32.mrf.mxu0  ;;  %v554_v59 = vpop.f32.mrf.mxu1 }
  0xe0   :  { %743 = vst.msk [vmem:[%s1532_s3] sm:$0xff] %vm742_vm3, %v678_v54  ;;  %775 = vst.msk [vmem:[%s1532_s3 + $0x100] sm:$0xff] %vm742_vm3, %v710_v55  ;;  %v681_v60 = vmax.f32 %v435_v56, 0.0  ;;  %v713_v61 = vmax.f32 %v563_v57, 0.0  ;;  %v427_v62 = vadd.f32 %v1207_v41, %v426_v58  ;;  %v555_v63 = vadd.f32 %v1207_v41, %v554_v59 }
  0xe1   :  { %v934_v0 = vpop.f32.mrf.mxu0  ;;  %v966_v1 = vpop.f32.mrf.mxu1 }
  0xe2   :  { %746 = vst.msk [vmem:[%s1532_s3 + $0x18] sm:$0xff] %vm742_vm3, %v681_v60  ;;  %778 = vst.msk [vmem:[%s1532_s3 + $0x118] sm:$0xff] %vm742_vm3, %v713_v61  ;;  %v679_v2 = vmax.f32 %v427_v62, 0.0  ;;  %v711_v3 = vmax.f32 %v555_v63, 0.0  ;;  %v448_v4 = vadd.f32 %v934_v0, %v1207_v41  ;;  %v576_v5 = vadd.f32 %v966_v1, %v1207_v41 }
  0xe3   :  { %v439_v6 = vpop.f32.mrf.mxu0  ;;  %v567_v7 = vpop.f32.mrf.mxu1 }
  0xe4   :  { %744 = vst.msk [vmem:[%s1532_s3 + $0x8] sm:$0xff] %vm742_vm3, %v679_v2  ;;  %776 = vst.msk [vmem:[%s1532_s3 + $0x108] sm:$0xff] %vm742_vm3, %v711_v3  ;;  %v684_v8 = vmax.f32 %v448_v4, 0.0  ;;  %v716_v9 = vmax.f32 %v576_v5, 0.0  ;;  %v440_v10 = vadd.f32 %v1207_v41, %v439_v6  ;;  %v568_v11 = vadd.f32 %v1207_v41, %v567_v7 }
  0xe5   :  { %v935_v12 = vpop.f32.mrf.mxu0  ;;  %v967_v13 = vpop.f32.mrf.mxu1 }
  0xe6   :  { %749 = vst.msk [vmem:[%s1532_s3 + $0x30] sm:$0xff] %vm742_vm3, %v684_v8  ;;  %781 = vst.msk [vmem:[%s1532_s3 + $0x130] sm:$0xff] %vm742_vm3, %v716_v9  ;;  %v682_v14 = vmax.f32 %v440_v10, 0.0  ;;  %v714_v15 = vmax.f32 %v568_v11, 0.0  ;;  %v451_v16 = vadd.f32 %v935_v12, %v1207_v41  ;;  %v579_v17 = vadd.f32 %v967_v13, %v1207_v41 }
  0xe7   :  { %v442_v18 = vpop.f32.mrf.mxu0  ;;  %v570_v19 = vpop.f32.mrf.mxu1 }
  0xe8   :  { %747 = vst.msk [vmem:[%s1532_s3 + $0x20] sm:$0xff] %vm742_vm3, %v682_v14  ;;  %779 = vst.msk [vmem:[%s1532_s3 + $0x120] sm:$0xff] %vm742_vm3, %v714_v15  ;;  %v685_v20 = vmax.f32 %v451_v16, 0.0  ;;  %v717_v21 = vmax.f32 %v579_v17, 0.0  ;;  %v443_v22 = vadd.f32 %v1207_v41, %v442_v18  ;;  %v571_v23 = vadd.f32 %v1207_v41, %v570_v19 }
  0xe9   :  { %v938_v24 = vpop.f32.mrf.mxu0  ;;  %v970_v25 = vpop.f32.mrf.mxu1 }
  0xea   :  { %750 = vst.msk [vmem:[%s1532_s3 + $0x38] sm:$0xff] %vm742_vm3, %v685_v20  ;;  %782 = vst.msk [vmem:[%s1532_s3 + $0x138] sm:$0xff] %vm742_vm3, %v717_v21  ;;  %v683_v26 = vmax.f32 %v443_v22, 0.0  ;;  %v715_v27 = vmax.f32 %v571_v23, 0.0  ;;  %v464_v28 = vadd.f32 %v938_v24, %v1207_v41  ;;  %v592_v29 = vadd.f32 %v970_v25, %v1207_v41 }
  0xeb   :  { %v455_v30 = vpop.f32.mrf.mxu0  ;;  %v583_v31 = vpop.f32.mrf.mxu1 }
  0xec   :  { %748 = vst.msk [vmem:[%s1532_s3 + $0x28] sm:$0xff] %vm742_vm3, %v683_v26  ;;  %780 = vst.msk [vmem:[%s1532_s3 + $0x128] sm:$0xff] %vm742_vm3, %v715_v27  ;;  %v688_v32 = vmax.f32 %v464_v28, 0.0  ;;  %v720_v33 = vmax.f32 %v592_v29, 0.0  ;;  %v456_v34 = vadd.f32 %v1207_v41, %v455_v30  ;;  %v584_v35 = vadd.f32 %v1207_v41, %v583_v31 }
  0xed   :  { %v939_v36 = vpop.f32.mrf.mxu0  ;;  %v971_v37 = vpop.f32.mrf.mxu1 }
  0xee   :  { %753 = vst.msk [vmem:[%s1532_s3 + $0x50] sm:$0xff] %vm742_vm3, %v688_v32  ;;  %785 = vst.msk [vmem:[%s1532_s3 + $0x150] sm:$0xff] %vm742_vm3, %v720_v33  ;;  %v686_v38 = vmax.f32 %v456_v34, 0.0  ;;  %v718_v39 = vmax.f32 %v584_v35, 0.0  ;;  %v467_v40 = vadd.f32 %v939_v36, %v1207_v41  ;;  %v595_v42 = vadd.f32 %v971_v37, %v1207_v41 }
  0xef   :  { %v458_v43 = vpop.f32.mrf.mxu0  ;;  %v586_v44 = vpop.f32.mrf.mxu1 }
  0xf0   :  { %751 = vst.msk [vmem:[%s1532_s3 + $0x40] sm:$0xff] %vm742_vm3, %v686_v38  ;;  %783 = vst.msk [vmem:[%s1532_s3 + $0x140] sm:$0xff] %vm742_vm3, %v718_v39  ;;  %v689_v45 = vmax.f32 %v467_v40, 0.0  ;;  %v721_v46 = vmax.f32 %v595_v42, 0.0  ;;  %v459_v47 = vadd.f32 %v1207_v41, %v458_v43  ;;  %v587_v48 = vadd.f32 %v1207_v41, %v586_v44 }
  0xf1   :  { %v942_v49 = vpop.f32.mrf.mxu0  ;;  %v974_v50 = vpop.f32.mrf.mxu1 }
  0xf2   :  { %754 = vst.msk [vmem:[%s1532_s3 + $0x58] sm:$0xff] %vm742_vm3, %v689_v45  ;;  %786 = vst.msk [vmem:[%s1532_s3 + $0x158] sm:$0xff] %vm742_vm3, %v721_v46  ;;  %v687_v51 = vmax.f32 %v459_v47, 0.0  ;;  %v719_v52 = vmax.f32 %v587_v48, 0.0  ;;  %v480_v53 = vadd.f32 %v942_v49, %v1207_v41  ;;  %v608_v54 = vadd.f32 %v974_v50, %v1207_v41 }
  0xf3   :  { %v471_v55 = vpop.f32.mrf.mxu0  ;;  %v599_v56 = vpop.f32.mrf.mxu1 }
  0xf4   :  { %752 = vst.msk [vmem:[%s1532_s3 + $0x48] sm:$0xff] %vm742_vm3, %v687_v51  ;;  %784 = vst.msk [vmem:[%s1532_s3 + $0x148] sm:$0xff] %vm742_vm3, %v719_v52  ;;  %v692_v57 = vmax.f32 %v480_v53, 0.0  ;;  %v724_v58 = vmax.f32 %v608_v54, 0.0  ;;  %v472_v59 = vadd.f32 %v1207_v41, %v471_v55  ;;  %v600_v60 = vadd.f32 %v1207_v41, %v599_v56 }
  0xf5   :  { %v943_v61 = vpop.f32.mrf.mxu0  ;;  %v975_v62 = vpop.f32.mrf.mxu1 }
  0xf6   :  { %757 = vst.msk [vmem:[%s1532_s3 + $0x70] sm:$0xff] %vm742_vm3, %v692_v57  ;;  %789 = vst.msk [vmem:[%s1532_s3 + $0x170] sm:$0xff] %vm742_vm3, %v724_v58  ;;  %v690_v63 = vmax.f32 %v472_v59, 0.0  ;;  %v722_v0 = vmax.f32 %v600_v60, 0.0  ;;  %v483_v1 = vadd.f32 %v943_v61, %v1207_v41  ;;  %v611_v2 = vadd.f32 %v975_v62, %v1207_v41 }
  0xf7   :  { %v474_v3 = vpop.f32.mrf.mxu0  ;;  %v602_v4 = vpop.f32.mrf.mxu1 }
  0xf8   :  { %755 = vst.msk [vmem:[%s1532_s3 + $0x60] sm:$0xff] %vm742_vm3, %v690_v63  ;;  %787 = vst.msk [vmem:[%s1532_s3 + $0x160] sm:$0xff] %vm742_vm3, %v722_v0  ;;  %v693_v5 = vmax.f32 %v483_v1, 0.0  ;;  %v725_v6 = vmax.f32 %v611_v2, 0.0  ;;  %v475_v7 = vadd.f32 %v1207_v41, %v474_v3  ;;  %v603_v8 = vadd.f32 %v1207_v41, %v602_v4 }
  0xf9   :  { %v946_v9 = vpop.f32.mrf.mxu0  ;;  %v978_v10 = vpop.f32.mrf.mxu1 }
  0xfa   :  { %758 = vst.msk [vmem:[%s1532_s3 + $0x78] sm:$0xff] %vm742_vm3, %v693_v5  ;;  %790 = vst.msk [vmem:[%s1532_s3 + $0x178] sm:$0xff] %vm742_vm3, %v725_v6  ;;  %v691_v11 = vmax.f32 %v475_v7, 0.0  ;;  %v723_v12 = vmax.f32 %v603_v8, 0.0  ;;  %v496_v13 = vadd.f32 %v946_v9, %v1207_v41  ;;  %v624_v14 = vadd.f32 %v978_v10, %v1207_v41 }
  0xfb   :  { %v487_v15 = vpop.f32.mrf.mxu0  ;;  %v615_v16 = vpop.f32.mrf.mxu1 }
  0xfc   :  { %756 = vst.msk [vmem:[%s1532_s3 + $0x68] sm:$0xff] %vm742_vm3, %v691_v11  ;;  %788 = vst.msk [vmem:[%s1532_s3 + $0x168] sm:$0xff] %vm742_vm3, %v723_v12  ;;  %v696_v17 = vmax.f32 %v496_v13, 0.0  ;;  %v728_v18 = vmax.f32 %v624_v14, 0.0  ;;  %v488_v19 = vadd.f32 %v1207_v41, %v487_v15  ;;  %v616_v20 = vadd.f32 %v1207_v41, %v615_v16 }
  0xfd   :  { %v947_v21 = vpop.f32.mrf.mxu0  ;;  %v979_v22 = vpop.f32.mrf.mxu1 }
  0xfe   :  { %761 = vst.msk [vmem:[%s1532_s3 + $0x90] sm:$0xff] %vm742_vm3, %v696_v17  ;;  %793 = vst.msk [vmem:[%s1532_s3 + $0x190] sm:$0xff] %vm742_vm3, %v728_v18  ;;  %v694_v23 = vmax.f32 %v488_v19, 0.0  ;;  %v726_v24 = vmax.f32 %v616_v20, 0.0  ;;  %v499_v25 = vadd.f32 %v947_v21, %v1207_v41  ;;  %v627_v26 = vadd.f32 %v979_v22, %v1207_v41 }
  0xff   :  { %v490_v27 = vpop.f32.mrf.mxu0  ;;  %v618_v28 = vpop.f32.mrf.mxu1 }
 0x100   :  { %759 = vst.msk [vmem:[%s1532_s3 + $0x80] sm:$0xff] %vm742_vm3, %v694_v23  ;;  %791 = vst.msk [vmem:[%s1532_s3 + $0x180] sm:$0xff] %vm742_vm3, %v726_v24  ;;  %v697_v29 = vmax.f32 %v499_v25, 0.0  ;;  %v729_v30 = vmax.f32 %v627_v26, 0.0  ;;  %v491_v31 = vadd.f32 %v1207_v41, %v490_v27  ;;  %v619_v32 = vadd.f32 %v1207_v41, %v618_v28 }
 0x101   :  { %v950_v33 = vpop.f32.mrf.mxu0  ;;  %v982_v34 = vpop.f32.mrf.mxu1 }
 0x102   :  { %762 = vst.msk [vmem:[%s1532_s3 + $0x98] sm:$0xff] %vm742_vm3, %v697_v29  ;;  %794 = vst.msk [vmem:[%s1532_s3 + $0x198] sm:$0xff] %vm742_vm3, %v729_v30  ;;  %v695_v35 = vmax.f32 %v491_v31, 0.0  ;;  %v727_v36 = vmax.f32 %v619_v32, 0.0  ;;  %v512_v37 = vadd.f32 %v950_v33, %v1207_v41  ;;  %v640_v38 = vadd.f32 %v982_v34, %v1207_v41 }
 0x103   :  { %v503_v39 = vpop.f32.mrf.mxu0  ;;  %v631_v40 = vpop.f32.mrf.mxu1 }
 0x104   :  { %760 = vst.msk [vmem:[%s1532_s3 + $0x88] sm:$0xff] %vm742_vm3, %v695_v35  ;;  %792 = vst.msk [vmem:[%s1532_s3 + $0x188] sm:$0xff] %vm742_vm3, %v727_v36  ;;  %v700_v42 = vmax.f32 %v512_v37, 0.0  ;;  %v732_v43 = vmax.f32 %v640_v38, 0.0  ;;  %v504_v44 = vadd.f32 %v1207_v41, %v503_v39  ;;  %v632_v45 = vadd.f32 %v1207_v41, %v631_v40 }
 0x105   :  { %v951_v46 = vpop.f32.mrf.mxu0  ;;  %v983_v47 = vpop.f32.mrf.mxu1 }
 0x106   :  { %765 = vst.msk [vmem:[%s1532_s3 + $0xb0] sm:$0xff] %vm742_vm3, %v700_v42  ;;  %797 = vst.msk [vmem:[%s1532_s3 + $0x1b0] sm:$0xff] %vm742_vm3, %v732_v43  ;;  %v698_v48 = vmax.f32 %v504_v44, 0.0  ;;  %v730_v49 = vmax.f32 %v632_v45, 0.0  ;;  %v515_v50 = vadd.f32 %v951_v46, %v1207_v41  ;;  %v643_v51 = vadd.f32 %v983_v47, %v1207_v41 }
 0x107   :  { %v506_v52 = vpop.f32.mrf.mxu0  ;;  %v634_v53 = vpop.f32.mrf.mxu1 }
 0x108   :  { %763 = vst.msk [vmem:[%s1532_s3 + $0xa0] sm:$0xff] %vm742_vm3, %v698_v48  ;;  %795 = vst.msk [vmem:[%s1532_s3 + $0x1a0] sm:$0xff] %vm742_vm3, %v730_v49  ;;  %v701_v54 = vmax.f32 %v515_v50, 0.0  ;;  %v733_v55 = vmax.f32 %v643_v51, 0.0  ;;  %v507_v56 = vadd.f32 %v1207_v41, %v506_v52  ;;  %v635_v57 = vadd.f32 %v1207_v41, %v634_v53 }
 0x109   :  { %v954_v58 = vpop.f32.mrf.mxu0  ;;  %v986_v59 = vpop.f32.mrf.mxu1 }
 0x10a   :  { %766 = vst.msk [vmem:[%s1532_s3 + $0xb8] sm:$0xff] %vm742_vm3, %v701_v54  ;;  %798 = vst.msk [vmem:[%s1532_s3 + $0x1b8] sm:$0xff] %vm742_vm3, %v733_v55  ;;  %v699_v60 = vmax.f32 %v507_v56, 0.0  ;;  %v731_v61 = vmax.f32 %v635_v57, 0.0  ;;  %v528_v62 = vadd.f32 %v954_v58, %v1207_v41  ;;  %v656_v63 = vadd.f32 %v986_v59, %v1207_v41 }
 0x10b   :  { %v519_v0 = vpop.f32.mrf.mxu0  ;;  %v647_v1 = vpop.f32.mrf.mxu1 }
 0x10c   :  { %764 = vst.msk [vmem:[%s1532_s3 + $0xa8] sm:$0xff] %vm742_vm3, %v699_v60  ;;  %796 = vst.msk [vmem:[%s1532_s3 + $0x1a8] sm:$0xff] %vm742_vm3, %v731_v61  ;;  %v704_v2 = vmax.f32 %v528_v62, 0.0  ;;  %v736_v3 = vmax.f32 %v656_v63, 0.0  ;;  %v520_v4 = vadd.f32 %v1207_v41, %v519_v0  ;;  %v648_v5 = vadd.f32 %v1207_v41, %v647_v1 }
 0x10d   :  { %v955_v6 = vpop.f32.mrf.mxu0  ;;  %v987_v7 = vpop.f32.mrf.mxu1 }
 0x10e   :  { %769 = vst.msk [vmem:[%s1532_s3 + $0xd0] sm:$0xff] %vm742_vm3, %v704_v2  ;;  %801 = vst.msk [vmem:[%s1532_s3 + $0x1d0] sm:$0xff] %vm742_vm3, %v736_v3  ;;  %v702_v8 = vmax.f32 %v520_v4, 0.0  ;;  %v734_v9 = vmax.f32 %v648_v5, 0.0  ;;  %v531_v10 = vadd.f32 %v955_v6, %v1207_v41  ;;  %v659_v11 = vadd.f32 %v987_v7, %v1207_v41 }
 0x10f   :  { %v522_v12 = vpop.f32.mrf.mxu0  ;;  %v650_v13 = vpop.f32.mrf.mxu1 }
 0x110   :  { %767 = vst.msk [vmem:[%s1532_s3 + $0xc0] sm:$0xff] %vm742_vm3, %v702_v8  ;;  %799 = vst.msk [vmem:[%s1532_s3 + $0x1c0] sm:$0xff] %vm742_vm3, %v734_v9  ;;  %v705_v14 = vmax.f32 %v531_v10, 0.0  ;;  %v737_v15 = vmax.f32 %v659_v11, 0.0  ;;  %v523_v16 = vadd.f32 %v1207_v41, %v522_v12  ;;  %v651_v17 = vadd.f32 %v1207_v41, %v650_v13 }
 0x111   :  { %v958_v18 = vpop.f32.mrf.mxu0  ;;  %v990_v19 = vpop.f32.mrf.mxu1 }
 0x112   :  { %770 = vst.msk [vmem:[%s1532_s3 + $0xd8] sm:$0xff] %vm742_vm3, %v705_v14  ;;  %802 = vst.msk [vmem:[%s1532_s3 + $0x1d8] sm:$0xff] %vm742_vm3, %v737_v15  ;;  %v703_v20 = vmax.f32 %v523_v16, 0.0  ;;  %v735_v21 = vmax.f32 %v651_v17, 0.0  ;;  %v544_v22 = vadd.f32 %v958_v18, %v1207_v41  ;;  %v672_v23 = vadd.f32 %v990_v19, %v1207_v41 }
 0x113   :  { %v535_v24 = vpop.f32.mrf.mxu0  ;;  %v663_v25 = vpop.f32.mrf.mxu1 }
 0x114   :  { %768 = vst.msk [vmem:[%s1532_s3 + $0xc8] sm:$0xff] %vm742_vm3, %v703_v20  ;;  %800 = vst.msk [vmem:[%s1532_s3 + $0x1c8] sm:$0xff] %vm742_vm3, %v735_v21  ;;  %v708_v26 = vmax.f32 %v544_v22, 0.0  ;;  %v740_v27 = vmax.f32 %v672_v23, 0.0  ;;  %v536_v28 = vadd.f32 %v1207_v41, %v535_v24  ;;  %v664_v29 = vadd.f32 %v1207_v41, %v663_v25 }
 0x115   :  { %v959_v30 = vpop.f32.mrf.mxu0  ;;  %v991_v31 = vpop.f32.mrf.mxu1 }
 0x116   :  { %773 = vst.msk [vmem:[%s1532_s3 + $0xf0] sm:$0xff] %vm742_vm3, %v708_v26  ;;  %805 = vst.msk [vmem:[%s1532_s3 + $0x1f0] sm:$0xff] %vm742_vm3, %v740_v27  ;;  %v706_v32 = vmax.f32 %v536_v28, 0.0  ;;  %v738_v33 = vmax.f32 %v664_v29, 0.0  ;;  %v547_v34 = vadd.f32 %v959_v30, %v1207_v41  ;;  %v675_v35 = vadd.f32 %v991_v31, %v1207_v41 }
 0x117   :  { %v538_v36 = vpop.f32.mrf.mxu0  ;;  %v666_v37 = vpop.f32.mrf.mxu1 }
 0x118   :  { %771 = vst.msk [vmem:[%s1532_s3 + $0xe0] sm:$0xff] %vm742_vm3, %v706_v32  ;;  %803 = vst.msk [vmem:[%s1532_s3 + $0x1e0] sm:$0xff] %vm742_vm3, %v738_v33  ;;  %v709_v38 = vmax.f32 %v547_v34, 0.0  ;;  %v741_v39 = vmax.f32 %v675_v35, 0.0  ;;  %v539_v40 = vadd.f32 %v1207_v41, %v538_v36  ;;  %v667_v42 = vadd.f32 %v1207_v41, %v666_v37 }
 0x11a   :  { %774 = vst.msk [vmem:[%s1532_s3 + $0xf8] sm:$0xff] %vm742_vm3, %v709_v38  ;;  %806 = vst.msk [vmem:[%s1532_s3 + $0x1f8] sm:$0xff] %vm742_vm3, %v741_v39  ;;  %v707_v43 = vmax.f32 %v539_v40, 0.0  ;;  %v739_v44 = vmax.f32 %v667_v42, 0.0 }
 0x11c   :  { %772 = vst.msk [vmem:[%s1532_s3 + $0xe8] sm:$0xff] %vm742_vm3, %v707_v43  ;;  %804 = vst.msk [vmem:[%s1532_s3 + $0x1e8] sm:$0xff] %vm742_vm3, %v739_v44 }

// kernel: espcn_forward.5
= control target key start
LH: loop header
LB: loop body
LE: loop exit
PB: predicated region body
PF: predicated region fallthrough
CT: control target
= control target key end

     0   :  { %v3029_v0 = vmov 0   ;;  %vm1302_vm0 = vcmask 523264   ;;  %s4402_s1 = inlined_call_operand.vmem [shape: bf16[576,64], index: 1, kind: input, shape index: {}]   ;;  %s4403_s0 = inlined_call_operand.vmem [shape: bf16[512,576], index: 0, kind: input, shape index: {}]   ;;  %s4404_s2 = inlined_call_operand.vmem [shape: f32[1,64], index: 2, kind: input, shape index: {}]   ;;  %s4405_s3 = inlined_call_operand.vmem [shape: f32[512,64], index: 3, kind: output, shape index: {}]  }
   0x1   :  { %1399 = vmatprep.subr.bf16.mxu0 %v3029_v0  ;;  %2735 = vmatprep.subr.bf16.mxu1 %v3029_v0  ;;  %v2768_v1 = vld [vmem:[%s4402_s1 + $0x38] sm:$0xff]   ;;  %v2769_v2 = vld [vmem:[%s4402_s1 + $0x30] sm:$0xff]   ;;  %v2770_v3 = vld [vmem:[%s4402_s1 + $0x28] sm:$0xff]  }
   0x2   :  { %1400 = vmatpush1.bf16.msra.mxu0 %v2768_v1  ;;  %2751 = vmatpush1.bf16.msra.mxu1 %v2768_v1  ;;  %v2771_v4 = vld [vmem:[%s4402_s1 + $0x20] sm:$0xff]   ;;  %v2772_v5 = vld [vmem:[%s4402_s1 + $0x18] sm:$0xff]   ;;  %v2773_v7 = vld [vmem:[%s4402_s1 + $0x10] sm:$0xff]  }
   0x3   :  { %1401 = vmatprep.subr.bf16.mxu0 %v3029_v0  ;;  %2736 = vmatprep.subr.bf16.mxu1 %v3029_v0  ;;  %v2786_v6 = vld [vmem:[%s4403_s0 + $0x4] ss:$20 sps:$4 sm:$0xff]   ;;  %v2774_v9 = vld [vmem:[%s4402_s1 + $0x8] sm:$0xff]   ;;  %v2777_v12 = vld [vmem:[%s4402_s1 + $0x70] sm:$0xff]  }
   0x4   :  { %v2789_v8 = vld [vmem:[%s4403_s0 + $0x3c4] ss:$20 sps:$4 sm:$0xff]   ;;  %1431 = vmatprep.mubr.bf16.mxu0 %v2786_v6  ;;  %v2778_v13 = vld [vmem:[%s4402_s1 + $0x68] sm:$0xff]   ;;  %v2781_v16 = vld [vmem:[%s4402_s1 + $0x50] sm:$0xff]  }
   0x5   :  { %1623 = vmatprep.mubr.bf16.mxu1 %v2789_v8  ;;  %v2775_v10 = vld [vmem:[%s4402_s1] sm:$0xff]   ;;  %v2776_v11 = vld [vmem:[%s4402_s1 + $0x78] sm:$0xff]   ;;  %v2782_v17 = vld [vmem:[%s4402_s1 + $0x48] sm:$0xff]  }
   0x6   :  { %1402 = vmatpush1.bf16.msra.mxu0 %v2769_v2  ;;  %2752 = vmatpush1.bf16.msra.mxu1 %v2769_v2  ;;  %v2779_v14 = vld [vmem:[%s4402_s1 + $0x60] sm:$0xff]   ;;  %v2780_v15 = vld [vmem:[%s4402_s1 + $0x58] sm:$0xff]   ;;  %v2839_v25 = vld [vmem:[%s4402_s1 + $0x110] sm:$0xff]  }
   0x7   :  { %1403 = vmatprep.subr.bf16.mxu0 %v3029_v0  ;;  %2737 = vmatprep.subr.bf16.mxu1 %v3029_v0  ;;  %v2783_v18 = vld [vmem:[%s4402_s1 + $0x40] sm:$0xff]   ;;  %v2790_v19 = vld [vmem:[%s4402_s1 + $0x118] sm:$0xff]   ;;  %v2792_v26 = vld [vmem:[%s4402_s1 + $0xb0] sm:$0xff]  }
   0x8   :  { %v2784_v20 = vld [vmem:[%s4403_s0] ss:$20 sps:$4 sm:$0xff]   ;;  %v2791_v22 = vld [vmem:[%s4402_s1 + $0xb8] sm:$0xff]   ;;  %v2799_v29 = vld [vmem:[%s4402_s1 + $0xa8] sm:$0xff]  }
   0x9   :  { %v2787_v21 = vld [vmem:[%s4403_s0 + $0x3c0] ss:$20 sps:$4 sm:$0xff]   ;;  %v2797_v27 = vld [vmem:[%s4403_s0 + $0x28] ss:$20 sps:$4 sm:$0xff]   ;;  %v2805_v34 = vld [vmem:[%s4403_s0 + $0x50] ss:$20 sps:$4 sm:$0xff]  }
   0xa   :  { %1404 = vmatpush1.bf16.msra.mxu0 %v2770_v3  ;;  %2753 = vmatpush1.bf16.msra.mxu1 %v2770_v3  ;;  %v2793_v23 = vld [vmem:[%s4403_s0 + $0x2c] ss:$20 sps:$4 sm:$0xff]   ;;  %v2798_v28 = vld [vmem:[%s4403_s0 + $0x3e8] ss:$20 sps:$4 sm:$0xff]   ;;  %v2806_v35 = vld [vmem:[%s4403_s0 + $0x410] ss:$20 sps:$4 sm:$0xff]  }
   0xb   :  { %1405 = vmatprep.subr.bf16.mxu0 %v3029_v0  ;;  %2738 = vmatprep.subr.bf16.mxu1 %v3029_v0  ;;  %v2795_v24 = vld [vmem:[%s4403_s0 + $0x3ec] ss:$20 sps:$4 sm:$0xff]   ;;  %v2801_v31 = vld [vmem:[%s4403_s0 + $0x54] ss:$20 sps:$4 sm:$0xff]   ;;  %v2807_v36 = vld [vmem:[%s4402_s1 + $0x98] sm:$0xff]  }
   0xc   :  { %v2880_v30 = vld [vmem:[%s4402_s1 + $0x108] sm:$0xff]   ;;  %v2800_v33 = vld [vmem:[%s4402_s1 + $0xa0] sm:$0xff]   ;;  %v2809_v37 = vld [vmem:[%s4403_s0 + $0x7c] ss:$20 sps:$4 sm:$0xff]  }
   0xd   :  { %v2803_v32 = vld [vmem:[%s4403_s0 + $0x414] ss:$20 sps:$4 sm:$0xff]   ;;  %v2811_v38 = vld [vmem:[%s4403_s0 + $0x43c] ss:$20 sps:$4 sm:$0xff]   ;;  %v2813_v40 = vld [vmem:[%s4403_s0 + $0x78] ss:$20 sps:$4 sm:$0xff]  }
   0xe   :  { %1406 = vmatpush1.bf16.msra.mxu0 %v2771_v4  ;;  %2754 = vmatpush1.bf16.msra.mxu1 %v2771_v4  ;;  %v2808_v39 = vld [vmem:[%s4402_s1 + $0x90] sm:$0xff]   ;;  %v2814_v41 = vld [vmem:[%s4403_s0 + $0x438] ss:$20 sps:$4 sm:$0xff]   ;;  %v2917_v44 = vld [vmem:[%s4402_s1 + $0x100] sm:$0xff]  }
   0xf   :  { %1407 = vmatprep.subr.bf16.mxu0 %v3029_v0  ;;  %2739 = vmatprep.subr.bf16.mxu1 %v3029_v0  ;;  %v2815_v42 = vld [vmem:[%s4402_s1 + $0x88] sm:$0xff]   ;;  %v2817_v43 = vld [vmem:[%s4403_s0 + $0xa4] ss:$20 sps:$4 sm:$0xff]   ;;  %v2821_v47 = vld [vmem:[%s4403_s0 + $0xa0] ss:$20 sps:$4 sm:$0xff]  }
  0x10   :  { %v2819_v45 = vld [vmem:[%s4403_s0 + $0x464] ss:$20 sps:$4 sm:$0xff]   ;;  %v2822_v48 = vld [vmem:[%s4403_s0 + $0x460] ss:$20 sps:$4 sm:$0xff]   ;;  %v2829_v53 = vld [vmem:[%s4403_s0 + $0xc8] ss:$20 sps:$4 sm:$0xff]  }
  0x11   :  { %v2816_v46 = vld [vmem:[%s4402_s1 + $0x80] sm:$0xff]   ;;  %v2823_v49 = vld [vmem:[%s4402_s1 + $0xf8] sm:$0xff]   ;;  %v2824_v52 = vld [vmem:[%s4402_s1 + $0xf0] sm:$0xff]  }
  0x12   :  { %1408 = vmatpush1.bf16.msra.mxu0 %v2772_v5  ;;  %2755 = vmatpush1.bf16.msra.mxu1 %v2772_v5  ;;  %v2825_v50 = vld [vmem:[%s4403_s0 + $0xcc] ss:$20 sps:$4 sm:$0xff]   ;;  %v2830_v54 = vld [vmem:[%s4403_s0 + $0x488] ss:$20 sps:$4 sm:$0xff]   ;;  %v2837_v59 = vld [vmem:[%s4403_s0 + $0xf0] ss:$20 sps:$4 sm:$0xff]  }
  0x13   :  { %1409 = vmatprep.subr.bf16.mxu0 %v3029_v0  ;;  %2740 = vmatprep.subr.bf16.mxu1 %v3029_v0  ;;  %v2827_v51 = vld [vmem:[%s4403_s0 + $0x48c] ss:$20 sps:$4 sm:$0xff]   ;;  %v2833_v56 = vld [vmem:[%s4403_s0 + $0xf4] ss:$20 sps:$4 sm:$0xff]   ;;  %v2838_v60 = vld [vmem:[%s4403_s0 + $0x4b0] ss:$20 sps:$4 sm:$0xff]  }
  0x14   :  { %v2831_v55 = vld [vmem:[%s4402_s1 + $0xe8] sm:$0xff]   ;;  %v2832_v58 = vld [vmem:[%s4402_s1 + $0xe0] sm:$0xff]   ;;  %v2840_v61 = vld [vmem:[%s4402_s1 + $0xd8] sm:$0xff]  }
  0x15   :  { %v2835_v57 = vld [vmem:[%s4403_s0 + $0x4b4] ss:$20 sps:$4 sm:$0xff]   ;;  %v2842_v62 = vld [vmem:[%s4403_s0 + $0x11c] ss:$20 sps:$4 sm:$0xff]   ;;  %v2846_v2 = vld [vmem:[%s4403_s0 + $0x118] ss:$20 sps:$4 sm:$0xff]  }
  0x16   :  { %1410 = vmatpush1.bf16.msra.mxu0 %v2773_v7  ;;  %2756 = vmatpush1.bf16.msra.mxu1 %v2773_v7  ;;  %v2844_v63 = vld [vmem:[%s4403_s0 + $0x4dc] ss:$20 sps:$4 sm:$0xff]   ;;  %v2847_v3 = vld [vmem:[%s4403_s0 + $0x4d8] ss:$20 sps:$4 sm:$0xff]   ;;  %v2849_v7 = vld [vmem:[%s4402_s1 + $0xc0] sm:$0xff]  }
  0x17   :  { %1411 = vmatprep.subr.bf16.mxu0 %v3029_v0  ;;  %2741 = vmatprep.subr.bf16.mxu1 %v3029_v0  ;;  %v2841_v1 = vld [vmem:[%s4402_s1 + $0xd0] sm:$0xff]   ;;  %v2848_v4 = vld [vmem:[%s4402_s1 + $0xc8] sm:$0xff]   ;;  %v2850_v5 = vld [vmem:[%s4403_s0 + $0x144] ss:$20 sps:$4 sm:$0xff]  }
  0x18   :  { %v2854_v6 = vld [vmem:[%s4403_s0 + $0xc] ss:$20 sps:$4 sm:$0xff]   ;;  %v2852_v8 = vld [vmem:[%s4403_s0 + $0x8] ss:$20 sps:$4 sm:$0xff]  }
  0x1a   :  { %1412 = vmatpush1.bf16.msra.mxu0 %v2774_v9  ;;  %2757 = vmatpush1.bf16.msra.mxu1 %v2774_v9  ;;  %v2855_v9 = vld [vmem:[%s4403_s0 + $0x140] ss:$20 sps:$4 sm:$0xff]  }
  0x1b   :  { %1413 = vmatprep.subr.bf16.mxu0 %v3029_v0  ;;  %2742 = vmatprep.subr.bf16.mxu1 %v3029_v0 }
  0x1e   :  { %1414 = vmatpush1.bf16.msra.mxu0 %v2775_v10  ;;  %2758 = vmatpush1.bf16.msra.mxu1 %v2775_v10  ;;  %v2856_v10 = vld [vmem:[%s4403_s0 + $0x16c] ss:$20 sps:$4 sm:$0xff]  }
  0x1f   :  { %1415 = vmatprep.subr.bf16.mxu0 %v3029_v0  ;;  %2743 = vmatprep.subr.bf16.mxu1 %v3029_v0 }
  0x22   :  { %1416 = vmatpush2.bf16.msra.mxu0 %v2776_v11  ;;  %2759 = vmatpush2.bf16.msra.mxu1 %v2776_v11  ;;  %v2858_v11 = vld [vmem:[%s4403_s0 + $0x34] ss:$20 sps:$4 sm:$0xff]  }
  0x23   :  { %1417 = vmatprep.subr.bf16.mxu0 %v3029_v0  ;;  %2744 = vmatprep.subr.bf16.mxu1 %v3029_v0 }
  0x26   :  { %1418 = vmatpush2.bf16.msra.mxu0 %v2777_v12  ;;  %2760 = vmatpush2.bf16.msra.mxu1 %v2777_v12  ;;  %v2861_v12 = vld [vmem:[%s4403_s0 + $0x30] ss:$20 sps:$4 sm:$0xff]  }
  0x27   :  { %1419 = vmatprep.subr.bf16.mxu0 %v3029_v0  ;;  %2745 = vmatprep.subr.bf16.mxu1 %v3029_v0 }
  0x2a   :  { %1420 = vmatpush2.bf16.msra.mxu0 %v2778_v13  ;;  %2761 = vmatpush2.bf16.msra.mxu1 %v2778_v13  ;;  %v2862_v13 = vld [vmem:[%s4403_s0 + $0x194] ss:$20 sps:$4 sm:$0xff]  }
  0x2b   :  { %1421 = vmatprep.subr.bf16.mxu0 %v3029_v0  ;;  %2746 = vmatprep.subr.bf16.mxu1 %v3029_v0 }
  0x2e   :  { %1422 = vmatpush2.bf16.msra.mxu0 %v2779_v14  ;;  %2762 = vmatpush2.bf16.msra.mxu1 %v2779_v14  ;;  %v2864_v14 = vld [vmem:[%s4403_s0 + $0x5c] ss:$20 sps:$4 sm:$0xff]  }
  0x2f   :  { %1423 = vmatprep.subr.bf16.mxu0 %v3029_v0  ;;  %2747 = vmatprep.subr.bf16.mxu1 %v3029_v0 }
  0x32   :  { %1424 = vmatpush2.bf16.msra.mxu0 %v2780_v15  ;;  %2763 = vmatpush2.bf16.msra.mxu1 %v2780_v15  ;;  %v2866_v15 = vld [vmem:[%s4403_s0 + $0x190] ss:$20 sps:$4 sm:$0xff]  }
  0x33   :  { %1425 = vmatprep.subr.bf16.mxu0 %v3029_v0  ;;  %2748 = vmatprep.subr.bf16.mxu1 %v3029_v0 }
  0x36   :  { %1426 = vmatpush2.bf16.msra.mxu0 %v2781_v16  ;;  %2764 = vmatpush2.bf16.msra.mxu1 %v2781_v16  ;;  %v2867_v16 = vld [vmem:[%s4403_s0 + $0x58] ss:$20 sps:$4 sm:$0xff]  }
  0x37   :  { %1427 = vmatprep.subr.bf16.mxu0 %v3029_v0  ;;  %2749 = vmatprep.subr.bf16.mxu1 %v3029_v0 }
  0x3a   :  { %1428 = vmatpush2.bf16.msra.mxu0 %v2782_v17  ;;  %2765 = vmatpush2.bf16.msra.mxu1 %v2782_v17  ;;  %v2868_v17 = vld [vmem:[%s4403_s0 + $0x1bc] ss:$20 sps:$4 sm:$0xff]  }
  0x3b   :  { %1429 = vmatprep.subr.bf16.mxu0 %v3029_v0  ;;  %2750 = vmatprep.subr.bf16.mxu1 %v3029_v0 }
  0x3e   :  { %1430 = vmatpush2.bf16.msra.mxu0 %v2783_v18  ;;  %2766 = vmatpush2.bf16.msra.mxu1 %v2783_v18  ;;  %v2870_v18 = vld [vmem:[%s4403_s0 + $0x84] ss:$20 sps:$4 sm:$0xff]  }
  0x3f   :  { %1688 = vmatprep.subr.bf16.mxu1 %v3029_v0  ;;  %2663 = vmatprep.subr.bf16.mxu0 %v2790_v19 }
  0x41   :  { %1432 = vmatmul.mubr.bf16.vlgmr.msra.gmra.mxu0 %v2784_v20  ;;  %1624 = vmatmul.mubr.bf16.vlgmr.msra.gmra.mxu1 %v2787_v21  ;;  %v2873_v20 = vld [vmem:[%s4403_s0 + $0x80] ss:$20 sps:$4 sm:$0xff]   ;;  %v2874_v21 = vld [vmem:[%s4403_s0 + $0x1e4] ss:$20 sps:$4 sm:$0xff]  }
  0x42   :  { %1689 = vmatpush1.bf16.msra.mxu1 %v2791_v22  ;;  %2664 = vmatpush3.bf16.msra.mxu0 %v2790_v19  ;;  %v2872_v19 = vld [vmem:[%s4403_s0 + $0x1b8] ss:$20 sps:$4 sm:$0xff]  }
  0x43   :  { %1690 = vmatprep.subr.bf16.mxu1 %v3029_v0  ;;  %1439 = vmatprep.mubr.bf16.mxu0 %v2793_v23  ;;  %v2876_v22 = vld [vmem:[%s4403_s0 + $0xac] ss:$20 sps:$4 sm:$0xff]  }
  0x44   :  { %1631 = vmatprep.mubr.bf16.mxu1 %v2795_v24  ;;  %2665 = vmatprep.subr.bf16.mxu0 %v2839_v25  ;;  %v2878_v23 = vld [vmem:[%s4403_s0 + $0x1e0] ss:$20 sps:$4 sm:$0xff]   ;;  %v2879_v24 = vld [vmem:[%s4403_s0 + $0xa8] ss:$20 sps:$4 sm:$0xff]  }
  0x46   :  { %1691 = vmatpush1.bf16.msra.mxu1 %v2792_v26  ;;  %2666 = vmatpush3.bf16.msra.mxu0 %v2839_v25  ;;  %v2881_v25 = vld [vmem:[%s4403_s0 + $0x20c] ss:$20 sps:$4 sm:$0xff]   ;;  %v2883_v26 = vld [vmem:[%s4403_s0 + $0xd4] ss:$20 sps:$4 sm:$0xff]  }
  0x47   :  { %1692 = vmatprep.subr.bf16.mxu1 %v3029_v0  ;;  %2667 = vmatprep.subr.bf16.mxu0 %v2880_v30 }
  0x49   :  { %1440 = vmatmul.mubr.bf16.gmra.mxu0 %v2797_v27  ;;  %1632 = vmatmul.mubr.bf16.gmra.mxu1 %v2798_v28  ;;  %v2885_v27 = vld [vmem:[%s4403_s0 + $0x208] ss:$20 sps:$4 sm:$0xff]   ;;  %v2886_v28 = vld [vmem:[%s4403_s0 + $0xd0] ss:$20 sps:$4 sm:$0xff]  }
  0x4a   :  { %1693 = vmatpush1.bf16.msra.mxu1 %v2799_v29  ;;  %1447 = vmatprep.mubr.bf16.mxu0 %v2801_v31  ;;  %v2887_v29 = vld [vmem:[%s4403_s0 + $0x234] ss:$20 sps:$4 sm:$0xff]   ;;  %v2891_v31 = vld [vmem:[%s4403_s0 + $0x230] ss:$20 sps:$4 sm:$0xff]  }
  0x4b   :  { %1694 = vmatprep.subr.bf16.mxu1 %v3029_v0  ;;  %1639 = vmatprep.mubr.bf16.mxu1 %v2803_v32  ;;  %v2892_v32 = vld [vmem:[%s4403_s0 + $0xf8] ss:$20 sps:$4 sm:$0xff]  }
  0x4c   :  { %2668 = vmatpush3.bf16.msra.mxu0 %v2880_v30  ;;  %v2889_v30 = vld [vmem:[%s4403_s0 + $0xfc] ss:$20 sps:$4 sm:$0xff]  }
  0x4d   :  { %2669 = vmatprep.subr.bf16.mxu0 %v2917_v44 }
  0x4e   :  { %1695 = vmatpush1.bf16.msra.mxu1 %v2800_v33  ;;  %v2893_v33 = vld [vmem:[%s4403_s0 + $0x25c] ss:$20 sps:$4 sm:$0xff]  }
  0x4f   :  { %1696 = vmatprep.subr.bf16.mxu1 %v3029_v0 }
  0x50   :  { %2670 = vmatpush3.bf16.msra.mxu0 %v2917_v44  ;;  %v2910_v44 = vld [vmem:[%s4403_s0 + $0x170] ss:$20 sps:$4 sm:$0xff]  }
  0x51   :  { %1448 = vmatmul.mubr.bf16.gmra.mxu0 %v2805_v34  ;;  %1640 = vmatmul.mubr.bf16.gmra.mxu1 %v2806_v35  ;;  %v2895_v34 = vld [vmem:[%s4403_s0 + $0x124] ss:$20 sps:$4 sm:$0xff]  }
  0x52   :  { %1697 = vmatpush1.bf16.msra.mxu1 %v2807_v36  ;;  %1455 = vmatprep.mubr.bf16.mxu0 %v2809_v37  ;;  %v2897_v35 = vld [vmem:[%s4403_s0 + $0x258] ss:$20 sps:$4 sm:$0xff]   ;;  %v2898_v36 = vld [vmem:[%s4403_s0 + $0x120] ss:$20 sps:$4 sm:$0xff]  }
  0x53   :  { %1698 = vmatprep.subr.bf16.mxu1 %v3029_v0  ;;  %1647 = vmatprep.mubr.bf16.mxu1 %v2811_v38  ;;  %v2899_v37 = vld [vmem:[%s4403_s0 + $0x284] ss:$20 sps:$4 sm:$0xff]   ;;  %v2901_v38 = vld [vmem:[%s4403_s0 + $0x14c] ss:$20 sps:$4 sm:$0xff]  }
  0x56   :  { %1699 = vmatpush1.bf16.msra.mxu1 %v2808_v39  ;;  %v2903_v39 = vld [vmem:[%s4403_s0 + $0x280] ss:$20 sps:$4 sm:$0xff]  }
  0x57   :  { %1700 = vmatprep.subr.bf16.mxu1 %v3029_v0 }
  0x59   :  { %1456 = vmatmul.mubr.bf16.gmra.mxu0 %v2813_v40  ;;  %1648 = vmatmul.mubr.bf16.gmra.mxu1 %v2814_v41  ;;  %v2904_v40 = vld [vmem:[%s4403_s0 + $0x148] ss:$20 sps:$4 sm:$0xff]   ;;  %v2905_v41 = vld [vmem:[%s4403_s0 + $0x2ac] ss:$20 sps:$4 sm:$0xff]  }
  0x5a   :  { %1701 = vmatpush1.bf16.msra.mxu1 %v2815_v42  ;;  %1463 = vmatprep.mubr.bf16.mxu0 %v2817_v43  ;;  %v2907_v42 = vld [vmem:[%s4403_s0 + $0x174] ss:$20 sps:$4 sm:$0xff]  }
  0x5b   :  { %1702 = vmatprep.subr.bf16.mxu1 %v3029_v0  ;;  %1655 = vmatprep.mubr.bf16.mxu1 %v2819_v45  ;;  %v2909_v43 = vld [vmem:[%s4403_s0 + $0x2a8] ss:$20 sps:$4 sm:$0xff]  }
  0x5c   :  { %v2911_v45 = vld [vmem:[%s4403_s0 + $0x2d4] ss:$20 sps:$4 sm:$0xff]  }
  0x5e   :  { %1703 = vmatpush1.bf16.msra.mxu1 %v2816_v46  ;;  %v2913_v46 = vld [vmem:[%s4403_s0 + $0x19c] ss:$20 sps:$4 sm:$0xff]  }
  0x5f   :  { %1704 = vmatprep.subr.bf16.mxu1 %v3029_v0 }
  0x61   :  { %1464 = vmatmul.mubr.bf16.gmra.mxu0 %v2821_v47  ;;  %1656 = vmatmul.mubr.bf16.gmra.mxu1 %v2822_v48  ;;  %v2915_v47 = vld [vmem:[%s4403_s0 + $0x2d0] ss:$20 sps:$4 sm:$0xff]   ;;  %v2916_v48 = vld [vmem:[%s4403_s0 + $0x198] ss:$20 sps:$4 sm:$0xff]  }
  0x62   :  { %1705 = vmatpush2.bf16.msra.mxu1 %v2823_v49  ;;  %1471 = vmatprep.mubr.bf16.mxu0 %v2825_v50  ;;  %v2918_v49 = vld [vmem:[%s4403_s0 + $0x2fc] ss:$20 sps:$4 sm:$0xff]   ;;  %v2920_v50 = vld [vmem:[%s4403_s0 + $0x1c4] ss:$20 sps:$4 sm:$0xff]  }
  0x63   :  { %1706 = vmatprep.subr.bf16.mxu1 %v3029_v0  ;;  %1663 = vmatprep.mubr.bf16.mxu1 %v2827_v51  ;;  %v2922_v51 = vld [vmem:[%s4403_s0 + $0x2f8] ss:$20 sps:$4 sm:$0xff]  }
  0x66   :  { %1707 = vmatpush2.bf16.msra.mxu1 %v2824_v52  ;;  %v2923_v52 = vld [vmem:[%s4403_s0 + $0x1c0] ss:$20 sps:$4 sm:$0xff]  }
  0x67   :  { %1708 = vmatprep.subr.bf16.mxu1 %v3029_v0 }
  0x69   :  { %1472 = vmatmul.mubr.bf16.gmra.mxu0 %v2829_v53  ;;  %1664 = vmatmul.mubr.bf16.gmra.mxu1 %v2830_v54  ;;  %v2924_v53 = vld [vmem:[%s4403_s0 + $0x324] ss:$20 sps:$4 sm:$0xff]   ;;  %v2926_v54 = vld [vmem:[%s4403_s0 + $0x1ec] ss:$20 sps:$4 sm:$0xff]  }
  0x6a   :  { %1709 = vmatpush2.bf16.msra.mxu1 %v2831_v55  ;;  %1479 = vmatprep.mubr.bf16.mxu0 %v2833_v56  ;;  %v2928_v55 = vld [vmem:[%s4403_s0 + $0x320] ss:$20 sps:$4 sm:$0xff]   ;;  %v2929_v56 = vld [vmem:[%s4403_s0 + $0x1e8] ss:$20 sps:$4 sm:$0xff]  }
  0x6b   :  { %1710 = vmatprep.subr.bf16.mxu1 %v3029_v0  ;;  %1671 = vmatprep.mubr.bf16.mxu1 %v2835_v57  ;;  %v2930_v57 = vld [vmem:[%s4403_s0 + $0x34c] ss:$20 sps:$4 sm:$0xff]  }
  0x6e   :  { %1711 = vmatpush2.bf16.msra.mxu1 %v2832_v58  ;;  %v2932_v58 = vld [vmem:[%s4403_s0 + $0x214] ss:$20 sps:$4 sm:$0xff]  }
  0x6f   :  { %1712 = vmatprep.subr.bf16.mxu1 %v3029_v0 }
  0x71   :  { %1480 = vmatmul.mubr.bf16.gmra.mxu0 %v2837_v59  ;;  %1672 = vmatmul.mubr.bf16.gmra.mxu1 %v2838_v60  ;;  %v2934_v59 = vld [vmem:[%s4403_s0 + $0x348] ss:$20 sps:$4 sm:$0xff]   ;;  %v2935_v60 = vld [vmem:[%s4403_s0 + $0x210] ss:$20 sps:$4 sm:$0xff]  }
  0x72   :  { %1713 = vmatpush2.bf16.msra.mxu1 %v2840_v61  ;;  %1487 = vmatprep.mubr.bf16.mxu0 %v2842_v62  ;;  %v2936_v61 = vld [vmem:[%s4403_s0 + $0x374] ss:$20 sps:$4 sm:$0xff]   ;;  %v2938_v62 = vld [vmem:[%s4403_s0 + $0x23c] ss:$20 sps:$4 sm:$0xff]  }
  0x73   :  { %1714 = vmatprep.subr.bf16.mxu1 %v3029_v0  ;;  %1679 = vmatprep.mubr.bf16.mxu1 %v2844_v63  ;;  %v2940_v63 = vld [vmem:[%s4403_s0 + $0x370] ss:$20 sps:$4 sm:$0xff]  }
  0x76   :  { %1715 = vmatpush2.bf16.msra.mxu1 %v2841_v1  ;;  %v2941_v1 = vld [vmem:[%s4403_s0 + $0x238] ss:$20 sps:$4 sm:$0xff]  }
  0x77   :  { %1716 = vmatprep.subr.bf16.mxu1 %v3029_v0 }
  0x79   :  { %1488 = vmatmul.mubr.bf16.gmra.mxu0 %v2846_v2  ;;  %1680 = vmatmul.mubr.bf16.gmra.mxu1 %v2847_v3  ;;  %v2942_v2 = vld [vmem:[%s4403_s0 + $0x39c] ss:$20 sps:$4 sm:$0xff]   ;;  %v2944_v3 = vld [vmem:[%s4403_s0 + $0x264] ss:$20 sps:$4 sm:$0xff]  }
  0x7a   :  { %1717 = vmatpush2.bf16.msra.mxu1 %v2848_v4  ;;  %1495 = vmatprep.mubr.bf16.mxu0 %v2850_v5  ;;  %v2946_v4 = vld [vmem:[%s4403_s0 + $0x398] ss:$20 sps:$4 sm:$0xff]   ;;  %v2947_v5 = vld [vmem:[%s4403_s0 + $0x260] ss:$20 sps:$4 sm:$0xff]  }
  0x7b   :  { %1718 = vmatprep.subr.bf16.mxu1 %v3029_v0  ;;  %1720 = vmatprep.mubr.bf16.mxu1 %v2854_v6  ;;  %v2860_v0 = vld [vmem:[%s4403_s0 + $0x168] ss:$20 sps:$4 sm:$0xff]   ;;  %v2948_v6 = vld [vmem:[%s4403_s0 + $0x28c] ss:$20 sps:$4 sm:$0xff]  }
  0x7e   :  { %1719 = vmatpush2.bf16.msra.mxu1 %v2849_v7  ;;  %v2950_v7 = vld [vmem:[%s4403_s0 + $0x10] ss:$20 sps:$4 sm:$0xff]  }
  0x81   :  { %1496 = vmatmul.mubr.bf16.gmra.mxu0 %v2855_v9  ;;  %1721 = vmatmul.mubr.bf16.vlgmr.msra.gmra.mxu1 %v2852_v8  ;;  %v2951_v8 = vld [vmem:[%s4403_s0 + $0x288] ss:$20 sps:$4 sm:$0xff]   ;;  %v2952_v9 = vld [vmem:[%s4403_s0 + $0x38] ss:$20 sps:$4 sm:$0xff]  }
  0x82   :  { %1503 = vmatprep.mubr.bf16.mxu0 %v2856_v10  ;;  %1728 = vmatprep.mubr.bf16.mxu1 %v2858_v11  ;;  %v2953_v10 = vld [vmem:[%s4403_s0 + $0x2b4] ss:$20 sps:$4 sm:$0xff]  }
  0x83   :  { %v2955_v11 = vld [vmem:[%s4403_s0 + $0x60] ss:$20 sps:$4 sm:$0xff]  }
  0x89   :  { %1504 = vmatmul.mubr.bf16.gmra.mxu0 %v2860_v0  ;;  %1729 = vmatmul.mubr.bf16.gmra.mxu1 %v2861_v12 }
  0x8a   :  { %1511 = vmatprep.mubr.bf16.mxu0 %v2862_v13  ;;  %1736 = vmatprep.mubr.bf16.mxu1 %v2864_v14 }
  0x91   :  { %1512 = vmatmul.mubr.bf16.gmra.mxu0 %v2866_v15  ;;  %1737 = vmatmul.mubr.bf16.gmra.mxu1 %v2867_v16 }
  0x92   :  { %1519 = vmatprep.mubr.bf16.mxu0 %v2868_v17  ;;  %1744 = vmatprep.mubr.bf16.mxu1 %v2870_v18  ;;  %v2956_v17 = vld [vmem:[%s4403_s0 + $0x2b0] ss:$20 sps:$4 sm:$0xff]   ;;  %v2957_v18 = vld [vmem:[%s4403_s0 + $0x88] ss:$20 sps:$4 sm:$0xff]  }
  0x99   :  { %1520 = vmatmul.mubr.bf16.gmra.mxu0 %v2872_v19  ;;  %1745 = vmatmul.mubr.bf16.gmra.mxu1 %v2873_v20  ;;  %v2958_v19 = vld [vmem:[%s4403_s0 + $0x2dc] ss:$20 sps:$4 sm:$0xff]  }
  0x9a   :  { %1527 = vmatprep.mubr.bf16.mxu0 %v2874_v21  ;;  %1752 = vmatprep.mubr.bf16.mxu1 %v2876_v22  ;;  %v2960_v20 = vld [vmem:[%s4403_s0 + $0xb0] ss:$20 sps:$4 sm:$0xff]  }
  0xa1   :  { %1528 = vmatmul.mubr.bf16.gmra.mxu0 %v2878_v23  ;;  %1753 = vmatmul.mubr.bf16.gmra.mxu1 %v2879_v24 }
  0xa2   :  { %1535 = vmatprep.mubr.bf16.mxu0 %v2881_v25  ;;  %1760 = vmatprep.mubr.bf16.mxu1 %v2883_v26 }
  0xa9   :  { %1536 = vmatmul.mubr.bf16.gmra.mxu0 %v2885_v27  ;;  %1761 = vmatmul.mubr.bf16.gmra.mxu1 %v2886_v28 }
  0xaa   :  { %1543 = vmatprep.mubr.bf16.mxu0 %v2887_v29  ;;  %1768 = vmatprep.mubr.bf16.mxu1 %v2889_v30  ;;  %v2961_v29 = vld [vmem:[%s4403_s0 + $0x2d8] ss:$20 sps:$4 sm:$0xff]  }
  0xab   :  { %v2962_v30 = vld [vmem:[%s4403_s0 + $0xd8] ss:$20 sps:$4 sm:$0xff]  }
  0xb1   :  { %1544 = vmatmul.mubr.bf16.gmra.mxu0 %v2891_v31  ;;  %1769 = vmatmul.mubr.bf16.gmra.mxu1 %v2892_v32  ;;  %v2963_v31 = vld [vmem:[%s4403_s0 + $0x304] ss:$20 sps:$4 sm:$0xff]   ;;  %v2965_v32 = vld [vmem:[%s4403_s0 + $0x100] ss:$20 sps:$4 sm:$0xff]  }
  0xb2   :  { %1551 = vmatprep.mubr.bf16.mxu0 %v2893_v33  ;;  %1776 = vmatprep.mubr.bf16.mxu1 %v2895_v34 }
  0xb9   :  { %1552 = vmatmul.mubr.bf16.gmra.mxu0 %v2897_v35  ;;  %1777 = vmatmul.mubr.bf16.gmra.mxu1 %v2898_v36 }
  0xba   :  { %1559 = vmatprep.mubr.bf16.mxu0 %v2899_v37  ;;  %1784 = vmatprep.mubr.bf16.mxu1 %v2901_v38 }
  0xc1   :  { %1560 = vmatmul.mubr.bf16.gmra.mxu0 %v2903_v39  ;;  %1785 = vmatmul.mubr.bf16.gmra.mxu1 %v2904_v40 }
  0xc2   :  { %1567 = vmatprep.mubr.bf16.mxu0 %v2905_v41  ;;  %1792 = vmatprep.mubr.bf16.mxu1 %v2907_v42  ;;  %v2966_v41 = vld [vmem:[%s4403_s0 + $0x300] ss:$20 sps:$4 sm:$0xff]   ;;  %v2967_v42 = vld [vmem:[%s4403_s0 + $0x128] ss:$20 sps:$4 sm:$0xff]  }
  0xc9   :  { %1568 = vmatmul.mubr.bf16.gmra.mxu0 %v2909_v43  ;;  %1793 = vmatmul.mubr.bf16.gmra.mxu1 %v2910_v44  ;;  %v2970_v43 = vld [vmem:[%s4403_s0 + $0x32c] ss:$20 sps:$4 sm:$0xff]   ;;  %v2971_v44 = vld [vmem:[%s4403_s0 + $0x150] ss:$20 sps:$4 sm:$0xff]  }
  0xca   :  { %1575 = vmatprep.mubr.bf16.mxu0 %v2911_v45  ;;  %1800 = vmatprep.mubr.bf16.mxu1 %v2913_v46 }
  0xd1   :  { %1576 = vmatmul.mubr.bf16.gmra.mxu0 %v2915_v47  ;;  %1801 = vmatmul.mubr.bf16.gmra.mxu1 %v2916_v48 }
  0xd2   :  { %1583 = vmatprep.mubr.bf16.mxu0 %v2918_v49  ;;  %1808 = vmatprep.mubr.bf16.mxu1 %v2920_v50 }
  0xd9   :  { %1584 = vmatmul.mubr.bf16.gmra.mxu0 %v2922_v51  ;;  %1809 = vmatmul.mubr.bf16.gmra.mxu1 %v2923_v52 }
  0xda   :  { %1591 = vmatprep.mubr.bf16.mxu0 %v2924_v53  ;;  %1816 = vmatprep.mubr.bf16.mxu1 %v2926_v54  ;;  %v2968_v53 = vld [vmem:[%s4403_s0 + $0x328] ss:$20 sps:$4 sm:$0xff]   ;;  %v2972_v54 = vld [vmem:[%s4403_s0 + $0x178] ss:$20 sps:$4 sm:$0xff]  }
  0xe1   :  { %1592 = vmatmul.mubr.bf16.gmra.mxu0 %v2928_v55  ;;  %1817 = vmatmul.mubr.bf16.gmra.mxu1 %v2929_v56  ;;  %v2975_v55 = vld [vmem:[%s4403_s0 + $0x354] ss:$20 sps:$4 sm:$0xff]  }
  0xe2   :  { %1599 = vmatprep.mubr.bf16.mxu0 %v2930_v57  ;;  %1824 = vmatprep.mubr.bf16.mxu1 %v2932_v58  ;;  %v2976_v56 = vld [vmem:[%s4403_s0 + $0x1a0] ss:$20 sps:$4 sm:$0xff]  }
  0xe9   :  { %1600 = vmatmul.mubr.bf16.gmra.mxu0 %v2934_v59  ;;  %1825 = vmatmul.mubr.bf16.gmra.mxu1 %v2935_v60 }
  0xea   :  { %1607 = vmatprep.mubr.bf16.mxu0 %v2936_v61  ;;  %1832 = vmatprep.mubr.bf16.mxu1 %v2938_v62 }
  0xf1   :  { %1608 = vmatmul.mubr.bf16.gmra.mxu0 %v2940_v63  ;;  %1833 = vmatmul.mubr.bf16.gmra.mxu1 %v2941_v1 }
  0xf2   :  { %1615 = vmatprep.mubr.bf16.mxu0 %v2942_v2  ;;  %1840 = vmatprep.mubr.bf16.mxu1 %v2944_v3  ;;  %v2973_v2 = vld [vmem:[%s4403_s0 + $0x350] ss:$20 sps:$4 sm:$0xff]   ;;  %v2977_v3 = vld [vmem:[%s4403_s0 + $0x1c8] ss:$20 sps:$4 sm:$0xff]  }
  0xf9   :  { %1616 = vmatmul.mubr.bf16.gmra.mxu0 %v2946_v4  ;;  %1841 = vmatmul.mubr.bf16.gmra.mxu1 %v2947_v5  ;;  %v2980_v4 = vld [vmem:[%s4403_s0 + $0x37c] ss:$20 sps:$4 sm:$0xff]  }
  0xfa   :  { %1848 = vmatprep.mubr.bf16.mxu1 %v2948_v6  ;;  %2671 = vmatprep.mubr.msk.bf16.mxu0 %vm1302_vm0, %v2950_v7  ;;  %v2981_v5 = vld [vmem:[%s4403_s0 + $0x1f0] ss:$20 sps:$4 sm:$0xff]  }
 0x101   :  { %v3513_v0 = vpop.f32.mrf.mxu0  ;;  %v3515_v12 = vpop.f32.mrf.mxu1  ;;  %1849 = vmatmul.mubr.bf16.gmra.mxu1 %v2951_v8  ;;  %2672 = vmatmul.mubr.msk.bf16.vlgmr.msra.gmra.mxu0 %vm1302_vm0, %v2952_v9 }
 0x102   :  { %4406 = vst [vmem:[#allocation2_spill] sm:$0xff] %v3515_v12  ;;  %1856 = vmatprep.mubr.bf16.mxu1 %v2953_v10  ;;  %2675 = vmatprep.mubr.msk.bf16.mxu0 %vm1302_vm0, %v2955_v11 }
 0x103   :  { %v1435_v13 = vpop.f32.mrf.mxu0  ;;  %v1627_v14 = vpop.f32.mrf.mxu1 }
 0x105   :  { %v3519_v15 = vpop.f32.mrf.mxu0  ;;  %v3521_v16 = vpop.f32.mrf.mxu1 }
 0x106   :  { %4407 = vst [vmem:[#allocation3_spill] sm:$0xff] %v3521_v16 }
 0x107   :  { %v1438_v21 = vpop.f32.mrf.mxu0  ;;  %v1630_v22 = vpop.f32.mrf.mxu1 }
 0x109   :  { %v3535_v23 = vpop.f32.mrf.mxu0  ;;  %v3537_v24 = vpop.f32.mrf.mxu1  ;;  %1857 = vmatmul.mubr.bf16.gmra.mxu1 %v2956_v17  ;;  %2676 = vmatmul.mubr.msk.bf16.gmra.mxu0 %vm1302_vm0, %v2957_v18  ;;  %v2978_v17 = vld [vmem:[%s4403_s0 + $0x378] ss:$20 sps:$4 sm:$0xff]  }
 0x10a   :  { %4408 = vst [vmem:[#allocation4_spill] sm:$0xff] %v3537_v24  ;;  %1864 = vmatprep.mubr.bf16.mxu1 %v2958_v19  ;;  %2679 = vmatprep.mubr.msk.bf16.mxu0 %vm1302_vm0, %v2960_v20  ;;  %v2982_v18 = vld [vmem:[%s4403_s0 + $0x218] ss:$20 sps:$4 sm:$0xff]   ;;  %v2986_v20 = vld [vmem:[%s4403_s0 + $0x240] ss:$20 sps:$4 sm:$0xff]  }
 0x10b   :  { %v1443_v25 = vpop.f32.mrf.mxu0  ;;  %v1635_v26 = vpop.f32.mrf.mxu1  ;;  %v2985_v19 = vld [vmem:[%s4403_s0 + $0x3a4] ss:$20 sps:$4 sm:$0xff]  }
 0x10d   :  { %v3541_v27 = vpop.f32.mrf.mxu0  ;;  %v3543_v28 = vpop.f32.mrf.mxu1 }
 0x10e   :  { %4409 = vst [vmem:[#allocation5_spill] sm:$0xff] %v3543_v28 }
 0x10f   :  { %v1446_v33 = vpop.f32.mrf.mxu0  ;;  %v1638_v34 = vpop.f32.mrf.mxu1 }
 0x110   :  { %v2983_v33 = vld [vmem:[%s4403_s0 + $0x3a0] ss:$20 sps:$4 sm:$0xff]   ;;  %v2987_v34 = vld [vmem:[%s4403_s0 + $0x268] ss:$20 sps:$4 sm:$0xff]  }
 0x111   :  { %v3557_v35 = vpop.f32.mrf.mxu0  ;;  %v3559_v36 = vpop.f32.mrf.mxu1  ;;  %1865 = vmatmul.mubr.bf16.gmra.mxu1 %v2961_v29  ;;  %2680 = vmatmul.mubr.msk.bf16.gmra.mxu0 %vm1302_vm0, %v2962_v30 }
 0x112   :  { %4410 = vst [vmem:[#allocation6_spill] sm:$0xff] %v3559_v36  ;;  %1872 = vmatprep.mubr.bf16.mxu1 %v2963_v31  ;;  %2683 = vmatprep.mubr.msk.bf16.mxu0 %vm1302_vm0, %v2965_v32 }
 0x113   :  { %v1451_v37 = vpop.f32.mrf.mxu0  ;;  %v1643_v38 = vpop.f32.mrf.mxu1 }
 0x114   :  { %v2990_v37 = vld [vmem:[%s4403_s0 + $0x3cc] ss:$20 sps:$4 sm:$0xff]   ;;  %v2991_v38 = vld [vmem:[%s4403_s0 + $0x290] ss:$20 sps:$4 sm:$0xff]  }
 0x115   :  { %v3563_v39 = vpop.f32.mrf.mxu0  ;;  %v3565_v40 = vpop.f32.mrf.mxu1 }
 0x116   :  { %4411 = vst [vmem:[#allocation7_spill] sm:$0xff] %v3565_v40 }
 0x117   :  { %v1454_v45 = vpop.f32.mrf.mxu0  ;;  %v1646_v46 = vpop.f32.mrf.mxu1 }
 0x119   :  { %v3579_v47 = vpop.f32.mrf.mxu0  ;;  %v3581_v48 = vpop.f32.mrf.mxu1  ;;  %1873 = vmatmul.mubr.bf16.gmra.mxu1 %v2966_v41  ;;  %2684 = vmatmul.mubr.msk.bf16.gmra.mxu0 %vm1302_vm0, %v2967_v42 }
 0x11a   :  { %4412 = vst [vmem:[#allocation8_spill] sm:$0xff] %v3581_v48  ;;  %1880 = vmatprep.mubr.bf16.mxu1 %v2970_v43  ;;  %2687 = vmatprep.mubr.msk.bf16.mxu0 %vm1302_vm0, %v2971_v44 }
 0x11b   :  { %v1459_v49 = vpop.f32.mrf.mxu0  ;;  %v1651_v50 = vpop.f32.mrf.mxu1 }
 0x11c   :  { %v3676_v49 = vld [vmem:[%s4404_s2] ss:$0 sm:$0xff] }
 0x11d   :  { %v3585_v51 = vpop.f32.mrf.mxu0  ;;  %v3587_v52 = vpop.f32.mrf.mxu1 }
 0x11e   :  { %4413 = vst [vmem:[#allocation9_spill] sm:$0xff] %v3587_v52 }
 0x11f   :  { %v1462_v57 = vpop.f32.mrf.mxu0  ;;  %v1654_v58 = vpop.f32.mrf.mxu1 }
 0x120   :  { %v2996_v57 = vld [vmem:[%s4403_s0 + $0x2e0] ss:$20 sps:$4 sm:$0xff]  }
 0x121   :  { %v3601_v59 = vpop.f32.mrf.mxu0  ;;  %v3603_v60 = vpop.f32.mrf.mxu1  ;;  %1881 = vmatmul.mubr.bf16.gmra.mxu1 %v2968_v53  ;;  %2688 = vmatmul.mubr.msk.bf16.gmra.mxu0 %vm1302_vm0, %v2972_v54  ;;  %v2988_v54 = vld [vmem:[%s4403_s0 + $0x3c8] ss:$20 sps:$4 sm:$0xff]  }
 0x122   :  { %4414 = vst [vmem:[#allocation10_spill] sm:$0xff] %v3603_v60  ;;  %1888 = vmatprep.mubr.bf16.mxu1 %v2975_v55  ;;  %2691 = vmatprep.mubr.msk.bf16.mxu0 %vm1302_vm0, %v2976_v56  ;;  %v2992_v55 = vld [vmem:[%s4403_s0 + $0x2b8] ss:$20 sps:$4 sm:$0xff]   ;;  %v2995_v56 = vld [vmem:[%s4403_s0 + $0x3f4] ss:$20 sps:$4 sm:$0xff]  }
 0x123   :  { %v1467_v61 = vpop.f32.mrf.mxu0  ;;  %v1659_v62 = vpop.f32.mrf.mxu1 }
 0x124   :  { %v1434_v62 = vadd.f32 %v3676_v49, %v3513_v0  ;;  %v2993_v0 = vld [vmem:[%s4403_s0 + $0x3f0] ss:$20 sps:$4 sm:$0xff]  }
 0x125   :  { %v3607_v63 = vpop.f32.mrf.mxu0  ;;  %v3609_v1 = vpop.f32.mrf.mxu1 }
 0x126   :  { %4415 = vst [vmem:[#allocation11_spill] sm:$0xff] %v3609_v1 }
 0x127   :  { %v1470_v6 = vpop.f32.mrf.mxu0  ;;  %v1662_v7 = vpop.f32.mrf.mxu1 }
 0x128   :  { %v1437_v7 = vadd.f32 %v3676_v49, %v3519_v15  ;;  %v3001_v15 = vld [vmem:[%s4403_s0 + $0x330] ss:$20 sps:$4 sm:$0xff]  }
 0x129   :  { %v3623_v8 = vpop.f32.mrf.mxu0  ;;  %v3625_v9 = vpop.f32.mrf.mxu1  ;;  %1889 = vmatmul.mubr.bf16.gmra.mxu1 %v2973_v2  ;;  %2692 = vmatmul.mubr.msk.bf16.gmra.mxu0 %vm1302_vm0, %v2977_v3 }
 0x12a   :  { %4416 = vst [vmem:[#allocation12_spill] sm:$0xff] %v3625_v9  ;;  %1896 = vmatprep.mubr.bf16.mxu1 %v2980_v4  ;;  %2695 = vmatprep.mubr.msk.bf16.mxu0 %vm1302_vm0, %v2981_v5 }
 0x12b   :  { %v1475_v10 = vpop.f32.mrf.mxu0  ;;  %v1667_v11 = vpop.f32.mrf.mxu1 }
 0x12d   :  { %v3629_v13 = vpop.f32.mrf.mxu0  ;;  %v3631_v14 = vpop.f32.mrf.mxu1 }
 0x12e   :  { %4417 = vst [vmem:[#allocation13_spill] sm:$0xff] %v3631_v14 }
 0x12f   :  { %v1478_v21 = vpop.f32.mrf.mxu0  ;;  %v1670_v22 = vpop.f32.mrf.mxu1 }
 0x130   :  { %v1442_v22 = vadd.f32 %v3676_v49, %v3535_v23  ;;  %v2998_v23 = vld [vmem:[%s4403_s0 + $0x418] ss:$20 sps:$4 sm:$0xff]  }
 0x131   :  { %v3645_v25 = vpop.f32.mrf.mxu0  ;;  %v3647_v26 = vpop.f32.mrf.mxu1  ;;  %1897 = vmatmul.mubr.bf16.gmra.mxu1 %v2978_v17  ;;  %2696 = vmatmul.mubr.msk.bf16.gmra.mxu0 %vm1302_vm0, %v2982_v18  ;;  %v2997_v17 = vld [vmem:[%s4403_s0 + $0x308] ss:$20 sps:$4 sm:$0xff]  }
 0x132   :  { %4418 = vst [vmem:[#allocation14_spill] sm:$0xff] %v3647_v26  ;;  %1904 = vmatprep.mubr.bf16.mxu1 %v2985_v19  ;;  %2699 = vmatprep.mubr.msk.bf16.mxu0 %vm1302_vm0, %v2986_v20  ;;  %v3000_v19 = vld [vmem:[%s4403_s0 + $0x41c] ss:$20 sps:$4 sm:$0xff]  }
 0x133   :  { %v1483_v29 = vpop.f32.mrf.mxu0  ;;  %v1675_v30 = vpop.f32.mrf.mxu1 }
 0x135   :  { %v3651_v31 = vpop.f32.mrf.mxu0  ;;  %v3653_v32 = vpop.f32.mrf.mxu1 }
 0x136   :  { %4419 = vst [vmem:[#allocation15_spill] sm:$0xff] %v3653_v32 }
 0x137   :  { %v1486_v41 = vpop.f32.mrf.mxu0  ;;  %v1678_v42 = vpop.f32.mrf.mxu1 }
 0x139   :  { %v3667_v43 = vpop.f32.mrf.mxu0  ;;  %v3669_v44 = vpop.f32.mrf.mxu1  ;;  %1905 = vmatmul.mubr.bf16.gmra.mxu1 %v2983_v33  ;;  %2700 = vmatmul.mubr.msk.bf16.gmra.mxu0 %vm1302_vm0, %v2987_v34 }
 0x13a   :  { %4420 = vst [vmem:[#allocation16_spill] sm:$0xff] %v3669_v44  ;;  %1912 = vmatprep.mubr.bf16.mxu1 %v2990_v37  ;;  %2703 = vmatprep.mubr.msk.bf16.mxu0 %vm1302_vm0, %v2991_v38  ;;  %v1445_v38 = vadd.f32 %v3676_v49, %v3541_v27  ;;  %v3006_v27 = vld [vmem:[%s4403_s0 + $0x380] ss:$20 sps:$4 sm:$0xff]  }
 0x13b   :  { %v1491_v45 = vpop.f32.mrf.mxu0  ;;  %v1683_v46 = vpop.f32.mrf.mxu1 }
 0x13c   :  { %v3002_v45 = vld [vmem:[%s4403_s0 + $0x358] ss:$20 sps:$4 sm:$0xff]  }
 0x13d   :  { %v3678_v50 = vpop.f32.mrf.mxu0  ;;  %v3680_v53 = vpop.f32.mrf.mxu1 }
 0x13e   :  { %4421 = vst [vmem:[#allocation17_spill] sm:$0xff] %v3680_v53 }
 0x13f   :  { %v1494_v58 = vpop.f32.mrf.mxu0  ;;  %v1686_v61 = vpop.f32.mrf.mxu1 }
 0x141   :  { %v3696_v2 = vpop.f32.mrf.mxu0  ;;  %v1722_v3 = vpop.f32.mrf.mxu1  ;;  %1913 = vmatmul.mubr.bf16.gmra.mxu1 %v2988_v54  ;;  %2704 = vmatmul.mubr.msk.bf16.gmra.mxu0 %vm1302_vm0, %v2992_v55  ;;  %v3005_v54 = vld [vmem:[%s4403_s0 + $0x444] ss:$20 sps:$4 sm:$0xff]  }
 0x142   :  { %v3699_v4 = vadd.f32 %v1722_v3, %v1434_v62  ;;  %1920 = vmatprep.mubr.bf16.mxu1 %v2995_v56  ;;  %2707 = vmatprep.mubr.msk.bf16.mxu0 %vm1302_vm0, %v2996_v57  ;;  %v1450_v57 = vadd.f32 %v3676_v49, %v3557_v35  ;;  %v3003_v35 = vld [vmem:[%s4403_s0 + $0x440] ss:$20 sps:$4 sm:$0xff]  }
 0x143   :  { %v1499_v5 = vpop.f32.mrf.mxu0  ;;  %v1724_v6 = vpop.f32.mrf.mxu1 }
 0x144   :  { %v1453_v6 = vadd.f32 %v3676_v49, %v3563_v39  ;;  %v3011_v39 = vld [vmem:[%s4403_s0 + $0x3d0] ss:$20 sps:$4 sm:$0xff]  }
 0x145   :  { %v3704_v10 = vpop.f32.mrf.mxu0  ;;  %v1725_v11 = vpop.f32.mrf.mxu1 }
 0x146   :  { %v3712_v18 = vadd.f32 %v1725_v11, %v1437_v7 }
 0x147   :  { %v1502_v20 = vpop.f32.mrf.mxu0  ;;  %v1727_v21 = vpop.f32.mrf.mxu1 }
 0x148   :  { %v1458_v21 = vadd.f32 %v3676_v49, %v3579_v47  ;;  %v3008_v47 = vld [vmem:[%s4403_s0 + $0x468] ss:$20 sps:$4 sm:$0xff]  }
 0x149   :  { %v3722_v29 = vpop.f32.mrf.mxu0  ;;  %v1730_v30 = vpop.f32.mrf.mxu1  ;;  %1921 = vmatmul.mubr.bf16.gmra.mxu1 %v2993_v0  ;;  %2708 = vmatmul.mubr.msk.bf16.gmra.mxu0 %vm1302_vm0, %v2997_v17  ;;  %v3007_v0 = vld [vmem:[%s4403_s0 + $0x3a8] ss:$20 sps:$4 sm:$0xff]  }
 0x14a   :  { %v3725_v33 = vadd.f32 %v1730_v30, %v1442_v22  ;;  %1928 = vmatprep.mubr.bf16.mxu1 %v3000_v19  ;;  %2711 = vmatprep.mubr.msk.bf16.mxu0 %vm1302_vm0, %v3001_v15  ;;  %v3010_v19 = vld [vmem:[%s4403_s0 + $0x46c] ss:$20 sps:$4 sm:$0xff]  }
 0x14b   :  { %v1507_v34 = vpop.f32.mrf.mxu0  ;;  %v1732_v37 = vpop.f32.mrf.mxu1 }
 0x14d   :  { %v3730_v41 = vpop.f32.mrf.mxu0  ;;  %v1733_v42 = vpop.f32.mrf.mxu1 }
 0x14e   :  { %v3738_v46 = vadd.f32 %v1733_v42, %v1445_v38  ;;  %v1461_v42 = vadd.f32 %v3676_v49, %v3585_v51  ;;  %v3016_v51 = vld [vmem:[%s4403_s0 + $0x420] ss:$20 sps:$4 sm:$0xff]  }
 0x14f   :  { %v1510_v55 = vpop.f32.mrf.mxu0  ;;  %v1735_v56 = vpop.f32.mrf.mxu1 }
 0x150   :  { %v3015_v55 = vld [vmem:[%s4403_s0 + $0x494] ss:$20 sps:$4 sm:$0xff]  }
 0x151   :  { %v3748_v58 = vpop.f32.mrf.mxu0  ;;  %v1738_v61 = vpop.f32.mrf.mxu1  ;;  %1929 = vmatmul.mubr.bf16.gmra.mxu1 %v2998_v23  ;;  %2712 = vmatmul.mubr.msk.bf16.gmra.mxu0 %vm1302_vm0, %v3002_v45 }
 0x152   :  { %v3751_v62 = vadd.f32 %v1738_v61, %v1450_v57  ;;  %1936 = vmatprep.mubr.bf16.mxu1 %v3005_v54  ;;  %2715 = vmatprep.mubr.msk.bf16.mxu0 %vm1302_vm0, %v3006_v27  ;;  %v3012_v54 = vld [vmem:[%s4403_s0 + $0x3f8] ss:$20 sps:$4 sm:$0xff]   ;;  %v1466_v61 = vadd.f32 %v3676_v49, %v3601_v59  ;;  %v3013_v59 = vld [vmem:[%s4403_s0 + $0x490] ss:$20 sps:$4 sm:$0xff]  }
 0x153   :  { %v1515_v3 = vpop.f32.mrf.mxu0  ;;  %v1740_v5 = vpop.f32.mrf.mxu1 }
 0x155   :  { %v3756_v7 = vpop.f32.mrf.mxu0  ;;  %v1741_v11 = vpop.f32.mrf.mxu1 }
 0x156   :  { %v3764_v17 = vadd.f32 %v1741_v11, %v1453_v6 }
 0x157   :  { %v1518_v15 = vpop.f32.mrf.mxu0  ;;  %v1743_v20 = vpop.f32.mrf.mxu1 }
 0x158   :  { %v3017_v15 = vld [vmem:[%s4403_s0 + $0x448] ss:$20 sps:$4 sm:$0xff]  }
 0x159   :  { %v3774_v22 = vpop.f32.mrf.mxu0  ;;  %v1746_v30 = vpop.f32.mrf.mxu1  ;;  %1937 = vmatmul.mubr.bf16.gmra.mxu1 %v3003_v35  ;;  %2716 = vmatmul.mubr.msk.bf16.gmra.mxu0 %vm1302_vm0, %v3007_v0  ;;  %v1469_v0 = vadd.f32 %v3676_v49, %v3607_v63  ;;  %v3021_v63 = vld [vmem:[%s4403_s0 + $0x470] ss:$20 sps:$4 sm:$0xff]  }
 0x15a   :  { %v3777_v34 = vadd.f32 %v1746_v30, %v1458_v21  ;;  %1944 = vmatprep.mubr.bf16.mxu1 %v3010_v19  ;;  %2719 = vmatprep.mubr.msk.bf16.mxu0 %vm1302_vm0, %v3011_v39  ;;  %v3020_v21 = vld [vmem:[%s4403_s0 + $0x4bc] ss:$20 sps:$4 sm:$0xff]  }
 0x15b   :  { %v1523_v37 = vpop.f32.mrf.mxu0  ;;  %v1748_v38 = vpop.f32.mrf.mxu1 }
 0x15c   :  { %v1474_v38 = vadd.f32 %v3676_v49, %v3623_v8  ;;  %v3018_v8 = vld [vmem:[%s4403_s0 + $0x4b8] ss:$20 sps:$4 sm:$0xff]  }
 0x15d   :  { %v3782_v23 = vpop.f32.mrf.mxu0  ;;  %v1749_v45 = vpop.f32.mrf.mxu1 }
 0x15e   :  { %v3790_v27 = vadd.f32 %v1749_v45, %v1461_v42 }
 0x15f   :  { %v1526_v56 = vpop.f32.mrf.mxu0  ;;  %v1751_v57 = vpop.f32.mrf.mxu1 }
 0x161   :  { %v3800_v3 = vpop.f32.mrf.mxu0  ;;  %v1754_v5 = vpop.f32.mrf.mxu1  ;;  %1945 = vmatmul.mubr.bf16.gmra.mxu1 %v3008_v47  ;;  %2720 = vmatmul.mubr.msk.bf16.gmra.mxu0 %vm1302_vm0, %v3012_v54 }
 0x162   :  { %v3803_v6 = vadd.f32 %v1754_v5, %v1466_v61  ;;  %1952 = vmatprep.mubr.bf16.mxu1 %v3015_v55  ;;  %2723 = vmatprep.mubr.msk.bf16.mxu0 %vm1302_vm0, %v3016_v51  ;;  %v1477_v51 = vadd.f32 %v3676_v49, %v3629_v13  ;;  %v3022_v61 = vld [vmem:[%s4403_s0 + $0x498] ss:$20 sps:$4 sm:$0xff]   ;;  %v3026_v13 = vld [vmem:[%s4403_s0 + $0x4c0] ss:$20 sps:$4 sm:$0xff]  }
 0x163   :  { %v1531_v11 = vpop.f32.mrf.mxu0  ;;  %v1756_v35 = vpop.f32.mrf.mxu1 }
 0x164   :  { %v3025_v11 = vld [vmem:[%s4403_s0 + $0x4e4] ss:$20 sps:$4 sm:$0xff]  }
 0x165   :  { %v3808_v19 = vpop.f32.mrf.mxu0  ;;  %v1757_v39 = vpop.f32.mrf.mxu1 }
 0x166   :  { %v3816_v20 = vadd.f32 %v1757_v39, %v1469_v0  ;;  %v1482_v39 = vadd.f32 %v3676_v49, %v3645_v25  ;;  %v3023_v25 = vld [vmem:[%s4403_s0 + $0x4e0] ss:$20 sps:$4 sm:$0xff]  }
 0x167   :  { %v1534_v30 = vpop.f32.mrf.mxu0  ;;  %v1759_v37 = vpop.f32.mrf.mxu1 }
 0x168   :  { %v1485_v37 = vadd.f32 %v3676_v49, %v3651_v31 }
 0x169   :  { %v3826_v42 = vpop.f32.mrf.mxu0  ;;  %v1762_v45 = vpop.f32.mrf.mxu1  ;;  %1953 = vmatmul.mubr.bf16.gmra.mxu1 %v3013_v59  ;;  %2724 = vmatmul.mubr.msk.bf16.gmra.mxu0 %vm1302_vm0, %v3017_v15 }
 0x16a   :  { %v3829_v47 = vadd.f32 %v1762_v45, %v1474_v38  ;;  %1960 = vmatprep.mubr.bf16.mxu1 %v3020_v21  ;;  %2727 = vmatprep.mubr.msk.bf16.mxu0 %vm1302_vm0, %v3021_v63 }
 0x16b   :  { %v1539_v54 = vpop.f32.mrf.mxu0  ;;  %v1764_v55 = vpop.f32.mrf.mxu1 }
 0x16c   :  { %v3027_v54 = vld [vmem:[%s4403_s0 + $0x4e8] ss:$20 sps:$4 sm:$0xff]  }
 0x16d   :  { %v3834_v56 = vpop.f32.mrf.mxu0  ;;  %v1765_v57 = vpop.f32.mrf.mxu1 }
 0x16e   :  { %v3842_v5 = vadd.f32 %v1765_v57, %v1477_v51 }
 0x16f   :  { %v1542_v35 = vpop.f32.mrf.mxu0  ;;  %v1767_v0 = vpop.f32.mrf.mxu1 }
 0x170   :  { %v1493_v0 = vadd.f32 %v3676_v49, %v3678_v50  ;;  %v1501_v50 = vadd.f32 %v3676_v49, %v3704_v10  ;;  %v1509_v10 = vadd.f32 %v3676_v49, %v3730_v41  ;;  %v1517_v41 = vadd.f32 %v3676_v49, %v3756_v7 }
 0x171   :  { %v3852_v59 = vpop.f32.mrf.mxu0  ;;  %v1770_v15 = vpop.f32.mrf.mxu1  ;;  %1961 = vmatmul.mubr.bf16.gmra.mxu1 %v3018_v8  ;;  %2728 = vmatmul.mubr.msk.bf16.gmra.mxu0 %vm1302_vm0, %v3022_v61  ;;  %v1490_v8 = vadd.f32 %v3676_v49, %v3667_v43  ;;  %v1525_v7 = vadd.f32 %v3676_v49, %v3782_v23  ;;  %v1533_v23 = vadd.f32 %v3676_v49, %v3808_v19 }
 0x172   :  { %v3855_v21 = vadd.f32 %v1770_v15, %v1482_v39  ;;  %1968 = vmatprep.mubr.bf16.mxu1 %v3025_v11  ;;  %2731 = vmatprep.mubr.msk.bf16.mxu0 %vm1302_vm0, %v3026_v13  ;;  %v1541_v19 = vadd.f32 %v3676_v49, %v3834_v56 }
 0x173   :  { %v1547_v63 = vpop.f32.mrf.mxu0  ;;  %v1772_v30 = vpop.f32.mrf.mxu1 }
 0x175   :  { %v3860_v38 = vpop.f32.mrf.mxu0  ;;  %v1773_v45 = vpop.f32.mrf.mxu1 }
 0x176   :  { %v3868_v55 = vadd.f32 %v1773_v45, %v1485_v37  ;;  %v1498_v37 = vadd.f32 %v3676_v49, %v3696_v2  ;;  %v1506_v2 = vadd.f32 %v3676_v49, %v3722_v29  ;;  %v1514_v29 = vadd.f32 %v3676_v49, %v3748_v58 }
 0x177   :  { %v1550_v51 = vpop.f32.mrf.mxu0  ;;  %v1775_v57 = vpop.f32.mrf.mxu1  ;;  %v1522_v58 = vadd.f32 %v3676_v49, %v3774_v22  ;;  %v1530_v22 = vadd.f32 %v3676_v49, %v3800_v3  ;;  %v1538_v3 = vadd.f32 %v3676_v49, %v3826_v42  ;;  %v1546_v42 = vadd.f32 %v3676_v49, %v3852_v59 }
 0x178   :  { %v1549_v56 = vadd.f32 %v3676_v49, %v3860_v38 }
 0x179   :  { %v3872_v61 = vpop.f32.mrf.mxu0  ;;  %v1778_v31 = vpop.f32.mrf.mxu1  ;;  %1969 = vmatmul.mubr.bf16.gmra.mxu1 %v3023_v25  ;;  %2732 = vmatmul.mubr.msk.bf16.gmra.mxu0 %vm1302_vm0, %v3027_v54 }
 0x17a   :  { %v3875_v11 = vadd.f32 %v1778_v31, %v1490_v8 }
 0x17b   :  { %v1555_v13 = vpop.f32.mrf.mxu0  ;;  %v1780_v35 = vpop.f32.mrf.mxu1 }
 0x17d   :  { %v3879_v39 = vpop.f32.mrf.mxu0  ;;  %v1781_v15 = vpop.f32.mrf.mxu1 }
 0x17e   :  { %v3881_v63 = vadd.f32 %v1781_v15, %v1493_v0 }
 0x17f   :  { %v1558_v30 = vpop.f32.mrf.mxu0  ;;  %v1783_v43 = vpop.f32.mrf.mxu1 }
 0x181   :  { %v3885_v45 = vpop.f32.mrf.mxu0  ;;  %v1786_v25 = vpop.f32.mrf.mxu1 }
 0x182   :  { %v3887_v54 = vadd.f32 %v1786_v25, %v1498_v37  ;;  %v1562_v38 = vadd.f32 %v3676_v49, %v3885_v45 }
 0x183   :  { %v1563_v51 = vpop.f32.mrf.mxu0  ;;  %v1788_v57 = vpop.f32.mrf.mxu1 }
 0x185   :  { %v3891_v8 = vpop.f32.mrf.mxu0  ;;  %v1789_v31 = vpop.f32.mrf.mxu1 }
 0x186   :  { %v3893_v13 = vadd.f32 %v1789_v31, %v1501_v50 }
 0x187   :  { %v1566_v35 = vpop.f32.mrf.mxu0  ;;  %v1791_v0 = vpop.f32.mrf.mxu1 }
 0x189   :  { %v3897_v15 = vpop.f32.mrf.mxu0  ;;  %v1794_v30 = vpop.f32.mrf.mxu1 }
 0x18a   :  { %v3899_v43 = vadd.f32 %v1794_v30, %v1506_v2 }
 0x18b   :  { %v1571_v37 = vpop.f32.mrf.mxu0  ;;  %v1796_v25 = vpop.f32.mrf.mxu1 }
 0x18d   :  { %v3903_v51 = vpop.f32.mrf.mxu0  ;;  %v1797_v57 = vpop.f32.mrf.mxu1 }
 0x18e   :  { %v3905_v50 = vadd.f32 %v1797_v57, %v1509_v10 }
 0x18f   :  { %v1574_v31 = vpop.f32.mrf.mxu0  ;;  %v1799_v35 = vpop.f32.mrf.mxu1 }
 0x191   :  { %v3909_v0 = vpop.f32.mrf.mxu0  ;;  %v1802_v53 = vpop.f32.mrf.mxu1 }
 0x192   :  { %v3911_v2 = vadd.f32 %v1802_v53, %v1514_v29 }
 0x193   :  { %v1579_v30 = vpop.f32.mrf.mxu0  ;;  %v1804_v37 = vpop.f32.mrf.mxu1 }
 0x195   :  { %v3915_v25 = vpop.f32.mrf.mxu0  ;;  %v1805_v32 = vpop.f32.mrf.mxu1 }
 0x196   :  { %v3917_v10 = vadd.f32 %v1805_v32, %v1517_v41 }
 0x197   :  { %v1582_v57 = vpop.f32.mrf.mxu0  ;;  %v1807_v31 = vpop.f32.mrf.mxu1 }
 0x199   :  { %v3921_v35 = vpop.f32.mrf.mxu0  ;;  %v1810_v44 = vpop.f32.mrf.mxu1 }
 0x19a   :  { %v3923_v53 = vadd.f32 %v1810_v44, %v1522_v58 }
 0x19b   :  { %v1587_v29 = vpop.f32.mrf.mxu0  ;;  %v1812_v30 = vpop.f32.mrf.mxu1 }
 0x19d   :  { %v3927_v37 = vpop.f32.mrf.mxu0  ;;  %v1813_v26 = vpop.f32.mrf.mxu1 }
 0x19e   :  { %v3929_v32 = vadd.f32 %v1813_v26, %v1525_v7 }
 0x19f   :  { %v1590_v41 = vpop.f32.mrf.mxu0  ;;  %v1815_v57 = vpop.f32.mrf.mxu1 }
 0x1a1   :  { %v3933_v31 = vpop.f32.mrf.mxu0  ;;  %v1818_v1 = vpop.f32.mrf.mxu1 }
 0x1a2   :  { %v3935_v44 = vadd.f32 %v1818_v1, %v1530_v22 }
 0x1a3   :  { %v1595_v58 = vpop.f32.mrf.mxu0  ;;  %v1820_v29 = vpop.f32.mrf.mxu1 }
 0x1a5   :  { %v3939_v30 = vpop.f32.mrf.mxu0  ;;  %v1821_v14 = vpop.f32.mrf.mxu1 }
 0x1a6   :  { %v3941_v26 = vadd.f32 %v1821_v14, %v1533_v23 }
 0x1a7   :  { %v1598_v7 = vpop.f32.mrf.mxu0  ;;  %v1823_v41 = vpop.f32.mrf.mxu1 }
 0x1a9   :  { %v3945_v57 = vpop.f32.mrf.mxu0  ;;  %v1826_v60 = vpop.f32.mrf.mxu1 }
 0x1aa   :  { %v3947_v1 = vadd.f32 %v1826_v60, %v1538_v3 }
 0x1ab   :  { %v1603_v22 = vpop.f32.mrf.mxu0  ;;  %v1828_v58 = vpop.f32.mrf.mxu1 }
 0x1ad   :  { %v3951_v29 = vpop.f32.mrf.mxu0  ;;  %v1829_v9 = vpop.f32.mrf.mxu1 }
 0x1ae   :  { %v3953_v14 = vadd.f32 %v1829_v9, %v1541_v19 }
 0x1af   :  { %v1606_v23 = vpop.f32.mrf.mxu0  ;;  %v1831_v7 = vpop.f32.mrf.mxu1 }
 0x1b1   :  { %v3957_v41 = vpop.f32.mrf.mxu0  ;;  %v1834_v40 = vpop.f32.mrf.mxu1 }
 0x1b2   :  { %v3959_v60 = vadd.f32 %v1834_v40, %v1546_v42 }
 0x1b3   :  { %v1611_v3 = vpop.f32.mrf.mxu0  ;;  %v1836_v22 = vpop.f32.mrf.mxu1 }
 0x1b5   :  { %v3963_v58 = vpop.f32.mrf.mxu0  ;;  %v1837_v52 = vpop.f32.mrf.mxu1 }
 0x1b6   :  { %v3965_v9 = vadd.f32 %v1837_v52, %v1549_v56 }
 0x1b7   :  { %v1614_v19 = vpop.f32.mrf.mxu0  ;;  %v1839_v23 = vpop.f32.mrf.mxu1 }
 0x1b9   :  { %v3967_v7 = vpop.f32.mrf.mxu0  ;;  %v3969_v59 = vpop.f32.mrf.mxu1 }
 0x1bb   :  { %v1619_v36 = vpop.f32.mrf.mxu0  ;;  %v1844_v48 = vpop.f32.mrf.mxu1 }
 0x1bc   :  { %v1565_v36 = vadd.f32 %v3676_v49, %v3891_v8 }
 0x1bd   :  { %v3971_v40 = vpop.f32.mrf.mxu0  ;;  %v3973_v42 = vpop.f32.mrf.mxu1 }
 0x1bf   :  { %v1622_v3 = vpop.f32.mrf.mxu0  ;;  %v1847_v22 = vpop.f32.mrf.mxu1 }
 0x1c1   :  { %v1850_v16 = vpop.f32.mrf.mxu1  ;;  %v2673_v52 = vpop.f32.mrf.mxu0 }
 0x1c2   :  { %v3977_v56 = vadd.f32 %v1850_v16, %v1562_v38  ;;  %v2020_v19 = vadd.f32 %v2673_v52, %v3725_v33 }
 0x1c3   :  { %v1852_v23 = vpop.f32.mrf.mxu1  ;;  %v2011_v28 = vpop.f32.mrf.mxu0 }
 0x1c4   :  { %v2268_v48 = vmax.f32 %v2020_v19, 0.0  ;;  %v2012_v12 = vadd.f32 %v2011_v28, %v3699_v4 }
 0x1c5   :  { %v1853_v24 = vpop.f32.mrf.mxu1  ;;  %v2674_v3 = vpop.f32.mrf.mxu0 }
 0x1c6   :  { %2332 = vst.msk [vmem:[%s4405_s3 + $0x10] sm:$0xff] %vm1302_vm0, %v2268_v48  ;;  %v2266_v45 = vmax.f32 %v2012_v12, 0.0  ;;  %v3987_v16 = vadd.f32 %v1853_v24, %v1565_v36  ;;  %v2023_v33 = vadd.f32 %v2674_v3, %v3738_v46 }
 0x1c7   :  { %v1855_v22 = vpop.f32.mrf.mxu1  ;;  %v2014_v38 = vpop.f32.mrf.mxu0 }
 0x1c8   :  { %2330 = vst.msk [vmem:[%s4405_s3] sm:$0xff] %vm1302_vm0, %v2266_v45  ;;  %v2269_v28 = vmax.f32 %v2023_v33, 0.0  ;;  %v2015_v4 = vadd.f32 %v2014_v38, %v3712_v18 }
 0x1c9   :  { %v3995_v8 = vpop.f32.mrf.mxu1  ;;  %v2677_v52 = vpop.f32.mrf.mxu0 }
 0x1ca   :  { %2333 = vst.msk [vmem:[%s4405_s3 + $0x18] sm:$0xff] %vm1302_vm0, %v2269_v28  ;;  %v2267_v12 = vmax.f32 %v2015_v4, 0.0  ;;  %v2036_v24 = vadd.f32 %v2677_v52, %v3777_v34 }
 0x1cb   :  { %v1860_v46 = vpop.f32.mrf.mxu1  ;;  %v2027_v19 = vpop.f32.mrf.mxu0 }
 0x1cc   :  { %2331 = vst.msk [vmem:[%s4405_s3 + $0x8] sm:$0xff] %vm1302_vm0, %v2267_v12  ;;  %v2272_v23 = vmax.f32 %v2036_v24, 0.0  ;;  %v2028_v18 = vadd.f32 %v2027_v19, %v3751_v62 }
 0x1cd   :  { %v4007_v36 = vpop.f32.mrf.mxu1  ;;  %v2678_v48 = vpop.f32.mrf.mxu0 }
 0x1ce   :  { %2336 = vst.msk [vmem:[%s4405_s3 + $0x30] sm:$0xff] %vm1302_vm0, %v2272_v23  ;;  %v2270_v3 = vmax.f32 %v2028_v18, 0.0  ;;  %v2039_v34 = vadd.f32 %v2678_v48, %v3790_v27 }
 0x1cf   :  { %v1863_v45 = vpop.f32.mrf.mxu1  ;;  %v2030_v33 = vpop.f32.mrf.mxu0 }
 0x1d0   :  { %2334 = vst.msk [vmem:[%s4405_s3 + $0x20] sm:$0xff] %vm1302_vm0, %v2270_v3  ;;  %v2273_v22 = vmax.f32 %v2039_v34, 0.0  ;;  %v2031_v62 = vadd.f32 %v2030_v33, %v3764_v17 }
 0x1d1   :  { %v4019_v38 = vpop.f32.mrf.mxu1  ;;  %v2681_v28 = vpop.f32.mrf.mxu0 }
 0x1d2   :  { %2337 = vst.msk [vmem:[%s4405_s3 + $0x38] sm:$0xff] %vm1302_vm0, %v2273_v22  ;;  %v2271_v4 = vmax.f32 %v2031_v62, 0.0  ;;  %v2052_v27 = vadd.f32 %v2681_v28, %v3829_v47 }
 0x1d3   :  { %v1868_v52 = vpop.f32.mrf.mxu1  ;;  %v2043_v12 = vpop.f32.mrf.mxu0 }
 0x1d4   :  { %2335 = vst.msk [vmem:[%s4405_s3 + $0x28] sm:$0xff] %vm1302_vm0, %v2271_v4  ;;  %v2276_v24 = vmax.f32 %v2052_v27, 0.0  ;;  %v2044_v17 = vadd.f32 %v2043_v12, %v3803_v6 }
 0x1d5   :  { %v4031_v46 = vpop.f32.mrf.mxu1  ;;  %v2682_v19 = vpop.f32.mrf.mxu0 }
 0x1d6   :  { %2340 = vst.msk [vmem:[%s4405_s3 + $0x50] sm:$0xff] %vm1302_vm0, %v2276_v24  ;;  %v2274_v23 = vmax.f32 %v2044_v17, 0.0  ;;  %v2055_v47 = vadd.f32 %v2682_v19, %v3842_v5 }
 0x1d7   :  { %v1871_v18 = vpop.f32.mrf.mxu1  ;;  %v2046_v48 = vpop.f32.mrf.mxu0 }
 0x1d8   :  { %2338 = vst.msk [vmem:[%s4405_s3 + $0x40] sm:$0xff] %vm1302_vm0, %v2274_v23  ;;  %v2277_v3 = vmax.f32 %v2055_v47, 0.0  ;;  %v2047_v6 = vadd.f32 %v2046_v48, %v3816_v20 }
 0x1d9   :  { %v4043_v34 = vpop.f32.mrf.mxu1  ;;  %v2685_v45 = vpop.f32.mrf.mxu0 }
 0x1da   :  { %2341 = vst.msk [vmem:[%s4405_s3 + $0x58] sm:$0xff] %vm1302_vm0, %v2277_v3  ;;  %v2275_v33 = vmax.f32 %v2047_v6, 0.0  ;;  %v2068_v5 = vadd.f32 %v2685_v45, %v3875_v11 }
 0x1db   :  { %v1876_v22 = vpop.f32.mrf.mxu1  ;;  %v2059_v62 = vpop.f32.mrf.mxu0 }
 0x1dc   :  { %2339 = vst.msk [vmem:[%s4405_s3 + $0x48] sm:$0xff] %vm1302_vm0, %v2275_v33  ;;  %v2280_v28 = vmax.f32 %v2068_v5, 0.0  ;;  %v2060_v20 = vadd.f32 %v2059_v62, %v3855_v21 }
 0x1dd   :  { %v4055_v4 = vpop.f32.mrf.mxu1  ;;  %v2686_v27 = vpop.f32.mrf.mxu0 }
 0x1de   :  { %2344 = vst.msk [vmem:[%s4405_s3 + $0x70] sm:$0xff] %vm1302_vm0, %v2280_v28  ;;  %v2278_v52 = vmax.f32 %v2060_v20, 0.0  ;;  %v2071_v11 = vadd.f32 %v2686_v27, %v3881_v63 }
 0x1df   :  { %v1879_v12 = vpop.f32.mrf.mxu1  ;;  %v2062_v24 = vpop.f32.mrf.mxu0 }
 0x1e0   :  { %2342 = vst.msk [vmem:[%s4405_s3 + $0x60] sm:$0xff] %vm1302_vm0, %v2278_v52  ;;  %v2281_v17 = vmax.f32 %v2071_v11, 0.0  ;;  %v2063_v21 = vadd.f32 %v2062_v24, %v3868_v55 }
 0x1e1   :  { %v4067_v19 = vpop.f32.mrf.mxu1  ;;  %v2689_v23 = vpop.f32.mrf.mxu0 }
 0x1e2   :  { %2345 = vst.msk [vmem:[%s4405_s3 + $0x78] sm:$0xff] %vm1302_vm0, %v2281_v17  ;;  %v2279_v47 = vmax.f32 %v2063_v21, 0.0  ;;  %v2084_v63 = vadd.f32 %v2689_v23, %v3899_v43 }
 0x1e3   :  { %v1884_v18 = vpop.f32.mrf.mxu1  ;;  %v2075_v48 = vpop.f32.mrf.mxu0 }
 0x1e4   :  { %2343 = vst.msk [vmem:[%s4405_s3 + $0x68] sm:$0xff] %vm1302_vm0, %v2279_v47  ;;  %v2284_v3 = vmax.f32 %v2084_v63, 0.0  ;;  %v2076_v55 = vadd.f32 %v2075_v48, %v3887_v54 }
 0x1e5   :  { %v4079_v6 = vpop.f32.mrf.mxu1  ;;  %v2690_v45 = vpop.f32.mrf.mxu0 }
 0x1e6   :  { %2348 = vst.msk [vmem:[%s4405_s3 + $0x90] sm:$0xff] %vm1302_vm0, %v2284_v3  ;;  %v2282_v33 = vmax.f32 %v2076_v55, 0.0  ;;  %v2087_v43 = vadd.f32 %v2690_v45, %v3905_v50 }
 0x1e7   :  { %v1887_v5 = vpop.f32.mrf.mxu1  ;;  %v2078_v22 = vpop.f32.mrf.mxu0 }
 0x1e8   :  { %2346 = vst.msk [vmem:[%s4405_s3 + $0x80] sm:$0xff] %vm1302_vm0, %v2282_v33  ;;  %v2285_v62 = vmax.f32 %v2087_v43, 0.0  ;;  %v2079_v54 = vadd.f32 %v2078_v22, %v3893_v13  ;;  %v1554_v22 = vadd.f32 %v3676_v49, %v3872_v61 }
 0x1e9   :  { %v4091_v28 = vpop.f32.mrf.mxu1  ;;  %v2693_v20 = vpop.f32.mrf.mxu0 }
 0x1ea   :  { %2349 = vst.msk [vmem:[%s4405_s3 + $0x98] sm:$0xff] %vm1302_vm0, %v2285_v62  ;;  %v2283_v27 = vmax.f32 %v2079_v54, 0.0  ;;  %v2100_v50 = vadd.f32 %v2693_v20, %v3923_v53 }
 0x1eb   :  { %v1892_v52 = vpop.f32.mrf.mxu1  ;;  %v2091_v11 = vpop.f32.mrf.mxu0 }
 0x1ec   :  { %2347 = vst.msk [vmem:[%s4405_s3 + $0x88] sm:$0xff] %vm1302_vm0, %v2283_v27  ;;  %v2288_v12 = vmax.f32 %v2100_v50, 0.0  ;;  %v2092_v13 = vadd.f32 %v2091_v11, %v3911_v2  ;;  %v1843_v27 = vadd.f32 %v3969_v59, %v1554_v22  ;;  %v1557_v11 = vadd.f32 %v3676_v49, %v3879_v39 }
 0x1ed   :  { %v4103_v24 = vpop.f32.mrf.mxu1  ;;  %v2694_v17 = vpop.f32.mrf.mxu0 }
 0x1ee   :  { %2352 = vst.msk [vmem:[%s4405_s3 + $0xb0] sm:$0xff] %vm1302_vm0, %v2288_v12  ;;  %v2286_v21 = vmax.f32 %v2092_v13, 0.0  ;;  %v2103_v53 = vadd.f32 %v2694_v17, %v3929_v32  ;;  %v1846_v17 = vadd.f32 %v3973_v42, %v1557_v11 }
 0x1ef   :  { %v1895_v23 = vpop.f32.mrf.mxu1  ;;  %v2094_v47 = vpop.f32.mrf.mxu0 }
 0x1f0   :  { %2350 = vst.msk [vmem:[%s4405_s3 + $0xa0] sm:$0xff] %vm1302_vm0, %v2286_v21  ;;  %v2289_v63 = vmax.f32 %v2103_v53, 0.0  ;;  %v2095_v2 = vadd.f32 %v2094_v47, %v3917_v10  ;;  %v1570_v23 = vadd.f32 %v3676_v49, %v3897_v15 }
 0x1f1   :  { %v4115_v18 = vpop.f32.mrf.mxu1  ;;  %v2697_v48 = vpop.f32.mrf.mxu0 }
 0x1f2   :  { %2353 = vst.msk [vmem:[%s4405_s3 + $0xb8] sm:$0xff] %vm1302_vm0, %v2289_v63  ;;  %v2287_v3 = vmax.f32 %v2095_v2, 0.0  ;;  %v2116_v32 = vadd.f32 %v2697_v48, %v3947_v1  ;;  %v1859_v48 = vadd.f32 %v3995_v8, %v1570_v23 }
 0x1f3   :  { %v1900_v55 = vpop.f32.mrf.mxu1  ;;  %v2107_v45 = vpop.f32.mrf.mxu0 }
 0x1f4   :  { %2351 = vst.msk [vmem:[%s4405_s3 + $0xa8] sm:$0xff] %vm1302_vm0, %v2287_v3  ;;  %v2292_v33 = vmax.f32 %v2116_v32, 0.0  ;;  %v2108_v10 = vadd.f32 %v2107_v45, %v3935_v44  ;;  %v1573_v55 = vadd.f32 %v3676_v49, %v3903_v51 }
 0x1f5   :  { %v4127_v43 = vpop.f32.mrf.mxu1  ;;  %v2698_v5 = vpop.f32.mrf.mxu0 }
 0x1f6   :  { %2356 = vst.msk [vmem:[%s4405_s3 + $0xd0] sm:$0xff] %vm1302_vm0, %v2292_v33  ;;  %v2290_v1 = vmax.f32 %v2108_v10, 0.0  ;;  %v2119_v62 = vadd.f32 %v2698_v5, %v3953_v14  ;;  %v1862_v5 = vadd.f32 %v4007_v36, %v1573_v55 }
 0x1f7   :  { %v1903_v54 = vpop.f32.mrf.mxu1  ;;  %v2110_v20 = vpop.f32.mrf.mxu0 }
 0x1f8   :  { %2354 = vst.msk [vmem:[%s4405_s3 + $0xc0] sm:$0xff] %vm1302_vm0, %v2290_v1  ;;  %v2293_v44 = vmax.f32 %v2119_v62, 0.0  ;;  %v2111_v61 = vadd.f32 %v2110_v20, %v3941_v26  ;;  %v1586_v62 = vadd.f32 %v3676_v49, %v3921_v35 }
 0x1f9   :  { %v4142_v50 = vpop.f32.mrf.mxu1  ;;  %v2701_v52 = vpop.f32.mrf.mxu0 }
 0x1fa   :  { %2357 = vst.msk [vmem:[%s4405_s3 + $0xd8] sm:$0xff] %vm1302_vm0, %v2293_v44  ;;  %v2291_v14 = vmax.f32 %v2111_v61, 0.0  ;;  %v2132_v59 = vadd.f32 %v2701_v52, %v1843_v27  ;;  %v1578_v44 = vadd.f32 %v3676_v49, %v3909_v0 }
 0x1fb   :  { %v1908_v12 = vpop.f32.mrf.mxu1  ;;  %v2123_v13 = vpop.f32.mrf.mxu0 }
 0x1fc   :  { %2355 = vst.msk [vmem:[%s4405_s3 + $0xc8] sm:$0xff] %vm1302_vm0, %v2291_v14  ;;  %v2296_v26 = vmax.f32 %v2132_v59, 0.0  ;;  %v2124_v21 = vadd.f32 %v2123_v13, %v3959_v60  ;;  %v1589_v14 = vadd.f32 %v3676_v49, %v3927_v37  ;;  %v1867_v59 = vadd.f32 %v4019_v38, %v1578_v44 }
 0x1fd   :  { %v4156_v39 = vpop.f32.mrf.mxu1  ;;  %v2702_v53 = vpop.f32.mrf.mxu0  ;;  %v1621_v44 = vadd.f32 %v3676_v49, %v3971_v40 }
 0x1fe   :  { %2360 = vst.msk [vmem:[%s4405_s3 + $0xf0] sm:$0xff] %vm1302_vm0, %v2296_v26  ;;  %v2294_v42 = vmax.f32 %v2124_v21, 0.0  ;;  %v2135_v47 = vadd.f32 %v2702_v53, %v1846_v17  ;;  %v1878_v17 = vadd.f32 %v4055_v4, %v1589_v14  ;;  %v1602_v53 = vadd.f32 %v3676_v49, %v3945_v57 }
 0x1ff   :  { %v1911_v63 = vpop.f32.mrf.mxu1  ;;  %v2126_v2 = vpop.f32.mrf.mxu0  ;;  %v1910_v14 = vadd.f32 %v4156_v39, %v1621_v44  ;;  %v4429_v44 = vld [vmem:[#allocation7_spill] sm:$0xff] }
 0x200   :  { %2358 = vst.msk [vmem:[%s4405_s3 + $0xe0] sm:$0xff] %vm1302_vm0, %v2294_v42  ;;  %v2297_v60 = vmax.f32 %v2135_v47, 0.0  ;;  %v2127_v3 = vadd.f32 %v2126_v2, %v3965_v9  ;;  %v1594_v63 = vadd.f32 %v3676_v49, %v3933_v31  ;;  %v1891_v2 = vadd.f32 %v4091_v28, %v1602_v53 }
 0x201   :  { %v4170_v15 = vpop.f32.mrf.mxu1  ;;  %v2705_v32 = vpop.f32.mrf.mxu0 }
 0x202   :  { %2361 = vst.msk [vmem:[%s4405_s3 + $0xf8] sm:$0xff] %vm1302_vm0, %v2297_v60  ;;  %v2295_v8 = vmax.f32 %v2127_v3, 0.0  ;;  %v2148_v45 = vadd.f32 %v2705_v32, %v1859_v48  ;;  %v1605_v3 = vadd.f32 %v3676_v49, %v3951_v29  ;;  %v1883_v32 = vadd.f32 %v4067_v19, %v1594_v63 }
 0x203   :  { %v1916_v33 = vpop.f32.mrf.mxu1  ;;  %v2139_v10 = vpop.f32.mrf.mxu0 }
 0x204   :  { %2359 = vst.msk [vmem:[%s4405_s3 + $0xe8] sm:$0xff] %vm1302_vm0, %v2295_v8  ;;  %v2300_v9 = vmax.f32 %v2148_v45, 0.0  ;;  %v2140_v22 = vadd.f32 %v2139_v10, %v3977_v56  ;;  %v1875_v56 = vadd.f32 %v4043_v34, %v1586_v62  ;;  %v1597_v45 = vadd.f32 %v3676_v49, %v3939_v30 }
 0x205   :  { %v4184_v51 = vpop.f32.mrf.mxu1  ;;  %v2706_v1 = vpop.f32.mrf.mxu0  ;;  %v1894_v33 = vadd.f32 %v4103_v24, %v1605_v3 }
 0x206   :  { %2364 = vst.msk [vmem:[%s4405_s3 + $0x110] sm:$0xff] %vm1302_vm0, %v2300_v9  ;;  %v2298_v36 = vmax.f32 %v2140_v22, 0.0  ;;  %v2151_v54 = vadd.f32 %v2706_v1, %v1862_v5  ;;  %v1618_v9 = vadd.f32 %v3676_v49, %v3967_v7  ;;  %v1886_v22 = vadd.f32 %v4079_v6, %v1597_v45 }
 0x207   :  { %v1919_v20 = vpop.f32.mrf.mxu1  ;;  %v2142_v27 = vpop.f32.mrf.mxu0 }
 0x208   :  { %2362 = vst.msk [vmem:[%s4405_s3 + $0x100] sm:$0xff] %vm1302_vm0, %v2298_v36  ;;  %v2301_v35 = vmax.f32 %v2151_v54, 0.0  ;;  %v2143_v61 = vadd.f32 %v2142_v27, %v3987_v16  ;;  %v1581_v16 = vadd.f32 %v3676_v49, %v3915_v25  ;;  %v1610_v36 = vadd.f32 %v3676_v49, %v3957_v41 }
 0x209   :  { %v4200_v52 = vpop.f32.mrf.mxu1  ;;  %v2709_v11 = vpop.f32.mrf.mxu0  ;;  %v1907_v54 = vadd.f32 %v4142_v50, %v1618_v9 }
 0x20a   :  { %2365 = vst.msk [vmem:[%s4405_s3 + $0x118] sm:$0xff] %vm1302_vm0, %v2301_v35  ;;  %v2299_v0 = vmax.f32 %v2143_v61, 0.0  ;;  %v2164_v34 = vadd.f32 %v2709_v11, %v1875_v56  ;;  %v1870_v23 = vadd.f32 %v4031_v46, %v1581_v16  ;;  %v1899_v56 = vadd.f32 %v4115_v18, %v1610_v36 }
 0x20b   :  { %v1924_v12 = vpop.f32.mrf.mxu1  ;;  %v2155_v13 = vpop.f32.mrf.mxu0  ;;  %v1613_v11 = vadd.f32 %v3676_v49, %v3963_v58 }
 0x20c   :  { %2363 = vst.msk [vmem:[%s4405_s3 + $0x108] sm:$0xff] %vm1302_vm0, %v2299_v0  ;;  %v2304_v37 = vmax.f32 %v2164_v34, 0.0  ;;  %v2156_v38 = vadd.f32 %v2155_v13, %v1867_v59  ;;  %v4281_v34 = vld [vmem:[%s4404_s2] ss:$0 sm:$0xff]  ;;  %v4422_v12 = vld [vmem:[#allocation4_spill] sm:$0xff] }
 0x20d   :  { %v4216_v26 = vpop.f32.mrf.mxu1  ;;  %v2710_v21 = vpop.f32.mrf.mxu0  ;;  %v1634_v13 = vadd.f32 %v4281_v34, %v4422_v12  ;;  %v1902_v49 = vadd.f32 %v4127_v43, %v1613_v11  ;;  %v4430_v11 = vld [vmem:[#allocation12_spill] sm:$0xff] }
 0x20e   :  { %2368 = vst.msk [vmem:[%s4405_s3 + $0x130] sm:$0xff] %vm1302_vm0, %v2304_v37  ;;  %v2302_v25 = vmax.f32 %v2156_v38, 0.0  ;;  %v2167_v4 = vadd.f32 %v2710_v21, %v1878_v17  ;;  %v4423_v37 = vld [vmem:[#allocation2_spill] sm:$0xff] }
 0x20f   :  { %v1927_v42 = vpop.f32.mrf.mxu1  ;;  %v2158_v47 = vpop.f32.mrf.mxu0  ;;  %v1626_v38 = vadd.f32 %v4281_v34, %v4423_v37  ;;  %v1923_v21 = vadd.f32 %v4200_v52, %v1634_v13  ;;  %v4431_v13 = vld [vmem:[#allocation10_spill] sm:$0xff]  ;;  %v4432_v37 = vld [vmem:[#allocation13_spill] sm:$0xff] }
 0x210   :  { %2366 = vst.msk [vmem:[%s4405_s3 + $0x120] sm:$0xff] %vm1302_vm0, %v2302_v25  ;;  %v2305_v57 = vmax.f32 %v2167_v4, 0.0  ;;  %v2159_v46 = vadd.f32 %v2158_v47, %v1870_v23  ;;  %v4424_v4 = vld [vmem:[#allocation5_spill] sm:$0xff] }
 0x211   :  { %v4232_v48 = vpop.f32.mrf.mxu1  ;;  %v2713_v60 = vpop.f32.mrf.mxu0  ;;  %v1637_v42 = vadd.f32 %v4281_v34, %v4424_v4  ;;  %v1915_v47 = vadd.f32 %v4170_v15, %v1626_v38  ;;  %v1669_v38 = vadd.f32 %v4281_v34, %v4432_v37 }
 0x212   :  { %2369 = vst.msk [vmem:[%s4405_s3 + $0x138] sm:$0xff] %vm1302_vm0, %v2305_v57  ;;  %v2303_v31 = vmax.f32 %v2159_v46, 0.0  ;;  %v2180_v28 = vadd.f32 %v2713_v60, %v1891_v2  ;;  %v4425_v46 = vld [vmem:[#allocation3_spill] sm:$0xff] }
 0x213   :  { %v1932_v55 = vpop.f32.mrf.mxu1  ;;  %v2171_v8 = vpop.f32.mrf.mxu0  ;;  %v1629_v60 = vadd.f32 %v4281_v34, %v4425_v46  ;;  %v1926_v3 = vadd.f32 %v4216_v26, %v1637_v42  ;;  %v4433_v42 = vld [vmem:[#allocation11_spill] sm:$0xff] }
 0x214   :  { %2367 = vst.msk [vmem:[%s4405_s3 + $0x128] sm:$0xff] %vm1302_vm0, %v2303_v31  ;;  %v2308_v29 = vmax.f32 %v2180_v28, 0.0  ;;  %v2172_v19 = vadd.f32 %v2171_v8, %v1883_v32  ;;  %v4426_v55 = vld [vmem:[#allocation8_spill] sm:$0xff] }
 0x215   :  { %v4248_v10 = vpop.f32.mrf.mxu1  ;;  %v2714_v5 = vpop.f32.mrf.mxu0  ;;  %v1650_v8 = vadd.f32 %v4281_v34, %v4426_v55  ;;  %v1918_v45 = vadd.f32 %v4184_v51, %v1629_v60 }
 0x216   :  { %2372 = vst.msk [vmem:[%s4405_s3 + $0x150] sm:$0xff] %vm1302_vm0, %v2308_v29  ;;  %v2306_v30 = vmax.f32 %v2172_v19, 0.0  ;;  %v2183_v24 = vadd.f32 %v2714_v5, %v1894_v33  ;;  %v4427_v5 = vld [vmem:[#allocation6_spill] sm:$0xff] }
 0x217   :  { %v1935_v1 = vpop.f32.mrf.mxu1  ;;  %v2174_v62 = vpop.f32.mrf.mxu0  ;;  %v1642_v9 = vadd.f32 %v4281_v34, %v4427_v5 }
 0x218   :  { %2370 = vst.msk [vmem:[%s4405_s3 + $0x140] sm:$0xff] %vm1302_vm0, %v2306_v30  ;;  %v2309_v7 = vmax.f32 %v2183_v24, 0.0  ;;  %v2175_v6 = vadd.f32 %v2174_v62, %v1886_v22  ;;  %v4428_v62 = vld [vmem:[#allocation9_spill] sm:$0xff] }
 0x219   :  { %v1938_v20 = vpop.f32.mrf.mxu1  ;;  %v2717_v27 = vpop.f32.mrf.mxu0  ;;  %v1653_v36 = vadd.f32 %v4281_v34, %v4428_v62 }
 0x21a   :  { %2373 = vst.msk [vmem:[%s4405_s3 + $0x158] sm:$0xff] %vm1302_vm0, %v2309_v7  ;;  %v2307_v41 = vmax.f32 %v2175_v6, 0.0  ;;  %v2196_v50 = vadd.f32 %v2717_v27, %v1907_v54  ;;  %v1939_v22 = vadd.f32 %v1938_v20, %v1650_v8  ;;  %v1931_v54 = vadd.f32 %v4232_v48, %v1642_v9  ;;  %v4435_v8 = vld [vmem:[#allocation16_spill] sm:$0xff] }
 0x21b   :  { %v1940_v35 = vpop.f32.mrf.mxu1  ;;  %v2187_v61 = vpop.f32.mrf.mxu0 }
 0x21c   :  { %2371 = vst.msk [vmem:[%s4405_s3 + $0x148] sm:$0xff] %vm1302_vm0, %v2307_v41  ;;  %v2312_v40 = vmax.f32 %v2196_v50, 0.0  ;;  %v2188_v18 = vadd.f32 %v2187_v61, %v1899_v56  ;;  %v1645_v56 = vadd.f32 %v4281_v34, %v4429_v44 }
 0x21d   :  { %v1941_v59 = vpop.f32.mrf.mxu1  ;;  %v2718_v0 = vpop.f32.mrf.mxu0 }
 0x21e   :  { %2376 = vst.msk [vmem:[%s4405_s3 + $0x170] sm:$0xff] %vm1302_vm0, %v2312_v40  ;;  %v2310_v58 = vmax.f32 %v2188_v18, 0.0  ;;  %v2199_v39 = vadd.f32 %v2718_v0, %v1910_v14  ;;  %v1942_v41 = vadd.f32 %v1941_v59, %v1653_v36  ;;  %v1666_v14 = vadd.f32 %v4281_v34, %v4430_v11 }
 0x21f   :  { %v1943_v16 = vpop.f32.mrf.mxu1  ;;  %v2190_v17 = vpop.f32.mrf.mxu0  ;;  %v1934_v40 = vadd.f32 %v4248_v10, %v1645_v56 }
 0x220   :  { %2374 = vst.msk [vmem:[%s4405_s3 + $0x160] sm:$0xff] %vm1302_vm0, %v2310_v58  ;;  %v2313_v43 = vmax.f32 %v2199_v39, 0.0  ;;  %v2191_v53 = vadd.f32 %v2190_v17, %v1902_v49  ;;  %v1658_v49 = vadd.f32 %v4281_v34, %v4431_v13 }
 0x221   :  { %v1946_v23 = vpop.f32.mrf.mxu1  ;;  %v2721_v25 = vpop.f32.mrf.mxu0 }
 0x222   :  { %2377 = vst.msk [vmem:[%s4405_s3 + $0x178] sm:$0xff] %vm1302_vm0, %v2313_v43  ;;  %v2311_v52 = vmax.f32 %v2191_v53, 0.0  ;;  %v2212_v63 = vadd.f32 %v2721_v25, %v1923_v21  ;;  %v1947_v21 = vadd.f32 %v1946_v23, %v1658_v49 }
 0x223   :  { %v1948_v2 = vpop.f32.mrf.mxu1  ;;  %v2203_v57 = vpop.f32.mrf.mxu0 }
 0x224   :  { %2375 = vst.msk [vmem:[%s4405_s3 + $0x168] sm:$0xff] %vm1302_vm0, %v2311_v52  ;;  %v2316_v15 = vmax.f32 %v2212_v63, 0.0  ;;  %v2204_v32 = vadd.f32 %v2203_v57, %v1915_v47  ;;  %v1661_v47 = vadd.f32 %v4281_v34, %v4433_v42 }
 0x225   :  { %v1949_v31 = vpop.f32.mrf.mxu1  ;;  %v2722_v28 = vpop.f32.mrf.mxu0 }
 0x226   :  { %2380 = vst.msk [vmem:[%s4405_s3 + $0x190] sm:$0xff] %vm1302_vm0, %v2316_v15  ;;  %v2314_v26 = vmax.f32 %v2204_v32, 0.0  ;;  %v2215_v33 = vadd.f32 %v2722_v28, %v1926_v3  ;;  %v1950_v46 = vadd.f32 %v1949_v31, %v1661_v47  ;;  %v4434_v28 = vld [vmem:[#allocation14_spill] sm:$0xff] }
 0x227   :  { %v1951_v29 = vpop.f32.mrf.mxu1  ;;  %v2206_v19 = vpop.f32.mrf.mxu0  ;;  %v1674_v55 = vadd.f32 %v4281_v34, %v4434_v28 }
 0x228   :  { %2378 = vst.msk [vmem:[%s4405_s3 + $0x180] sm:$0xff] %vm1302_vm0, %v2314_v26  ;;  %v2317_v30 = vmax.f32 %v2215_v33, 0.0  ;;  %v2207_v51 = vadd.f32 %v2206_v19, %v1918_v45  ;;  %v1682_v45 = vadd.f32 %v4281_v34, %v4435_v8 }
 0x229   :  { %v1954_v24 = vpop.f32.mrf.mxu1  ;;  %v2725_v1 = vpop.f32.mrf.mxu0 }
 0x22a   :  { %2381 = vst.msk [vmem:[%s4405_s3 + $0x198] sm:$0xff] %vm1302_vm0, %v2317_v30  ;;  %v2315_v7 = vmax.f32 %v2207_v51, 0.0  ;;  %v2228_v6 = vadd.f32 %v2725_v1, %v1939_v22  ;;  %v1955_v58 = vadd.f32 %v1954_v24, %v1666_v14  ;;  %v4436_v51 = vld [vmem:[#allocation15_spill] sm:$0xff]  ;;  %v4437_v1 = vld [vmem:[#allocation17_spill] sm:$0xff] }
 0x22b   :  { %v1956_v20 = vpop.f32.mrf.mxu1  ;;  %v2219_v27 = vpop.f32.mrf.mxu0  ;;  %v1677_v24 = vadd.f32 %v4281_v34, %v4436_v51  ;;  %v1685_v62 = vadd.f32 %v4281_v34, %v4437_v1 }
 0x22c   :  { %2379 = vst.msk [vmem:[%s4405_s3 + $0x188] sm:$0xff] %vm1302_vm0, %v2315_v7  ;;  %v2320_v50 = vmax.f32 %v2228_v6, 0.0  ;;  %v2220_v48 = vadd.f32 %v2219_v27, %v1931_v54 }
 0x22d   :  { %v1957_v35 = vpop.f32.mrf.mxu1  ;;  %v2726_v61 = vpop.f32.mrf.mxu0 }
 0x22e   :  { %2384 = vst.msk [vmem:[%s4405_s3 + $0x1b0] sm:$0xff] %vm1302_vm0, %v2320_v50  ;;  %v2318_v18 = vmax.f32 %v2220_v48, 0.0  ;;  %v2231_v59 = vadd.f32 %v2726_v61, %v1942_v41  ;;  %v1958_v52 = vadd.f32 %v1957_v35, %v1669_v38 }
 0x22f   :  { %v1959_v0 = vpop.f32.mrf.mxu1  ;;  %v2222_v12 = vpop.f32.mrf.mxu0 }
 0x230   :  { %2382 = vst.msk [vmem:[%s4405_s3 + $0x1a0] sm:$0xff] %vm1302_vm0, %v2318_v18  ;;  %v2321_v39 = vmax.f32 %v2231_v59, 0.0  ;;  %v2223_v10 = vadd.f32 %v2222_v12, %v1934_v40 }
 0x231   :  { %v1962_v16 = vpop.f32.mrf.mxu1  ;;  %v2729_v17 = vpop.f32.mrf.mxu0 }
 0x232   :  { %2385 = vst.msk [vmem:[%s4405_s3 + $0x1b8] sm:$0xff] %vm1302_vm0, %v2321_v39  ;;  %v2319_v43 = vmax.f32 %v2223_v10, 0.0  ;;  %v2244_v53 = vadd.f32 %v2729_v17, %v1955_v58  ;;  %v1963_v19 = vadd.f32 %v1962_v16, %v1674_v55 }
 0x233   :  { %v1964_v25 = vpop.f32.mrf.mxu1  ;;  %v2235_v4 = vpop.f32.mrf.mxu0 }
 0x234   :  { %2383 = vst.msk [vmem:[%s4405_s3 + $0x1a8] sm:$0xff] %vm1302_vm0, %v2319_v43  ;;  %v2324_v63 = vmax.f32 %v2244_v53, 0.0  ;;  %v2236_v23 = vadd.f32 %v2235_v4, %v1947_v21 }
 0x235   :  { %v1965_v2 = vpop.f32.mrf.mxu1  ;;  %v2730_v57 = vpop.f32.mrf.mxu0 }
 0x236   :  { %2388 = vst.msk [vmem:[%s4405_s3 + $0x1d0] sm:$0xff] %vm1302_vm0, %v2324_v63  ;;  %v2322_v60 = vmax.f32 %v2236_v23, 0.0  ;;  %v2247_v3 = vadd.f32 %v2730_v57, %v1958_v52  ;;  %v1966_v20 = vadd.f32 %v1965_v2, %v1677_v24 }
 0x237   :  { %v1967_v15 = vpop.f32.mrf.mxu1  ;;  %v2238_v32 = vpop.f32.mrf.mxu0 }
 0x238   :  { %2386 = vst.msk [vmem:[%s4405_s3 + $0x1c0] sm:$0xff] %vm1302_vm0, %v2322_v60  ;;  %v2325_v31 = vmax.f32 %v2247_v3, 0.0  ;;  %v2239_v26 = vadd.f32 %v2238_v32, %v1950_v46 }
 0x239   :  { %v1970_v33 = vpop.f32.mrf.mxu1  ;;  %v2733_v29 = vpop.f32.mrf.mxu0 }
 0x23a   :  { %2389 = vst.msk [vmem:[%s4405_s3 + $0x1d8] sm:$0xff] %vm1302_vm0, %v2325_v31  ;;  %v2323_v5 = vmax.f32 %v2239_v26, 0.0  ;;  %v1971_v9 = vadd.f32 %v1970_v33, %v1682_v45 }
 0x23b   :  { %v1972_v22 = vpop.f32.mrf.mxu1  ;;  %v2251_v30 = vpop.f32.mrf.mxu0 }
 0x23c   :  { %2387 = vst.msk [vmem:[%s4405_s3 + $0x1c8] sm:$0xff] %vm1302_vm0, %v2323_v5  ;;  %v2260_v36 = vadd.f32 %v2733_v29, %v1971_v9  ;;  %v2252_v54 = vadd.f32 %v2251_v30, %v1963_v19 }
 0x23d   :  { %v1973_v7 = vpop.f32.mrf.mxu1  ;;  %v2734_v6 = vpop.f32.mrf.mxu0 }
 0x23e   :  { %v2328_v27 = vmax.f32 %v2260_v36, 0.0  ;;  %v2326_v44 = vmax.f32 %v2252_v54, 0.0  ;;  %v1974_v56 = vadd.f32 %v1973_v7, %v1685_v62 }
 0x23f   :  { %v1975_v41 = vpop.f32.mrf.mxu1  ;;  %v2254_v50 = vpop.f32.mrf.mxu0 }
 0x240   :  { %2392 = vst.msk [vmem:[%s4405_s3 + $0x1f0] sm:$0xff] %vm1302_vm0, %v2328_v27  ;;  %2390 = vst.msk [vmem:[%s4405_s3 + $0x1e0] sm:$0xff] %vm1302_vm0, %v2326_v44  ;;  %v2263_v34 = vadd.f32 %v2734_v6, %v1974_v56  ;;  %v2255_v48 = vadd.f32 %v2254_v50, %v1966_v20 }
 0x242   :  { %v2329_v35 = vmax.f32 %v2263_v34, 0.0  ;;  %v2327_v61 = vmax.f32 %v2255_v48, 0.0 }
 0x244   :  { %2393 = vst.msk [vmem:[%s4405_s3 + $0x1f8] sm:$0xff] %vm1302_vm0, %v2329_v35  ;;  %2391 = vst.msk [vmem:[%s4405_s3 + $0x1e8] sm:$0xff] %vm1302_vm0, %v2327_v61 }

// kernel: espcn_forward.6
= control target key start
LH: loop header
LB: loop body
LE: loop exit
PB: predicated region body
PF: predicated region fallthrough
CT: control target
= control target key end

     0   :  { %v3030_v0 = vmov 0   ;;  %vm1302_vm0 = vcmask 523264   ;;  %vm2330_vm1 = vcmask 261120   ;;  %s4403_s1 = inlined_call_operand.vmem [shape: bf16[576,32], index: 1, kind: input, shape index: {}]   ;;  %s4404_s0 = inlined_call_operand.vmem [shape: bf16[512,576], index: 0, kind: input, shape index: {}]   ;;  %s4405_s2 = inlined_call_operand.vmem [shape: f32[1,32], index: 2, kind: input, shape index: {}]   ;;  %s4406_s3 = inlined_call_operand.vmem [shape: f32[512,32], index: 3, kind: output, shape index: {}]  }
   0x1   :  { %1399 = vmatprep.subr.bf16.mxu0 %v3030_v0  ;;  %2736 = vmatprep.subr.bf16.mxu1 %v3030_v0  ;;  %v2769_v1 = vld [vmem:[%s4403_s1 + $0x38] sm:$0xff]   ;;  %v2770_v2 = vld [vmem:[%s4403_s1 + $0x30] sm:$0xff]   ;;  %v2771_v3 = vld [vmem:[%s4403_s1 + $0x28] sm:$0xff]  }
   0x2   :  { %1400 = vmatpush1.bf16.msra.mxu0 %v2769_v1  ;;  %2752 = vmatpush1.bf16.msra.mxu1 %v2769_v1  ;;  %v2772_v4 = vld [vmem:[%s4403_s1 + $0x20] sm:$0xff]   ;;  %v2773_v5 = vld [vmem:[%s4403_s1 + $0x18] sm:$0xff]   ;;  %v2774_v7 = vld [vmem:[%s4403_s1 + $0x10] sm:$0xff]  }
   0x3   :  { %1401 = vmatprep.subr.bf16.mxu0 %v3030_v0  ;;  %2737 = vmatprep.subr.bf16.mxu1 %v3030_v0  ;;  %v2787_v6 = vld [vmem:[%s4404_s0 + $0x4] ss:$20 sps:$4 sm:$0xff]   ;;  %v2775_v9 = vld [vmem:[%s4403_s1 + $0x8] sm:$0xff]   ;;  %v2778_v12 = vld [vmem:[%s4403_s1 + $0x70] sm:$0xff]  }
   0x4   :  { %v2790_v8 = vld [vmem:[%s4404_s0 + $0x3c4] ss:$20 sps:$4 sm:$0xff]   ;;  %1431 = vmatprep.mubr.bf16.mxu0 %v2787_v6  ;;  %v2779_v13 = vld [vmem:[%s4403_s1 + $0x68] sm:$0xff]   ;;  %v2782_v16 = vld [vmem:[%s4403_s1 + $0x50] sm:$0xff]  }
   0x5   :  { %1623 = vmatprep.mubr.bf16.mxu1 %v2790_v8  ;;  %v2776_v10 = vld [vmem:[%s4403_s1] sm:$0xff]   ;;  %v2777_v11 = vld [vmem:[%s4403_s1 + $0x78] sm:$0xff]   ;;  %v2783_v17 = vld [vmem:[%s4403_s1 + $0x48] sm:$0xff]  }
   0x6   :  { %1402 = vmatpush1.bf16.msra.mxu0 %v2770_v2  ;;  %2753 = vmatpush1.bf16.msra.mxu1 %v2770_v2  ;;  %v2780_v14 = vld [vmem:[%s4403_s1 + $0x60] sm:$0xff]   ;;  %v2781_v15 = vld [vmem:[%s4403_s1 + $0x58] sm:$0xff]   ;;  %v2840_v25 = vld [vmem:[%s4403_s1 + $0x110] sm:$0xff]  }
   0x7   :  { %1403 = vmatprep.subr.bf16.mxu0 %v3030_v0  ;;  %2738 = vmatprep.subr.bf16.mxu1 %v3030_v0  ;;  %v2784_v18 = vld [vmem:[%s4403_s1 + $0x40] sm:$0xff]   ;;  %v2791_v19 = vld [vmem:[%s4403_s1 + $0x118] sm:$0xff]   ;;  %v2793_v26 = vld [vmem:[%s4403_s1 + $0xb0] sm:$0xff]  }
   0x8   :  { %v2785_v20 = vld [vmem:[%s4404_s0] ss:$20 sps:$4 sm:$0xff]   ;;  %v2792_v22 = vld [vmem:[%s4403_s1 + $0xb8] sm:$0xff]   ;;  %v2800_v29 = vld [vmem:[%s4403_s1 + $0xa8] sm:$0xff]  }
   0x9   :  { %v2788_v21 = vld [vmem:[%s4404_s0 + $0x3c0] ss:$20 sps:$4 sm:$0xff]   ;;  %v2798_v27 = vld [vmem:[%s4404_s0 + $0x28] ss:$20 sps:$4 sm:$0xff]   ;;  %v2806_v34 = vld [vmem:[%s4404_s0 + $0x50] ss:$20 sps:$4 sm:$0xff]  }
   0xa   :  { %1404 = vmatpush1.bf16.msra.mxu0 %v2771_v3  ;;  %2754 = vmatpush1.bf16.msra.mxu1 %v2771_v3  ;;  %v2794_v23 = vld [vmem:[%s4404_s0 + $0x2c] ss:$20 sps:$4 sm:$0xff]   ;;  %v2799_v28 = vld [vmem:[%s4404_s0 + $0x3e8] ss:$20 sps:$4 sm:$0xff]   ;;  %v2807_v35 = vld [vmem:[%s4404_s0 + $0x410] ss:$20 sps:$4 sm:$0xff]  }
   0xb   :  { %1405 = vmatprep.subr.bf16.mxu0 %v3030_v0  ;;  %2739 = vmatprep.subr.bf16.mxu1 %v3030_v0  ;;  %v2796_v24 = vld [vmem:[%s4404_s0 + $0x3ec] ss:$20 sps:$4 sm:$0xff]   ;;  %v2802_v31 = vld [vmem:[%s4404_s0 + $0x54] ss:$20 sps:$4 sm:$0xff]   ;;  %v2808_v36 = vld [vmem:[%s4403_s1 + $0x98] sm:$0xff]  }
   0xc   :  { %v2881_v30 = vld [vmem:[%s4403_s1 + $0x108] sm:$0xff]   ;;  %v2801_v33 = vld [vmem:[%s4403_s1 + $0xa0] sm:$0xff]   ;;  %v2810_v37 = vld [vmem:[%s4404_s0 + $0x7c] ss:$20 sps:$4 sm:$0xff]  }
   0xd   :  { %v2804_v32 = vld [vmem:[%s4404_s0 + $0x414] ss:$20 sps:$4 sm:$0xff]   ;;  %v2812_v38 = vld [vmem:[%s4404_s0 + $0x43c] ss:$20 sps:$4 sm:$0xff]   ;;  %v2814_v40 = vld [vmem:[%s4404_s0 + $0x78] ss:$20 sps:$4 sm:$0xff]  }
   0xe   :  { %1406 = vmatpush1.bf16.msra.mxu0 %v2772_v4  ;;  %2755 = vmatpush1.bf16.msra.mxu1 %v2772_v4  ;;  %v2809_v39 = vld [vmem:[%s4403_s1 + $0x90] sm:$0xff]   ;;  %v2815_v41 = vld [vmem:[%s4404_s0 + $0x438] ss:$20 sps:$4 sm:$0xff]   ;;  %v2918_v44 = vld [vmem:[%s4403_s1 + $0x100] sm:$0xff]  }
   0xf   :  { %1407 = vmatprep.subr.bf16.mxu0 %v3030_v0  ;;  %2740 = vmatprep.subr.bf16.mxu1 %v3030_v0  ;;  %v2816_v42 = vld [vmem:[%s4403_s1 + $0x88] sm:$0xff]   ;;  %v2818_v43 = vld [vmem:[%s4404_s0 + $0xa4] ss:$20 sps:$4 sm:$0xff]   ;;  %v2822_v47 = vld [vmem:[%s4404_s0 + $0xa0] ss:$20 sps:$4 sm:$0xff]  }
  0x10   :  { %v2820_v45 = vld [vmem:[%s4404_s0 + $0x464] ss:$20 sps:$4 sm:$0xff]   ;;  %v2823_v48 = vld [vmem:[%s4404_s0 + $0x460] ss:$20 sps:$4 sm:$0xff]   ;;  %v2830_v53 = vld [vmem:[%s4404_s0 + $0xc8] ss:$20 sps:$4 sm:$0xff]  }
  0x11   :  { %v2817_v46 = vld [vmem:[%s4403_s1 + $0x80] sm:$0xff]   ;;  %v2824_v49 = vld [vmem:[%s4403_s1 + $0xf8] sm:$0xff]   ;;  %v2825_v52 = vld [vmem:[%s4403_s1 + $0xf0] sm:$0xff]  }
  0x12   :  { %1408 = vmatpush1.bf16.msra.mxu0 %v2773_v5  ;;  %2756 = vmatpush1.bf16.msra.mxu1 %v2773_v5  ;;  %v2826_v50 = vld [vmem:[%s4404_s0 + $0xcc] ss:$20 sps:$4 sm:$0xff]   ;;  %v2831_v54 = vld [vmem:[%s4404_s0 + $0x488] ss:$20 sps:$4 sm:$0xff]   ;;  %v2838_v59 = vld [vmem:[%s4404_s0 + $0xf0] ss:$20 sps:$4 sm:$0xff]  }
  0x13   :  { %1409 = vmatprep.subr.bf16.mxu0 %v3030_v0  ;;  %2741 = vmatprep.subr.bf16.mxu1 %v3030_v0  ;;  %v2828_v51 = vld [vmem:[%s4404_s0 + $0x48c] ss:$20 sps:$4 sm:$0xff]   ;;  %v2834_v56 = vld [vmem:[%s4404_s0 + $0xf4] ss:$20 sps:$4 sm:$0xff]   ;;  %v2839_v60 = vld [vmem:[%s4404_s0 + $0x4b0] ss:$20 sps:$4 sm:$0xff]  }
  0x14   :  { %v2832_v55 = vld [vmem:[%s4403_s1 + $0xe8] sm:$0xff]   ;;  %v2833_v58 = vld [vmem:[%s4403_s1 + $0xe0] sm:$0xff]   ;;  %v2841_v61 = vld [vmem:[%s4403_s1 + $0xd8] sm:$0xff]  }
  0x15   :  { %v2836_v57 = vld [vmem:[%s4404_s0 + $0x4b4] ss:$20 sps:$4 sm:$0xff]   ;;  %v2843_v62 = vld [vmem:[%s4404_s0 + $0x11c] ss:$20 sps:$4 sm:$0xff]   ;;  %v2847_v2 = vld [vmem:[%s4404_s0 + $0x118] ss:$20 sps:$4 sm:$0xff]  }
  0x16   :  { %1410 = vmatpush1.bf16.msra.mxu0 %v2774_v7  ;;  %2757 = vmatpush1.bf16.msra.mxu1 %v2774_v7  ;;  %v2845_v63 = vld [vmem:[%s4404_s0 + $0x4dc] ss:$20 sps:$4 sm:$0xff]   ;;  %v2848_v3 = vld [vmem:[%s4404_s0 + $0x4d8] ss:$20 sps:$4 sm:$0xff]   ;;  %v2850_v7 = vld [vmem:[%s4403_s1 + $0xc0] sm:$0xff]  }
  0x17   :  { %1411 = vmatprep.subr.bf16.mxu0 %v3030_v0  ;;  %2742 = vmatprep.subr.bf16.mxu1 %v3030_v0  ;;  %v2842_v1 = vld [vmem:[%s4403_s1 + $0xd0] sm:$0xff]   ;;  %v2849_v4 = vld [vmem:[%s4403_s1 + $0xc8] sm:$0xff]   ;;  %v2851_v5 = vld [vmem:[%s4404_s0 + $0x144] ss:$20 sps:$4 sm:$0xff]  }
  0x18   :  { %v2855_v6 = vld [vmem:[%s4404_s0 + $0xc] ss:$20 sps:$4 sm:$0xff]   ;;  %v2853_v8 = vld [vmem:[%s4404_s0 + $0x8] ss:$20 sps:$4 sm:$0xff]  }
  0x1a   :  { %1412 = vmatpush1.bf16.msra.mxu0 %v2775_v9  ;;  %2758 = vmatpush1.bf16.msra.mxu1 %v2775_v9  ;;  %v2856_v9 = vld [vmem:[%s4404_s0 + $0x140] ss:$20 sps:$4 sm:$0xff]  }
  0x1b   :  { %1413 = vmatprep.subr.bf16.mxu0 %v3030_v0  ;;  %2743 = vmatprep.subr.bf16.mxu1 %v3030_v0 }
  0x1e   :  { %1414 = vmatpush1.bf16.msra.mxu0 %v2776_v10  ;;  %2759 = vmatpush1.bf16.msra.mxu1 %v2776_v10  ;;  %v2857_v10 = vld [vmem:[%s4404_s0 + $0x16c] ss:$20 sps:$4 sm:$0xff]  }
  0x1f   :  { %1415 = vmatprep.subr.bf16.mxu0 %v3030_v0  ;;  %2744 = vmatprep.subr.bf16.mxu1 %v3030_v0 }
  0x22   :  { %1416 = vmatpush2.bf16.msra.mxu0 %v2777_v11  ;;  %2760 = vmatpush2.bf16.msra.mxu1 %v2777_v11  ;;  %v2859_v11 = vld [vmem:[%s4404_s0 + $0x34] ss:$20 sps:$4 sm:$0xff]  }
  0x23   :  { %1417 = vmatprep.subr.bf16.mxu0 %v3030_v0  ;;  %2745 = vmatprep.subr.bf16.mxu1 %v3030_v0 }
  0x26   :  { %1418 = vmatpush2.bf16.msra.mxu0 %v2778_v12  ;;  %2761 = vmatpush2.bf16.msra.mxu1 %v2778_v12  ;;  %v2862_v12 = vld [vmem:[%s4404_s0 + $0x30] ss:$20 sps:$4 sm:$0xff]  }
  0x27   :  { %1419 = vmatprep.subr.bf16.mxu0 %v3030_v0  ;;  %2746 = vmatprep.subr.bf16.mxu1 %v3030_v0 }
  0x2a   :  { %1420 = vmatpush2.bf16.msra.mxu0 %v2779_v13  ;;  %2762 = vmatpush2.bf16.msra.mxu1 %v2779_v13  ;;  %v2863_v13 = vld [vmem:[%s4404_s0 + $0x194] ss:$20 sps:$4 sm:$0xff]  }
  0x2b   :  { %1421 = vmatprep.subr.bf16.mxu0 %v3030_v0  ;;  %2747 = vmatprep.subr.bf16.mxu1 %v3030_v0 }
  0x2e   :  { %1422 = vmatpush2.bf16.msra.mxu0 %v2780_v14  ;;  %2763 = vmatpush2.bf16.msra.mxu1 %v2780_v14  ;;  %v2865_v14 = vld [vmem:[%s4404_s0 + $0x5c] ss:$20 sps:$4 sm:$0xff]  }
  0x2f   :  { %1423 = vmatprep.subr.bf16.mxu0 %v3030_v0  ;;  %2748 = vmatprep.subr.bf16.mxu1 %v3030_v0 }
  0x32   :  { %1424 = vmatpush2.bf16.msra.mxu0 %v2781_v15  ;;  %2764 = vmatpush2.bf16.msra.mxu1 %v2781_v15  ;;  %v2867_v15 = vld [vmem:[%s4404_s0 + $0x190] ss:$20 sps:$4 sm:$0xff]  }
  0x33   :  { %1425 = vmatprep.subr.bf16.mxu0 %v3030_v0  ;;  %2749 = vmatprep.subr.bf16.mxu1 %v3030_v0 }
  0x36   :  { %1426 = vmatpush2.bf16.msra.mxu0 %v2782_v16  ;;  %2765 = vmatpush2.bf16.msra.mxu1 %v2782_v16  ;;  %v2868_v16 = vld [vmem:[%s4404_s0 + $0x58] ss:$20 sps:$4 sm:$0xff]  }
  0x37   :  { %1427 = vmatprep.subr.bf16.mxu0 %v3030_v0  ;;  %2750 = vmatprep.subr.bf16.mxu1 %v3030_v0 }
  0x3a   :  { %1428 = vmatpush2.bf16.msra.mxu0 %v2783_v17  ;;  %2766 = vmatpush2.bf16.msra.mxu1 %v2783_v17  ;;  %v2869_v17 = vld [vmem:[%s4404_s0 + $0x1bc] ss:$20 sps:$4 sm:$0xff]  }
  0x3b   :  { %1429 = vmatprep.subr.bf16.mxu0 %v3030_v0  ;;  %2751 = vmatprep.subr.bf16.mxu1 %v3030_v0 }
  0x3e   :  { %1430 = vmatpush2.bf16.msra.mxu0 %v2784_v18  ;;  %2767 = vmatpush2.bf16.msra.mxu1 %v2784_v18  ;;  %v2871_v18 = vld [vmem:[%s4404_s0 + $0x84] ss:$20 sps:$4 sm:$0xff]  }
  0x3f   :  { %1688 = vmatprep.subr.bf16.mxu1 %v3030_v0  ;;  %2664 = vmatprep.subr.bf16.mxu0 %v2791_v19 }
  0x41   :  { %1432 = vmatmul.mubr.bf16.vlgmr.msra.gmra.mxu0 %v2785_v20  ;;  %1624 = vmatmul.mubr.bf16.vlgmr.msra.gmra.mxu1 %v2788_v21  ;;  %v2874_v20 = vld [vmem:[%s4404_s0 + $0x80] ss:$20 sps:$4 sm:$0xff]   ;;  %v2875_v21 = vld [vmem:[%s4404_s0 + $0x1e4] ss:$20 sps:$4 sm:$0xff]  }
  0x42   :  { %1689 = vmatpush1.bf16.msra.mxu1 %v2792_v22  ;;  %2665 = vmatpush3.bf16.msra.mxu0 %v2791_v19  ;;  %v2873_v19 = vld [vmem:[%s4404_s0 + $0x1b8] ss:$20 sps:$4 sm:$0xff]  }
  0x43   :  { %1690 = vmatprep.subr.bf16.mxu1 %v3030_v0  ;;  %1439 = vmatprep.mubr.bf16.mxu0 %v2794_v23  ;;  %v2877_v22 = vld [vmem:[%s4404_s0 + $0xac] ss:$20 sps:$4 sm:$0xff]  }
  0x44   :  { %1631 = vmatprep.mubr.bf16.mxu1 %v2796_v24  ;;  %2666 = vmatprep.subr.bf16.mxu0 %v2840_v25  ;;  %v2879_v23 = vld [vmem:[%s4404_s0 + $0x1e0] ss:$20 sps:$4 sm:$0xff]   ;;  %v2880_v24 = vld [vmem:[%s4404_s0 + $0xa8] ss:$20 sps:$4 sm:$0xff]  }
  0x46   :  { %1691 = vmatpush1.bf16.msra.mxu1 %v2793_v26  ;;  %2667 = vmatpush3.bf16.msra.mxu0 %v2840_v25  ;;  %v2882_v25 = vld [vmem:[%s4404_s0 + $0x20c] ss:$20 sps:$4 sm:$0xff]   ;;  %v2884_v26 = vld [vmem:[%s4404_s0 + $0xd4] ss:$20 sps:$4 sm:$0xff]  }
  0x47   :  { %1692 = vmatprep.subr.bf16.mxu1 %v3030_v0  ;;  %2668 = vmatprep.subr.bf16.mxu0 %v2881_v30 }
  0x49   :  { %1440 = vmatmul.mubr.bf16.gmra.mxu0 %v2798_v27  ;;  %1632 = vmatmul.mubr.bf16.gmra.mxu1 %v2799_v28  ;;  %v2886_v27 = vld [vmem:[%s4404_s0 + $0x208] ss:$20 sps:$4 sm:$0xff]   ;;  %v2887_v28 = vld [vmem:[%s4404_s0 + $0xd0] ss:$20 sps:$4 sm:$0xff]  }
  0x4a   :  { %1693 = vmatpush1.bf16.msra.mxu1 %v2800_v29  ;;  %1447 = vmatprep.mubr.bf16.mxu0 %v2802_v31  ;;  %v2888_v29 = vld [vmem:[%s4404_s0 + $0x234] ss:$20 sps:$4 sm:$0xff]   ;;  %v2892_v31 = vld [vmem:[%s4404_s0 + $0x230] ss:$20 sps:$4 sm:$0xff]  }
  0x4b   :  { %1694 = vmatprep.subr.bf16.mxu1 %v3030_v0  ;;  %1639 = vmatprep.mubr.bf16.mxu1 %v2804_v32  ;;  %v2893_v32 = vld [vmem:[%s4404_s0 + $0xf8] ss:$20 sps:$4 sm:$0xff]  }
  0x4c   :  { %2669 = vmatpush3.bf16.msra.mxu0 %v2881_v30  ;;  %v2890_v30 = vld [vmem:[%s4404_s0 + $0xfc] ss:$20 sps:$4 sm:$0xff]  }
  0x4d   :  { %2670 = vmatprep.subr.bf16.mxu0 %v2918_v44 }
  0x4e   :  { %1695 = vmatpush1.bf16.msra.mxu1 %v2801_v33  ;;  %v2894_v33 = vld [vmem:[%s4404_s0 + $0x25c] ss:$20 sps:$4 sm:$0xff]  }
  0x4f   :  { %1696 = vmatprep.subr.bf16.mxu1 %v3030_v0 }
  0x50   :  { %2671 = vmatpush3.bf16.msra.mxu0 %v2918_v44  ;;  %v2911_v44 = vld [vmem:[%s4404_s0 + $0x170] ss:$20 sps:$4 sm:$0xff]  }
  0x51   :  { %1448 = vmatmul.mubr.bf16.gmra.mxu0 %v2806_v34  ;;  %1640 = vmatmul.mubr.bf16.gmra.mxu1 %v2807_v35  ;;  %v2896_v34 = vld [vmem:[%s4404_s0 + $0x124] ss:$20 sps:$4 sm:$0xff]  }
  0x52   :  { %1697 = vmatpush1.bf16.msra.mxu1 %v2808_v36  ;;  %1455 = vmatprep.mubr.bf16.mxu0 %v2810_v37  ;;  %v2898_v35 = vld [vmem:[%s4404_s0 + $0x258] ss:$20 sps:$4 sm:$0xff]   ;;  %v2899_v36 = vld [vmem:[%s4404_s0 + $0x120] ss:$20 sps:$4 sm:$0xff]  }
  0x53   :  { %1698 = vmatprep.subr.bf16.mxu1 %v3030_v0  ;;  %1647 = vmatprep.mubr.bf16.mxu1 %v2812_v38  ;;  %v2900_v37 = vld [vmem:[%s4404_s0 + $0x284] ss:$20 sps:$4 sm:$0xff]   ;;  %v2902_v38 = vld [vmem:[%s4404_s0 + $0x14c] ss:$20 sps:$4 sm:$0xff]  }
  0x56   :  { %1699 = vmatpush1.bf16.msra.mxu1 %v2809_v39  ;;  %v2904_v39 = vld [vmem:[%s4404_s0 + $0x280] ss:$20 sps:$4 sm:$0xff]  }
  0x57   :  { %1700 = vmatprep.subr.bf16.mxu1 %v3030_v0 }
  0x59   :  { %1456 = vmatmul.mubr.bf16.gmra.mxu0 %v2814_v40  ;;  %1648 = vmatmul.mubr.bf16.gmra.mxu1 %v2815_v41  ;;  %v2905_v40 = vld [vmem:[%s4404_s0 + $0x148] ss:$20 sps:$4 sm:$0xff]   ;;  %v2906_v41 = vld [vmem:[%s4404_s0 + $0x2ac] ss:$20 sps:$4 sm:$0xff]  }
  0x5a   :  { %1701 = vmatpush1.bf16.msra.mxu1 %v2816_v42  ;;  %1463 = vmatprep.mubr.bf16.mxu0 %v2818_v43  ;;  %v2908_v42 = vld [vmem:[%s4404_s0 + $0x174] ss:$20 sps:$4 sm:$0xff]  }
  0x5b   :  { %1702 = vmatprep.subr.bf16.mxu1 %v3030_v0  ;;  %1655 = vmatprep.mubr.bf16.mxu1 %v2820_v45  ;;  %v2910_v43 = vld [vmem:[%s4404_s0 + $0x2a8] ss:$20 sps:$4 sm:$0xff]  }
  0x5c   :  { %v2912_v45 = vld [vmem:[%s4404_s0 + $0x2d4] ss:$20 sps:$4 sm:$0xff]  }
  0x5e   :  { %1703 = vmatpush1.bf16.msra.mxu1 %v2817_v46  ;;  %v2914_v46 = vld [vmem:[%s4404_s0 + $0x19c] ss:$20 sps:$4 sm:$0xff]  }
  0x5f   :  { %1704 = vmatprep.subr.bf16.mxu1 %v3030_v0 }
  0x61   :  { %1464 = vmatmul.mubr.bf16.gmra.mxu0 %v2822_v47  ;;  %1656 = vmatmul.mubr.bf16.gmra.mxu1 %v2823_v48  ;;  %v2916_v47 = vld [vmem:[%s4404_s0 + $0x2d0] ss:$20 sps:$4 sm:$0xff]   ;;  %v2917_v48 = vld [vmem:[%s4404_s0 + $0x198] ss:$20 sps:$4 sm:$0xff]  }
  0x62   :  { %1705 = vmatpush2.bf16.msra.mxu1 %v2824_v49  ;;  %1471 = vmatprep.mubr.bf16.mxu0 %v2826_v50  ;;  %v2919_v49 = vld [vmem:[%s4404_s0 + $0x2fc] ss:$20 sps:$4 sm:$0xff]   ;;  %v2921_v50 = vld [vmem:[%s4404_s0 + $0x1c4] ss:$20 sps:$4 sm:$0xff]  }
  0x63   :  { %1706 = vmatprep.subr.bf16.mxu1 %v3030_v0  ;;  %1663 = vmatprep.mubr.bf16.mxu1 %v2828_v51  ;;  %v2923_v51 = vld [vmem:[%s4404_s0 + $0x2f8] ss:$20 sps:$4 sm:$0xff]  }
  0x66   :  { %1707 = vmatpush2.bf16.msra.mxu1 %v2825_v52  ;;  %v2924_v52 = vld [vmem:[%s4404_s0 + $0x1c0] ss:$20 sps:$4 sm:$0xff]  }
  0x67   :  { %1708 = vmatprep.subr.bf16.mxu1 %v3030_v0 }
  0x69   :  { %1472 = vmatmul.mubr.bf16.gmra.mxu0 %v2830_v53  ;;  %1664 = vmatmul.mubr.bf16.gmra.mxu1 %v2831_v54  ;;  %v2925_v53 = vld [vmem:[%s4404_s0 + $0x324] ss:$20 sps:$4 sm:$0xff]   ;;  %v2927_v54 = vld [vmem:[%s4404_s0 + $0x1ec] ss:$20 sps:$4 sm:$0xff]  }
  0x6a   :  { %1709 = vmatpush2.bf16.msra.mxu1 %v2832_v55  ;;  %1479 = vmatprep.mubr.bf16.mxu0 %v2834_v56  ;;  %v2929_v55 = vld [vmem:[%s4404_s0 + $0x320] ss:$20 sps:$4 sm:$0xff]   ;;  %v2930_v56 = vld [vmem:[%s4404_s0 + $0x1e8] ss:$20 sps:$4 sm:$0xff]  }
  0x6b   :  { %1710 = vmatprep.subr.bf16.mxu1 %v3030_v0  ;;  %1671 = vmatprep.mubr.bf16.mxu1 %v2836_v57  ;;  %v2931_v57 = vld [vmem:[%s4404_s0 + $0x34c] ss:$20 sps:$4 sm:$0xff]  }
  0x6e   :  { %1711 = vmatpush2.bf16.msra.mxu1 %v2833_v58  ;;  %v2933_v58 = vld [vmem:[%s4404_s0 + $0x214] ss:$20 sps:$4 sm:$0xff]  }
  0x6f   :  { %1712 = vmatprep.subr.bf16.mxu1 %v3030_v0 }
  0x71   :  { %1480 = vmatmul.mubr.bf16.gmra.mxu0 %v2838_v59  ;;  %1672 = vmatmul.mubr.bf16.gmra.mxu1 %v2839_v60  ;;  %v2935_v59 = vld [vmem:[%s4404_s0 + $0x348] ss:$20 sps:$4 sm:$0xff]   ;;  %v2936_v60 = vld [vmem:[%s4404_s0 + $0x210] ss:$20 sps:$4 sm:$0xff]  }
  0x72   :  { %1713 = vmatpush2.bf16.msra.mxu1 %v2841_v61  ;;  %1487 = vmatprep.mubr.bf16.mxu0 %v2843_v62  ;;  %v2937_v61 = vld [vmem:[%s4404_s0 + $0x374] ss:$20 sps:$4 sm:$0xff]   ;;  %v2939_v62 = vld [vmem:[%s4404_s0 + $0x23c] ss:$20 sps:$4 sm:$0xff]  }
  0x73   :  { %1714 = vmatprep.subr.bf16.mxu1 %v3030_v0  ;;  %1679 = vmatprep.mubr.bf16.mxu1 %v2845_v63  ;;  %v2941_v63 = vld [vmem:[%s4404_s0 + $0x370] ss:$20 sps:$4 sm:$0xff]  }
  0x76   :  { %1715 = vmatpush2.bf16.msra.mxu1 %v2842_v1  ;;  %v2942_v1 = vld [vmem:[%s4404_s0 + $0x238] ss:$20 sps:$4 sm:$0xff]  }
  0x77   :  { %1716 = vmatprep.subr.bf16.mxu1 %v3030_v0 }
  0x79   :  { %1488 = vmatmul.mubr.bf16.gmra.mxu0 %v2847_v2  ;;  %1680 = vmatmul.mubr.bf16.gmra.mxu1 %v2848_v3  ;;  %v2943_v2 = vld [vmem:[%s4404_s0 + $0x39c] ss:$20 sps:$4 sm:$0xff]   ;;  %v2945_v3 = vld [vmem:[%s4404_s0 + $0x264] ss:$20 sps:$4 sm:$0xff]  }
  0x7a   :  { %1717 = vmatpush2.bf16.msra.mxu1 %v2849_v4  ;;  %1495 = vmatprep.mubr.bf16.mxu0 %v2851_v5  ;;  %v2947_v4 = vld [vmem:[%s4404_s0 + $0x398] ss:$20 sps:$4 sm:$0xff]   ;;  %v2948_v5 = vld [vmem:[%s4404_s0 + $0x260] ss:$20 sps:$4 sm:$0xff]  }
  0x7b   :  { %1718 = vmatprep.subr.bf16.mxu1 %v3030_v0  ;;  %1720 = vmatprep.mubr.bf16.mxu1 %v2855_v6  ;;  %v2861_v0 = vld [vmem:[%s4404_s0 + $0x168] ss:$20 sps:$4 sm:$0xff]   ;;  %v2949_v6 = vld [vmem:[%s4404_s0 + $0x28c] ss:$20 sps:$4 sm:$0xff]  }
  0x7e   :  { %1719 = vmatpush2.bf16.msra.mxu1 %v2850_v7  ;;  %v2951_v7 = vld [vmem:[%s4404_s0 + $0x10] ss:$20 sps:$4 sm:$0xff]  }
  0x81   :  { %1496 = vmatmul.mubr.bf16.gmra.mxu0 %v2856_v9  ;;  %1721 = vmatmul.mubr.bf16.vlgmr.msra.gmra.mxu1 %v2853_v8  ;;  %v2952_v8 = vld [vmem:[%s4404_s0 + $0x288] ss:$20 sps:$4 sm:$0xff]   ;;  %v2953_v9 = vld [vmem:[%s4404_s0 + $0x38] ss:$20 sps:$4 sm:$0xff]  }
  0x82   :  { %1503 = vmatprep.mubr.bf16.mxu0 %v2857_v10  ;;  %1728 = vmatprep.mubr.bf16.mxu1 %v2859_v11  ;;  %v2954_v10 = vld [vmem:[%s4404_s0 + $0x2b4] ss:$20 sps:$4 sm:$0xff]  }
  0x83   :  { %v2956_v11 = vld [vmem:[%s4404_s0 + $0x60] ss:$20 sps:$4 sm:$0xff]  }
  0x89   :  { %1504 = vmatmul.mubr.bf16.gmra.mxu0 %v2861_v0  ;;  %1729 = vmatmul.mubr.bf16.gmra.mxu1 %v2862_v12 }
  0x8a   :  { %1511 = vmatprep.mubr.bf16.mxu0 %v2863_v13  ;;  %1736 = vmatprep.mubr.bf16.mxu1 %v2865_v14 }
  0x91   :  { %1512 = vmatmul.mubr.bf16.gmra.mxu0 %v2867_v15  ;;  %1737 = vmatmul.mubr.bf16.gmra.mxu1 %v2868_v16 }
  0x92   :  { %1519 = vmatprep.mubr.bf16.mxu0 %v2869_v17  ;;  %1744 = vmatprep.mubr.bf16.mxu1 %v2871_v18  ;;  %v2957_v17 = vld [vmem:[%s4404_s0 + $0x2b0] ss:$20 sps:$4 sm:$0xff]   ;;  %v2958_v18 = vld [vmem:[%s4404_s0 + $0x88] ss:$20 sps:$4 sm:$0xff]  }
  0x99   :  { %1520 = vmatmul.mubr.bf16.gmra.mxu0 %v2873_v19  ;;  %1745 = vmatmul.mubr.bf16.gmra.mxu1 %v2874_v20  ;;  %v2959_v19 = vld [vmem:[%s4404_s0 + $0x2dc] ss:$20 sps:$4 sm:$0xff]  }
  0x9a   :  { %1527 = vmatprep.mubr.bf16.mxu0 %v2875_v21  ;;  %1752 = vmatprep.mubr.bf16.mxu1 %v2877_v22  ;;  %v2961_v20 = vld [vmem:[%s4404_s0 + $0xb0] ss:$20 sps:$4 sm:$0xff]  }
  0xa1   :  { %1528 = vmatmul.mubr.bf16.gmra.mxu0 %v2879_v23  ;;  %1753 = vmatmul.mubr.bf16.gmra.mxu1 %v2880_v24 }
  0xa2   :  { %1535 = vmatprep.mubr.bf16.mxu0 %v2882_v25  ;;  %1760 = vmatprep.mubr.bf16.mxu1 %v2884_v26 }
  0xa9   :  { %1536 = vmatmul.mubr.bf16.gmra.mxu0 %v2886_v27  ;;  %1761 = vmatmul.mubr.bf16.gmra.mxu1 %v2887_v28 }
  0xaa   :  { %1543 = vmatprep.mubr.bf16.mxu0 %v2888_v29  ;;  %1768 = vmatprep.mubr.bf16.mxu1 %v2890_v30  ;;  %v2962_v29 = vld [vmem:[%s4404_s0 + $0x2d8] ss:$20 sps:$4 sm:$0xff]  }
  0xab   :  { %v2963_v30 = vld [vmem:[%s4404_s0 + $0xd8] ss:$20 sps:$4 sm:$0xff]  }
  0xb1   :  { %1544 = vmatmul.mubr.bf16.gmra.mxu0 %v2892_v31  ;;  %1769 = vmatmul.mubr.bf16.gmra.mxu1 %v2893_v32  ;;  %v2964_v31 = vld [vmem:[%s4404_s0 + $0x304] ss:$20 sps:$4 sm:$0xff]   ;;  %v2966_v32 = vld [vmem:[%s4404_s0 + $0x100] ss:$20 sps:$4 sm:$0xff]  }
  0xb2   :  { %1551 = vmatprep.mubr.bf16.mxu0 %v2894_v33  ;;  %1776 = vmatprep.mubr.bf16.mxu1 %v2896_v34 }
  0xb9   :  { %1552 = vmatmul.mubr.bf16.gmra.mxu0 %v2898_v35  ;;  %1777 = vmatmul.mubr.bf16.gmra.mxu1 %v2899_v36 }
  0xba   :  { %1559 = vmatprep.mubr.bf16.mxu0 %v2900_v37  ;;  %1784 = vmatprep.mubr.bf16.mxu1 %v2902_v38 }
  0xc1   :  { %1560 = vmatmul.mubr.bf16.gmra.mxu0 %v2904_v39  ;;  %1785 = vmatmul.mubr.bf16.gmra.mxu1 %v2905_v40 }
  0xc2   :  { %1567 = vmatprep.mubr.bf16.mxu0 %v2906_v41  ;;  %1792 = vmatprep.mubr.bf16.mxu1 %v2908_v42  ;;  %v2967_v41 = vld [vmem:[%s4404_s0 + $0x300] ss:$20 sps:$4 sm:$0xff]   ;;  %v2968_v42 = vld [vmem:[%s4404_s0 + $0x128] ss:$20 sps:$4 sm:$0xff]  }
  0xc9   :  { %1568 = vmatmul.mubr.bf16.gmra.mxu0 %v2910_v43  ;;  %1793 = vmatmul.mubr.bf16.gmra.mxu1 %v2911_v44  ;;  %v2971_v43 = vld [vmem:[%s4404_s0 + $0x32c] ss:$20 sps:$4 sm:$0xff]   ;;  %v2972_v44 = vld [vmem:[%s4404_s0 + $0x150] ss:$20 sps:$4 sm:$0xff]  }
  0xca   :  { %1575 = vmatprep.mubr.bf16.mxu0 %v2912_v45  ;;  %1800 = vmatprep.mubr.bf16.mxu1 %v2914_v46 }
  0xd1   :  { %1576 = vmatmul.mubr.bf16.gmra.mxu0 %v2916_v47  ;;  %1801 = vmatmul.mubr.bf16.gmra.mxu1 %v2917_v48 }
  0xd2   :  { %1583 = vmatprep.mubr.bf16.mxu0 %v2919_v49  ;;  %1808 = vmatprep.mubr.bf16.mxu1 %v2921_v50 }
  0xd9   :  { %1584 = vmatmul.mubr.bf16.gmra.mxu0 %v2923_v51  ;;  %1809 = vmatmul.mubr.bf16.gmra.mxu1 %v2924_v52 }
  0xda   :  { %1591 = vmatprep.mubr.bf16.mxu0 %v2925_v53  ;;  %1816 = vmatprep.mubr.bf16.mxu1 %v2927_v54  ;;  %v2969_v53 = vld [vmem:[%s4404_s0 + $0x328] ss:$20 sps:$4 sm:$0xff]   ;;  %v2973_v54 = vld [vmem:[%s4404_s0 + $0x178] ss:$20 sps:$4 sm:$0xff]  }
  0xe1   :  { %1592 = vmatmul.mubr.bf16.gmra.mxu0 %v2929_v55  ;;  %1817 = vmatmul.mubr.bf16.gmra.mxu1 %v2930_v56  ;;  %v2976_v55 = vld [vmem:[%s4404_s0 + $0x354] ss:$20 sps:$4 sm:$0xff]  }
  0xe2   :  { %1599 = vmatprep.mubr.bf16.mxu0 %v2931_v57  ;;  %1824 = vmatprep.mubr.bf16.mxu1 %v2933_v58  ;;  %v2977_v56 = vld [vmem:[%s4404_s0 + $0x1a0] ss:$20 sps:$4 sm:$0xff]  }
  0xe9   :  { %1600 = vmatmul.mubr.bf16.gmra.mxu0 %v2935_v59  ;;  %1825 = vmatmul.mubr.bf16.gmra.mxu1 %v2936_v60 }
  0xea   :  { %1607 = vmatprep.mubr.bf16.mxu0 %v2937_v61  ;;  %1832 = vmatprep.mubr.bf16.mxu1 %v2939_v62 }
  0xf1   :  { %1608 = vmatmul.mubr.bf16.gmra.mxu0 %v2941_v63  ;;  %1833 = vmatmul.mubr.bf16.gmra.mxu1 %v2942_v1 }
  0xf2   :  { %1615 = vmatprep.mubr.bf16.mxu0 %v2943_v2  ;;  %1840 = vmatprep.mubr.bf16.mxu1 %v2945_v3  ;;  %v2974_v2 = vld [vmem:[%s4404_s0 + $0x350] ss:$20 sps:$4 sm:$0xff]   ;;  %v2978_v3 = vld [vmem:[%s4404_s0 + $0x1c8] ss:$20 sps:$4 sm:$0xff]  }
  0xf9   :  { %1616 = vmatmul.mubr.bf16.gmra.mxu0 %v2947_v4  ;;  %1841 = vmatmul.mubr.bf16.gmra.mxu1 %v2948_v5  ;;  %v2981_v4 = vld [vmem:[%s4404_s0 + $0x37c] ss:$20 sps:$4 sm:$0xff]  }
  0xfa   :  { %1848 = vmatprep.mubr.bf16.mxu1 %v2949_v6  ;;  %2672 = vmatprep.mubr.msk.bf16.mxu0 %vm1302_vm0, %v2951_v7  ;;  %v2982_v5 = vld [vmem:[%s4404_s0 + $0x1f0] ss:$20 sps:$4 sm:$0xff]  }
 0x101   :  { %v3514_v0 = vpop.f32.mrf.mxu0  ;;  %v3516_v12 = vpop.f32.mrf.mxu1  ;;  %1849 = vmatmul.mubr.bf16.gmra.mxu1 %v2952_v8  ;;  %2673 = vmatmul.mubr.msk.bf16.vlgmr.msra.gmra.mxu0 %vm1302_vm0, %v2953_v9 }
 0x102   :  { %4407 = vst [vmem:[#allocation2_spill] sm:$0xff] %v3516_v12  ;;  %1856 = vmatprep.mubr.bf16.mxu1 %v2954_v10  ;;  %2676 = vmatprep.mubr.msk.bf16.mxu0 %vm1302_vm0, %v2956_v11 }
 0x103   :  { %v1435_v13 = vpop.f32.mrf.mxu0  ;;  %v1627_v14 = vpop.f32.mrf.mxu1 }
 0x105   :  { %v3520_v15 = vpop.f32.mrf.mxu0  ;;  %v3522_v16 = vpop.f32.mrf.mxu1 }
 0x106   :  { %4408 = vst [vmem:[#allocation3_spill] sm:$0xff] %v3522_v16 }
 0x107   :  { %v1438_v21 = vpop.f32.mrf.mxu0  ;;  %v1630_v22 = vpop.f32.mrf.mxu1 }
 0x109   :  { %v3536_v23 = vpop.f32.mrf.mxu0  ;;  %v3538_v24 = vpop.f32.mrf.mxu1  ;;  %1857 = vmatmul.mubr.bf16.gmra.mxu1 %v2957_v17  ;;  %2677 = vmatmul.mubr.msk.bf16.gmra.mxu0 %vm1302_vm0, %v2958_v18  ;;  %v2979_v17 = vld [vmem:[%s4404_s0 + $0x378] ss:$20 sps:$4 sm:$0xff]  }
 0x10a   :  { %1864 = vmatprep.mubr.bf16.mxu1 %v2959_v19  ;;  %2680 = vmatprep.mubr.msk.bf16.mxu0 %vm1302_vm0, %v2961_v20  ;;  %v2983_v18 = vld [vmem:[%s4404_s0 + $0x218] ss:$20 sps:$4 sm:$0xff]   ;;  %v2987_v20 = vld [vmem:[%s4404_s0 + $0x240] ss:$20 sps:$4 sm:$0xff]  }
 0x10b   :  { %v1443_v25 = vpop.f32.mrf.mxu0  ;;  %v1635_v26 = vpop.f32.mrf.mxu1  ;;  %v2986_v19 = vld [vmem:[%s4404_s0 + $0x3a4] ss:$20 sps:$4 sm:$0xff]  }
 0x10d   :  { %v3542_v27 = vpop.f32.mrf.mxu0  ;;  %v3544_v28 = vpop.f32.mrf.mxu1 }
 0x10e   :  { %4409 = vst [vmem:[#allocation4_spill] sm:$0xff] %v3544_v28 }
 0x10f   :  { %v1446_v33 = vpop.f32.mrf.mxu0  ;;  %v1638_v34 = vpop.f32.mrf.mxu1 }
 0x110   :  { %v2984_v33 = vld [vmem:[%s4404_s0 + $0x3a0] ss:$20 sps:$4 sm:$0xff]   ;;  %v2988_v34 = vld [vmem:[%s4404_s0 + $0x268] ss:$20 sps:$4 sm:$0xff]  }
 0x111   :  { %v3558_v35 = vpop.f32.mrf.mxu0  ;;  %v3560_v36 = vpop.f32.mrf.mxu1  ;;  %1865 = vmatmul.mubr.bf16.gmra.mxu1 %v2962_v29  ;;  %2681 = vmatmul.mubr.msk.bf16.gmra.mxu0 %vm1302_vm0, %v2963_v30 }
 0x112   :  { %4410 = vst [vmem:[#allocation5_spill] sm:$0xff] %v3560_v36  ;;  %1872 = vmatprep.mubr.bf16.mxu1 %v2964_v31  ;;  %2684 = vmatprep.mubr.msk.bf16.mxu0 %vm1302_vm0, %v2966_v32 }
 0x113   :  { %v1451_v37 = vpop.f32.mrf.mxu0  ;;  %v1643_v38 = vpop.f32.mrf.mxu1 }
 0x114   :  { %v2991_v37 = vld [vmem:[%s4404_s0 + $0x3cc] ss:$20 sps:$4 sm:$0xff]   ;;  %v2992_v38 = vld [vmem:[%s4404_s0 + $0x290] ss:$20 sps:$4 sm:$0xff]  }
 0x115   :  { %v3564_v39 = vpop.f32.mrf.mxu0  ;;  %v3566_v40 = vpop.f32.mrf.mxu1 }
 0x116   :  { %4411 = vst [vmem:[#allocation6_spill] sm:$0xff] %v3566_v40 }
 0x117   :  { %v1454_v45 = vpop.f32.mrf.mxu0  ;;  %v1646_v46 = vpop.f32.mrf.mxu1 }
 0x119   :  { %v3580_v47 = vpop.f32.mrf.mxu0  ;;  %v3582_v48 = vpop.f32.mrf.mxu1  ;;  %1873 = vmatmul.mubr.bf16.gmra.mxu1 %v2967_v41  ;;  %2685 = vmatmul.mubr.msk.bf16.gmra.mxu0 %vm1302_vm0, %v2968_v42 }
 0x11a   :  { %4412 = vst [vmem:[#allocation7_spill] sm:$0xff] %v3582_v48  ;;  %1880 = vmatprep.mubr.bf16.mxu1 %v2971_v43  ;;  %2688 = vmatprep.mubr.msk.bf16.mxu0 %vm1302_vm0, %v2972_v44 }
 0x11b   :  { %v1459_v49 = vpop.f32.mrf.mxu0  ;;  %v1651_v50 = vpop.f32.mrf.mxu1 }
 0x11c   :  { %v3677_v49 = vld [vmem:[%s4405_s2] ss:$0 sm:$0xff] }
 0x11d   :  { %v3586_v51 = vpop.f32.mrf.mxu0  ;;  %v3588_v52 = vpop.f32.mrf.mxu1 }
 0x11e   :  { %4413 = vst [vmem:[#allocation8_spill] sm:$0xff] %v3588_v52 }
 0x11f   :  { %v1462_v57 = vpop.f32.mrf.mxu0  ;;  %v1654_v58 = vpop.f32.mrf.mxu1 }
 0x120   :  { %v2997_v57 = vld [vmem:[%s4404_s0 + $0x2e0] ss:$20 sps:$4 sm:$0xff]  }
 0x121   :  { %v3602_v59 = vpop.f32.mrf.mxu0  ;;  %v3604_v60 = vpop.f32.mrf.mxu1  ;;  %1881 = vmatmul.mubr.bf16.gmra.mxu1 %v2969_v53  ;;  %2689 = vmatmul.mubr.msk.bf16.gmra.mxu0 %vm1302_vm0, %v2973_v54  ;;  %v2989_v54 = vld [vmem:[%s4404_s0 + $0x3c8] ss:$20 sps:$4 sm:$0xff]  }
 0x122   :  { %4414 = vst [vmem:[#allocation9_spill] sm:$0xff] %v3604_v60  ;;  %1888 = vmatprep.mubr.bf16.mxu1 %v2976_v55  ;;  %2692 = vmatprep.mubr.msk.bf16.mxu0 %vm1302_vm0, %v2977_v56  ;;  %v2993_v55 = vld [vmem:[%s4404_s0 + $0x2b8] ss:$20 sps:$4 sm:$0xff]   ;;  %v2996_v56 = vld [vmem:[%s4404_s0 + $0x3f4] ss:$20 sps:$4 sm:$0xff]  }
 0x123   :  { %v1467_v61 = vpop.f32.mrf.mxu0  ;;  %v1659_v62 = vpop.f32.mrf.mxu1 }
 0x124   :  { %v1434_v62 = vadd.f32 %v3677_v49, %v3514_v0  ;;  %v2994_v0 = vld [vmem:[%s4404_s0 + $0x3f0] ss:$20 sps:$4 sm:$0xff]  }
 0x125   :  { %v3608_v63 = vpop.f32.mrf.mxu0  ;;  %v3610_v1 = vpop.f32.mrf.mxu1 }
 0x126   :  { %4415 = vst [vmem:[#allocation10_spill] sm:$0xff] %v3610_v1 }
 0x127   :  { %v1470_v6 = vpop.f32.mrf.mxu0  ;;  %v1662_v7 = vpop.f32.mrf.mxu1 }
 0x128   :  { %v1437_v7 = vadd.f32 %v3677_v49, %v3520_v15  ;;  %v3002_v15 = vld [vmem:[%s4404_s0 + $0x330] ss:$20 sps:$4 sm:$0xff]  }
 0x129   :  { %v3624_v8 = vpop.f32.mrf.mxu0  ;;  %v3626_v9 = vpop.f32.mrf.mxu1  ;;  %1889 = vmatmul.mubr.bf16.gmra.mxu1 %v2974_v2  ;;  %2693 = vmatmul.mubr.msk.bf16.gmra.mxu0 %vm1302_vm0, %v2978_v3 }
 0x12a   :  { %4416 = vst [vmem:[#allocation11_spill] sm:$0xff] %v3626_v9  ;;  %1896 = vmatprep.mubr.bf16.mxu1 %v2981_v4  ;;  %2696 = vmatprep.mubr.msk.bf16.mxu0 %vm1302_vm0, %v2982_v5 }
 0x12b   :  { %v1475_v10 = vpop.f32.mrf.mxu0  ;;  %v1667_v11 = vpop.f32.mrf.mxu1 }
 0x12d   :  { %v3630_v13 = vpop.f32.mrf.mxu0  ;;  %v3632_v14 = vpop.f32.mrf.mxu1 }
 0x12e   :  { %4417 = vst [vmem:[#allocation12_spill] sm:$0xff] %v3632_v14 }
 0x12f   :  { %v1478_v21 = vpop.f32.mrf.mxu0  ;;  %v1670_v22 = vpop.f32.mrf.mxu1 }
 0x130   :  { %v1442_v22 = vadd.f32 %v3677_v49, %v3536_v23  ;;  %v2999_v23 = vld [vmem:[%s4404_s0 + $0x418] ss:$20 sps:$4 sm:$0xff]  }
 0x131   :  { %v3646_v25 = vpop.f32.mrf.mxu0  ;;  %v3648_v26 = vpop.f32.mrf.mxu1  ;;  %1897 = vmatmul.mubr.bf16.gmra.mxu1 %v2979_v17  ;;  %2697 = vmatmul.mubr.msk.bf16.gmra.mxu0 %vm1302_vm0, %v2983_v18  ;;  %v2998_v17 = vld [vmem:[%s4404_s0 + $0x308] ss:$20 sps:$4 sm:$0xff]  }
 0x132   :  { %4418 = vst [vmem:[#allocation13_spill] sm:$0xff] %v3648_v26  ;;  %1904 = vmatprep.mubr.bf16.mxu1 %v2986_v19  ;;  %2700 = vmatprep.mubr.msk.bf16.mxu0 %vm1302_vm0, %v2987_v20  ;;  %v3001_v19 = vld [vmem:[%s4404_s0 + $0x41c] ss:$20 sps:$4 sm:$0xff]  }
 0x133   :  { %v1483_v29 = vpop.f32.mrf.mxu0  ;;  %v1675_v30 = vpop.f32.mrf.mxu1 }
 0x135   :  { %v3652_v31 = vpop.f32.mrf.mxu0  ;;  %v3654_v32 = vpop.f32.mrf.mxu1 }
 0x136   :  { %4419 = vst [vmem:[#allocation14_spill] sm:$0xff] %v3654_v32 }
 0x137   :  { %v1486_v41 = vpop.f32.mrf.mxu0  ;;  %v1678_v42 = vpop.f32.mrf.mxu1 }
 0x139   :  { %v3668_v43 = vpop.f32.mrf.mxu0  ;;  %v3670_v44 = vpop.f32.mrf.mxu1  ;;  %1905 = vmatmul.mubr.bf16.gmra.mxu1 %v2984_v33  ;;  %2701 = vmatmul.mubr.msk.bf16.gmra.mxu0 %vm1302_vm0, %v2988_v34 }
 0x13a   :  { %4420 = vst [vmem:[#allocation15_spill] sm:$0xff] %v3670_v44  ;;  %1912 = vmatprep.mubr.bf16.mxu1 %v2991_v37  ;;  %2704 = vmatprep.mubr.msk.bf16.mxu0 %vm1302_vm0, %v2992_v38  ;;  %v1445_v38 = vadd.f32 %v3677_v49, %v3542_v27  ;;  %v3007_v27 = vld [vmem:[%s4404_s0 + $0x380] ss:$20 sps:$4 sm:$0xff]  }
 0x13b   :  { %v1491_v45 = vpop.f32.mrf.mxu0  ;;  %v1683_v46 = vpop.f32.mrf.mxu1 }
 0x13c   :  { %v3003_v45 = vld [vmem:[%s4404_s0 + $0x358] ss:$20 sps:$4 sm:$0xff]  }
 0x13d   :  { %v3679_v50 = vpop.f32.mrf.mxu0  ;;  %v3681_v53 = vpop.f32.mrf.mxu1 }
 0x13e   :  { %4421 = vst [vmem:[#allocation16_spill] sm:$0xff] %v3681_v53 }
 0x13f   :  { %v1494_v58 = vpop.f32.mrf.mxu0  ;;  %v1686_v61 = vpop.f32.mrf.mxu1 }
 0x141   :  { %v3697_v2 = vpop.f32.mrf.mxu0  ;;  %v1722_v3 = vpop.f32.mrf.mxu1  ;;  %1913 = vmatmul.mubr.bf16.gmra.mxu1 %v2989_v54  ;;  %2705 = vmatmul.mubr.msk.bf16.gmra.mxu0 %vm1302_vm0, %v2993_v55  ;;  %v3006_v54 = vld [vmem:[%s4404_s0 + $0x444] ss:$20 sps:$4 sm:$0xff]  }
 0x142   :  { %v3700_v4 = vadd.f32 %v1722_v3, %v1434_v62  ;;  %1920 = vmatprep.mubr.bf16.mxu1 %v2996_v56  ;;  %2708 = vmatprep.mubr.msk.bf16.mxu0 %vm1302_vm0, %v2997_v57  ;;  %v1450_v57 = vadd.f32 %v3677_v49, %v3558_v35  ;;  %v3004_v35 = vld [vmem:[%s4404_s0 + $0x440] ss:$20 sps:$4 sm:$0xff]  }
 0x143   :  { %v1499_v5 = vpop.f32.mrf.mxu0  ;;  %v1724_v6 = vpop.f32.mrf.mxu1 }
 0x144   :  { %v1453_v6 = vadd.f32 %v3677_v49, %v3564_v39  ;;  %v3012_v39 = vld [vmem:[%s4404_s0 + $0x3d0] ss:$20 sps:$4 sm:$0xff]  }
 0x145   :  { %v3705_v10 = vpop.f32.mrf.mxu0  ;;  %v1725_v11 = vpop.f32.mrf.mxu1 }
 0x146   :  { %v3713_v18 = vadd.f32 %v1725_v11, %v1437_v7 }
 0x147   :  { %v1502_v20 = vpop.f32.mrf.mxu0  ;;  %v1727_v21 = vpop.f32.mrf.mxu1 }
 0x148   :  { %v1458_v21 = vadd.f32 %v3677_v49, %v3580_v47  ;;  %v3009_v47 = vld [vmem:[%s4404_s0 + $0x468] ss:$20 sps:$4 sm:$0xff]  }
 0x149   :  { %v3723_v29 = vpop.f32.mrf.mxu0  ;;  %v1730_v30 = vpop.f32.mrf.mxu1  ;;  %1921 = vmatmul.mubr.bf16.gmra.mxu1 %v2994_v0  ;;  %2709 = vmatmul.mubr.msk.bf16.gmra.mxu0 %vm1302_vm0, %v2998_v17  ;;  %v3008_v0 = vld [vmem:[%s4404_s0 + $0x3a8] ss:$20 sps:$4 sm:$0xff]  }
 0x14a   :  { %v3726_v33 = vadd.f32 %v1730_v30, %v1442_v22  ;;  %1928 = vmatprep.mubr.bf16.mxu1 %v3001_v19  ;;  %2712 = vmatprep.mubr.msk.bf16.mxu0 %vm1302_vm0, %v3002_v15  ;;  %v3011_v19 = vld [vmem:[%s4404_s0 + $0x46c] ss:$20 sps:$4 sm:$0xff]  }
 0x14b   :  { %v1507_v34 = vpop.f32.mrf.mxu0  ;;  %v1732_v37 = vpop.f32.mrf.mxu1 }
 0x14d   :  { %v3731_v41 = vpop.f32.mrf.mxu0  ;;  %v1733_v42 = vpop.f32.mrf.mxu1 }
 0x14e   :  { %v3739_v46 = vadd.f32 %v1733_v42, %v1445_v38  ;;  %v1461_v42 = vadd.f32 %v3677_v49, %v3586_v51  ;;  %v3017_v51 = vld [vmem:[%s4404_s0 + $0x420] ss:$20 sps:$4 sm:$0xff]  }
 0x14f   :  { %v1510_v55 = vpop.f32.mrf.mxu0  ;;  %v1735_v56 = vpop.f32.mrf.mxu1 }
 0x150   :  { %v3016_v55 = vld [vmem:[%s4404_s0 + $0x494] ss:$20 sps:$4 sm:$0xff]  }
 0x151   :  { %v3749_v58 = vpop.f32.mrf.mxu0  ;;  %v1738_v61 = vpop.f32.mrf.mxu1  ;;  %1929 = vmatmul.mubr.bf16.gmra.mxu1 %v2999_v23  ;;  %2713 = vmatmul.mubr.msk.bf16.gmra.mxu0 %vm1302_vm0, %v3003_v45 }
 0x152   :  { %v3752_v62 = vadd.f32 %v1738_v61, %v1450_v57  ;;  %1936 = vmatprep.mubr.bf16.mxu1 %v3006_v54  ;;  %2716 = vmatprep.mubr.msk.bf16.mxu0 %vm1302_vm0, %v3007_v27  ;;  %v3013_v54 = vld [vmem:[%s4404_s0 + $0x3f8] ss:$20 sps:$4 sm:$0xff]   ;;  %v1466_v61 = vadd.f32 %v3677_v49, %v3602_v59  ;;  %v3014_v59 = vld [vmem:[%s4404_s0 + $0x490] ss:$20 sps:$4 sm:$0xff]  }
 0x153   :  { %v1515_v3 = vpop.f32.mrf.mxu0  ;;  %v1740_v5 = vpop.f32.mrf.mxu1 }
 0x155   :  { %v3757_v7 = vpop.f32.mrf.mxu0  ;;  %v1741_v11 = vpop.f32.mrf.mxu1 }
 0x156   :  { %v3765_v17 = vadd.f32 %v1741_v11, %v1453_v6 }
 0x157   :  { %v1518_v15 = vpop.f32.mrf.mxu0  ;;  %v1743_v20 = vpop.f32.mrf.mxu1 }
 0x158   :  { %v3018_v15 = vld [vmem:[%s4404_s0 + $0x448] ss:$20 sps:$4 sm:$0xff]  }
 0x159   :  { %v3775_v22 = vpop.f32.mrf.mxu0  ;;  %v1746_v30 = vpop.f32.mrf.mxu1  ;;  %1937 = vmatmul.mubr.bf16.gmra.mxu1 %v3004_v35  ;;  %2717 = vmatmul.mubr.msk.bf16.gmra.mxu0 %vm1302_vm0, %v3008_v0  ;;  %v1469_v0 = vadd.f32 %v3677_v49, %v3608_v63  ;;  %v3022_v63 = vld [vmem:[%s4404_s0 + $0x470] ss:$20 sps:$4 sm:$0xff]  }
 0x15a   :  { %v3778_v34 = vadd.f32 %v1746_v30, %v1458_v21  ;;  %1944 = vmatprep.mubr.bf16.mxu1 %v3011_v19  ;;  %2720 = vmatprep.mubr.msk.bf16.mxu0 %vm1302_vm0, %v3012_v39  ;;  %v3021_v21 = vld [vmem:[%s4404_s0 + $0x4bc] ss:$20 sps:$4 sm:$0xff]  }
 0x15b   :  { %v1523_v37 = vpop.f32.mrf.mxu0  ;;  %v1748_v38 = vpop.f32.mrf.mxu1 }
 0x15c   :  { %v1474_v38 = vadd.f32 %v3677_v49, %v3624_v8  ;;  %v3019_v8 = vld [vmem:[%s4404_s0 + $0x4b8] ss:$20 sps:$4 sm:$0xff]  }
 0x15d   :  { %v3783_v23 = vpop.f32.mrf.mxu0  ;;  %v1749_v45 = vpop.f32.mrf.mxu1 }
 0x15e   :  { %v3791_v27 = vadd.f32 %v1749_v45, %v1461_v42 }
 0x15f   :  { %v1526_v56 = vpop.f32.mrf.mxu0  ;;  %v1751_v57 = vpop.f32.mrf.mxu1 }
 0x161   :  { %v3801_v3 = vpop.f32.mrf.mxu0  ;;  %v1754_v5 = vpop.f32.mrf.mxu1  ;;  %1945 = vmatmul.mubr.bf16.gmra.mxu1 %v3009_v47  ;;  %2721 = vmatmul.mubr.msk.bf16.gmra.mxu0 %vm1302_vm0, %v3013_v54 }
 0x162   :  { %v3804_v6 = vadd.f32 %v1754_v5, %v1466_v61  ;;  %1952 = vmatprep.mubr.bf16.mxu1 %v3016_v55  ;;  %2724 = vmatprep.mubr.msk.bf16.mxu0 %vm1302_vm0, %v3017_v51  ;;  %v1477_v51 = vadd.f32 %v3677_v49, %v3630_v13  ;;  %v3023_v61 = vld [vmem:[%s4404_s0 + $0x498] ss:$20 sps:$4 sm:$0xff]   ;;  %v3027_v13 = vld [vmem:[%s4404_s0 + $0x4c0] ss:$20 sps:$4 sm:$0xff]  }
 0x163   :  { %v1531_v11 = vpop.f32.mrf.mxu0  ;;  %v1756_v35 = vpop.f32.mrf.mxu1 }
 0x164   :  { %v3026_v11 = vld [vmem:[%s4404_s0 + $0x4e4] ss:$20 sps:$4 sm:$0xff]  }
 0x165   :  { %v3809_v19 = vpop.f32.mrf.mxu0  ;;  %v1757_v39 = vpop.f32.mrf.mxu1 }
 0x166   :  { %v3817_v20 = vadd.f32 %v1757_v39, %v1469_v0  ;;  %v1482_v39 = vadd.f32 %v3677_v49, %v3646_v25  ;;  %v3024_v25 = vld [vmem:[%s4404_s0 + $0x4e0] ss:$20 sps:$4 sm:$0xff]  }
 0x167   :  { %v1534_v30 = vpop.f32.mrf.mxu0  ;;  %v1759_v37 = vpop.f32.mrf.mxu1 }
 0x168   :  { %v1485_v37 = vadd.f32 %v3677_v49, %v3652_v31 }
 0x169   :  { %v3827_v42 = vpop.f32.mrf.mxu0  ;;  %v1762_v45 = vpop.f32.mrf.mxu1  ;;  %1953 = vmatmul.mubr.bf16.gmra.mxu1 %v3014_v59  ;;  %2725 = vmatmul.mubr.msk.bf16.gmra.mxu0 %vm1302_vm0, %v3018_v15 }
 0x16a   :  { %v3830_v47 = vadd.f32 %v1762_v45, %v1474_v38  ;;  %1960 = vmatprep.mubr.bf16.mxu1 %v3021_v21  ;;  %2728 = vmatprep.mubr.msk.bf16.mxu0 %vm1302_vm0, %v3022_v63 }
 0x16b   :  { %v1539_v54 = vpop.f32.mrf.mxu0  ;;  %v1764_v55 = vpop.f32.mrf.mxu1 }
 0x16c   :  { %v3028_v54 = vld [vmem:[%s4404_s0 + $0x4e8] ss:$20 sps:$4 sm:$0xff]  }
 0x16d   :  { %v3835_v56 = vpop.f32.mrf.mxu0  ;;  %v1765_v57 = vpop.f32.mrf.mxu1 }
 0x16e   :  { %v3843_v5 = vadd.f32 %v1765_v57, %v1477_v51 }
 0x16f   :  { %v1542_v35 = vpop.f32.mrf.mxu0  ;;  %v1767_v0 = vpop.f32.mrf.mxu1 }
 0x170   :  { %v1493_v0 = vadd.f32 %v3677_v49, %v3679_v50  ;;  %v1501_v50 = vadd.f32 %v3677_v49, %v3705_v10  ;;  %v1509_v10 = vadd.f32 %v3677_v49, %v3731_v41  ;;  %v1517_v41 = vadd.f32 %v3677_v49, %v3757_v7 }
 0x171   :  { %v3853_v59 = vpop.f32.mrf.mxu0  ;;  %v1770_v15 = vpop.f32.mrf.mxu1  ;;  %1961 = vmatmul.mubr.bf16.gmra.mxu1 %v3019_v8  ;;  %2729 = vmatmul.mubr.msk.bf16.gmra.mxu0 %vm1302_vm0, %v3023_v61  ;;  %v1490_v8 = vadd.f32 %v3677_v49, %v3668_v43  ;;  %v1525_v7 = vadd.f32 %v3677_v49, %v3783_v23  ;;  %v1533_v23 = vadd.f32 %v3677_v49, %v3809_v19 }
 0x172   :  { %v3856_v21 = vadd.f32 %v1770_v15, %v1482_v39  ;;  %1968 = vmatprep.mubr.bf16.mxu1 %v3026_v11  ;;  %2732 = vmatprep.mubr.msk.bf16.mxu0 %vm1302_vm0, %v3027_v13  ;;  %v1541_v19 = vadd.f32 %v3677_v49, %v3835_v56 }
 0x173   :  { %v1547_v63 = vpop.f32.mrf.mxu0  ;;  %v1772_v30 = vpop.f32.mrf.mxu1 }
 0x175   :  { %v3861_v38 = vpop.f32.mrf.mxu0  ;;  %v1773_v45 = vpop.f32.mrf.mxu1 }
 0x176   :  { %v3869_v55 = vadd.f32 %v1773_v45, %v1485_v37  ;;  %v1498_v37 = vadd.f32 %v3677_v49, %v3697_v2  ;;  %v1506_v2 = vadd.f32 %v3677_v49, %v3723_v29  ;;  %v1514_v29 = vadd.f32 %v3677_v49, %v3749_v58 }
 0x177   :  { %v1550_v51 = vpop.f32.mrf.mxu0  ;;  %v1775_v57 = vpop.f32.mrf.mxu1  ;;  %v1522_v58 = vadd.f32 %v3677_v49, %v3775_v22  ;;  %v1530_v22 = vadd.f32 %v3677_v49, %v3801_v3  ;;  %v1538_v3 = vadd.f32 %v3677_v49, %v3827_v42  ;;  %v1546_v42 = vadd.f32 %v3677_v49, %v3853_v59 }
 0x178   :  { %v1549_v56 = vadd.f32 %v3677_v49, %v3861_v38 }
 0x179   :  { %v3873_v61 = vpop.f32.mrf.mxu0  ;;  %v1778_v31 = vpop.f32.mrf.mxu1  ;;  %1969 = vmatmul.mubr.bf16.gmra.mxu1 %v3024_v25  ;;  %2733 = vmatmul.mubr.msk.bf16.gmra.mxu0 %vm1302_vm0, %v3028_v54 }
 0x17a   :  { %v3876_v11 = vadd.f32 %v1778_v31, %v1490_v8 }
 0x17b   :  { %v1555_v13 = vpop.f32.mrf.mxu0  ;;  %v1780_v35 = vpop.f32.mrf.mxu1 }
 0x17d   :  { %v3880_v39 = vpop.f32.mrf.mxu0  ;;  %v1781_v15 = vpop.f32.mrf.mxu1 }
 0x17e   :  { %v3882_v63 = vadd.f32 %v1781_v15, %v1493_v0 }
 0x17f   :  { %v1558_v30 = vpop.f32.mrf.mxu0  ;;  %v1783_v43 = vpop.f32.mrf.mxu1 }
 0x181   :  { %v3886_v45 = vpop.f32.mrf.mxu0  ;;  %v1786_v25 = vpop.f32.mrf.mxu1 }
 0x182   :  { %v3888_v54 = vadd.f32 %v1786_v25, %v1498_v37  ;;  %v1562_v38 = vadd.f32 %v3677_v49, %v3886_v45 }
 0x183   :  { %v1563_v51 = vpop.f32.mrf.mxu0  ;;  %v1788_v57 = vpop.f32.mrf.mxu1 }
 0x185   :  { %v3892_v8 = vpop.f32.mrf.mxu0  ;;  %v1789_v31 = vpop.f32.mrf.mxu1 }
 0x186   :  { %v3894_v13 = vadd.f32 %v1789_v31, %v1501_v50 }
 0x187   :  { %v1566_v35 = vpop.f32.mrf.mxu0  ;;  %v1791_v0 = vpop.f32.mrf.mxu1 }
 0x189   :  { %v3898_v15 = vpop.f32.mrf.mxu0  ;;  %v1794_v30 = vpop.f32.mrf.mxu1 }
 0x18a   :  { %v3900_v43 = vadd.f32 %v1794_v30, %v1506_v2 }
 0x18b   :  { %v1571_v37 = vpop.f32.mrf.mxu0  ;;  %v1796_v25 = vpop.f32.mrf.mxu1 }
 0x18d   :  { %v3904_v51 = vpop.f32.mrf.mxu0  ;;  %v1797_v57 = vpop.f32.mrf.mxu1 }
 0x18e   :  { %v3906_v50 = vadd.f32 %v1797_v57, %v1509_v10 }
 0x18f   :  { %v1574_v31 = vpop.f32.mrf.mxu0  ;;  %v1799_v35 = vpop.f32.mrf.mxu1 }
 0x191   :  { %v3910_v0 = vpop.f32.mrf.mxu0  ;;  %v1802_v53 = vpop.f32.mrf.mxu1 }
 0x192   :  { %v3912_v2 = vadd.f32 %v1802_v53, %v1514_v29 }
 0x193   :  { %v1579_v30 = vpop.f32.mrf.mxu0  ;;  %v1804_v37 = vpop.f32.mrf.mxu1 }
 0x195   :  { %v3916_v25 = vpop.f32.mrf.mxu0  ;;  %v1805_v32 = vpop.f32.mrf.mxu1 }
 0x196   :  { %v3918_v10 = vadd.f32 %v1805_v32, %v1517_v41 }
 0x197   :  { %v1582_v57 = vpop.f32.mrf.mxu0  ;;  %v1807_v31 = vpop.f32.mrf.mxu1 }
 0x199   :  { %v3922_v35 = vpop.f32.mrf.mxu0  ;;  %v1810_v44 = vpop.f32.mrf.mxu1 }
 0x19a   :  { %v3924_v53 = vadd.f32 %v1810_v44, %v1522_v58 }
 0x19b   :  { %v1587_v29 = vpop.f32.mrf.mxu0  ;;  %v1812_v30 = vpop.f32.mrf.mxu1 }
 0x19d   :  { %v3928_v37 = vpop.f32.mrf.mxu0  ;;  %v1813_v26 = vpop.f32.mrf.mxu1 }
 0x19e   :  { %v3930_v32 = vadd.f32 %v1813_v26, %v1525_v7 }
 0x19f   :  { %v1590_v41 = vpop.f32.mrf.mxu0  ;;  %v1815_v57 = vpop.f32.mrf.mxu1 }
 0x1a1   :  { %v3934_v31 = vpop.f32.mrf.mxu0  ;;  %v1818_v1 = vpop.f32.mrf.mxu1 }
 0x1a2   :  { %v3936_v44 = vadd.f32 %v1818_v1, %v1530_v22 }
 0x1a3   :  { %v1595_v58 = vpop.f32.mrf.mxu0  ;;  %v1820_v29 = vpop.f32.mrf.mxu1 }
 0x1a5   :  { %v3940_v30 = vpop.f32.mrf.mxu0  ;;  %v1821_v14 = vpop.f32.mrf.mxu1 }
 0x1a6   :  { %v3942_v26 = vadd.f32 %v1821_v14, %v1533_v23 }
 0x1a7   :  { %v1598_v7 = vpop.f32.mrf.mxu0  ;;  %v1823_v41 = vpop.f32.mrf.mxu1 }
 0x1a9   :  { %v3946_v57 = vpop.f32.mrf.mxu0  ;;  %v1826_v60 = vpop.f32.mrf.mxu1 }
 0x1aa   :  { %v3948_v1 = vadd.f32 %v1826_v60, %v1538_v3 }
 0x1ab   :  { %v1603_v22 = vpop.f32.mrf.mxu0  ;;  %v1828_v58 = vpop.f32.mrf.mxu1 }
 0x1ad   :  { %v3952_v29 = vpop.f32.mrf.mxu0  ;;  %v1829_v9 = vpop.f32.mrf.mxu1 }
 0x1ae   :  { %v3954_v14 = vadd.f32 %v1829_v9, %v1541_v19 }
 0x1af   :  { %v1606_v23 = vpop.f32.mrf.mxu0  ;;  %v1831_v7 = vpop.f32.mrf.mxu1 }
 0x1b1   :  { %v3958_v41 = vpop.f32.mrf.mxu0  ;;  %v1834_v40 = vpop.f32.mrf.mxu1 }
 0x1b2   :  { %v3960_v60 = vadd.f32 %v1834_v40, %v1546_v42 }
 0x1b3   :  { %v1611_v3 = vpop.f32.mrf.mxu0  ;;  %v1836_v22 = vpop.f32.mrf.mxu1 }
 0x1b5   :  { %v3964_v58 = vpop.f32.mrf.mxu0  ;;  %v1837_v52 = vpop.f32.mrf.mxu1 }
 0x1b6   :  { %v3966_v9 = vadd.f32 %v1837_v52, %v1549_v56 }
 0x1b7   :  { %v1614_v19 = vpop.f32.mrf.mxu0  ;;  %v1839_v23 = vpop.f32.mrf.mxu1 }
 0x1b9   :  { %v3968_v7 = vpop.f32.mrf.mxu0  ;;  %v3970_v59 = vpop.f32.mrf.mxu1 }
 0x1bb   :  { %v1619_v36 = vpop.f32.mrf.mxu0  ;;  %v1844_v48 = vpop.f32.mrf.mxu1 }
 0x1bc   :  { %v1565_v36 = vadd.f32 %v3677_v49, %v3892_v8 }
 0x1bd   :  { %v3972_v40 = vpop.f32.mrf.mxu0  ;;  %v3974_v42 = vpop.f32.mrf.mxu1 }
 0x1bf   :  { %v1622_v3 = vpop.f32.mrf.mxu0  ;;  %v1847_v22 = vpop.f32.mrf.mxu1 }
 0x1c1   :  { %v1850_v16 = vpop.f32.mrf.mxu1  ;;  %v2674_v52 = vpop.f32.mrf.mxu0 }
 0x1c2   :  { %v3978_v56 = vadd.f32 %v1850_v16, %v1562_v38  ;;  %v2020_v19 = vadd.f32 %v2674_v52, %v3726_v33 }
 0x1c3   :  { %v1852_v23 = vpop.f32.mrf.mxu1  ;;  %v2011_v28 = vpop.f32.mrf.mxu0 }
 0x1c4   :  { %v2268_v48 = vmax.f32 %v2020_v19, 0.0  ;;  %v2012_v12 = vadd.f32 %v2011_v28, %v3700_v4 }
 0x1c5   :  { %v1853_v3 = vpop.f32.mrf.mxu1  ;;  %v2675_v22 = vpop.f32.mrf.mxu0 }
 0x1c6   :  { %2333 = vst.msk [vmem:[%s4406_s3 + $0x10] sm:$0xff] %vm2330_vm1, %v2268_v48  ;;  %v2266_v16 = vmax.f32 %v2012_v12, 0.0  ;;  %v3988_v45 = vadd.f32 %v1853_v3, %v1565_v36  ;;  %v2023_v33 = vadd.f32 %v2675_v22, %v3739_v46 }
 0x1c7   :  { %v1855_v38 = vpop.f32.mrf.mxu1  ;;  %v2014_v52 = vpop.f32.mrf.mxu0 }
 0x1c8   :  { %2331 = vst.msk [vmem:[%s4406_s3] sm:$0xff] %vm2330_vm1, %v2266_v16  ;;  %v2269_v28 = vmax.f32 %v2023_v33, 0.0  ;;  %v2015_v4 = vadd.f32 %v2014_v52, %v3713_v18 }
 0x1c9   :  { %v3996_v8 = vpop.f32.mrf.mxu1  ;;  %v2678_v19 = vpop.f32.mrf.mxu0 }
 0x1ca   :  { %2334 = vst.msk [vmem:[%s4406_s3 + $0x18] sm:$0xff] %vm2330_vm1, %v2269_v28  ;;  %v2267_v12 = vmax.f32 %v2015_v4, 0.0  ;;  %v2036_v46 = vadd.f32 %v2678_v19, %v3778_v34 }
 0x1cb   :  { %v1860_v23 = vpop.f32.mrf.mxu1  ;;  %v2027_v36 = vpop.f32.mrf.mxu0 }
 0x1cc   :  { %2332 = vst.msk [vmem:[%s4406_s3 + $0x8] sm:$0xff] %vm2330_vm1, %v2267_v12  ;;  %v2272_v48 = vmax.f32 %v2036_v46, 0.0  ;;  %v2028_v18 = vadd.f32 %v2027_v36, %v3752_v62 }
 0x1cd   :  { %v4008_v3 = vpop.f32.mrf.mxu1  ;;  %v2679_v22 = vpop.f32.mrf.mxu0 }
 0x1ce   :  { %2337 = vst.msk [vmem:[%s4406_s3 + $0x30] sm:$0xff] %vm2330_vm1, %v2272_v48  ;;  %v2270_v16 = vmax.f32 %v2028_v18, 0.0  ;;  %v2039_v34 = vadd.f32 %v2679_v22, %v3791_v27 }
 0x1cf   :  { %v1863_v33 = vpop.f32.mrf.mxu1  ;;  %v2030_v38 = vpop.f32.mrf.mxu0 }
 0x1d0   :  { %2335 = vst.msk [vmem:[%s4406_s3 + $0x20] sm:$0xff] %vm2330_vm1, %v2270_v16  ;;  %v2273_v52 = vmax.f32 %v2039_v34, 0.0  ;;  %v2031_v62 = vadd.f32 %v2030_v38, %v3765_v17 }
 0x1d1   :  { %v4020_v28 = vpop.f32.mrf.mxu1  ;;  %v2682_v4 = vpop.f32.mrf.mxu0 }
 0x1d2   :  { %2338 = vst.msk [vmem:[%s4406_s3 + $0x38] sm:$0xff] %vm2330_vm1, %v2273_v52  ;;  %v2271_v19 = vmax.f32 %v2031_v62, 0.0  ;;  %v2052_v27 = vadd.f32 %v2682_v4, %v3830_v47 }
 0x1d3   :  { %v1868_v12 = vpop.f32.mrf.mxu1  ;;  %v2043_v46 = vpop.f32.mrf.mxu0 }
 0x1d4   :  { %2336 = vst.msk [vmem:[%s4406_s3 + $0x28] sm:$0xff] %vm2330_vm1, %v2271_v19  ;;  %v2276_v23 = vmax.f32 %v2052_v27, 0.0  ;;  %v2044_v17 = vadd.f32 %v2043_v46, %v3804_v6 }
 0x1d5   :  { %v4032_v36 = vpop.f32.mrf.mxu1  ;;  %v2683_v48 = vpop.f32.mrf.mxu0 }
 0x1d6   :  { %2341 = vst.msk [vmem:[%s4406_s3 + $0x50] sm:$0xff] %vm2330_vm1, %v2276_v23  ;;  %v2274_v18 = vmax.f32 %v2044_v17, 0.0  ;;  %v2055_v47 = vadd.f32 %v2683_v48, %v3843_v5 }
 0x1d7   :  { %v1871_v22 = vpop.f32.mrf.mxu1  ;;  %v2046_v16 = vpop.f32.mrf.mxu0 }
 0x1d8   :  { %2339 = vst.msk [vmem:[%s4406_s3 + $0x40] sm:$0xff] %vm2330_vm1, %v2274_v18  ;;  %v2277_v34 = vmax.f32 %v2055_v47, 0.0  ;;  %v2047_v6 = vadd.f32 %v2046_v16, %v3817_v20 }
 0x1d9   :  { %v4044_v33 = vpop.f32.mrf.mxu1  ;;  %v2686_v38 = vpop.f32.mrf.mxu0 }
 0x1da   :  { %2342 = vst.msk [vmem:[%s4406_s3 + $0x58] sm:$0xff] %vm2330_vm1, %v2277_v34  ;;  %v2275_v52 = vmax.f32 %v2047_v6, 0.0  ;;  %v2068_v5 = vadd.f32 %v2686_v38, %v3876_v11 }
 0x1db   :  { %v1876_v62 = vpop.f32.mrf.mxu1  ;;  %v2059_v4 = vpop.f32.mrf.mxu0 }
 0x1dc   :  { %2340 = vst.msk [vmem:[%s4406_s3 + $0x48] sm:$0xff] %vm2330_vm1, %v2275_v52  ;;  %v2280_v19 = vmax.f32 %v2068_v5, 0.0  ;;  %v2060_v20 = vadd.f32 %v2059_v4, %v3856_v21 }
 0x1dd   :  { %v4056_v27 = vpop.f32.mrf.mxu1  ;;  %v2687_v12 = vpop.f32.mrf.mxu0 }
 0x1de   :  { %2345 = vst.msk [vmem:[%s4406_s3 + $0x70] sm:$0xff] %vm2330_vm1, %v2280_v19  ;;  %v2278_v46 = vmax.f32 %v2060_v20, 0.0  ;;  %v2071_v11 = vadd.f32 %v2687_v12, %v3882_v63 }
 0x1df   :  { %v1879_v23 = vpop.f32.mrf.mxu1  ;;  %v2062_v17 = vpop.f32.mrf.mxu0 }
 0x1e0   :  { %2343 = vst.msk [vmem:[%s4406_s3 + $0x60] sm:$0xff] %vm2330_vm1, %v2278_v46  ;;  %v2281_v48 = vmax.f32 %v2071_v11, 0.0  ;;  %v2063_v21 = vadd.f32 %v2062_v17, %v3869_v55 }
 0x1e1   :  { %v4068_v18 = vpop.f32.mrf.mxu1  ;;  %v2690_v47 = vpop.f32.mrf.mxu0 }
 0x1e2   :  { %2346 = vst.msk [vmem:[%s4406_s3 + $0x78] sm:$0xff] %vm2330_vm1, %v2281_v48  ;;  %v2279_v22 = vmax.f32 %v2063_v21, 0.0  ;;  %v2084_v63 = vadd.f32 %v2690_v47, %v3900_v43 }
 0x1e3   :  { %v1884_v16 = vpop.f32.mrf.mxu1  ;;  %v2075_v34 = vpop.f32.mrf.mxu0 }
 0x1e4   :  { %2344 = vst.msk [vmem:[%s4406_s3 + $0x68] sm:$0xff] %vm2330_vm1, %v2279_v22  ;;  %v2284_v6 = vmax.f32 %v2084_v63, 0.0  ;;  %v2076_v55 = vadd.f32 %v2075_v34, %v3888_v54 }
 0x1e5   :  { %v4080_v38 = vpop.f32.mrf.mxu1  ;;  %v2691_v52 = vpop.f32.mrf.mxu0 }
 0x1e6   :  { %2349 = vst.msk [vmem:[%s4406_s3 + $0x90] sm:$0xff] %vm2330_vm1, %v2284_v6  ;;  %v2282_v5 = vmax.f32 %v2076_v55, 0.0  ;;  %v2087_v43 = vadd.f32 %v2691_v52, %v3906_v50 }
 0x1e7   :  { %v1887_v62 = vpop.f32.mrf.mxu1  ;;  %v2078_v4 = vpop.f32.mrf.mxu0 }
 0x1e8   :  { %2347 = vst.msk [vmem:[%s4406_s3 + $0x80] sm:$0xff] %vm2330_vm1, %v2282_v5  ;;  %v2285_v19 = vmax.f32 %v2087_v43, 0.0  ;;  %v2079_v54 = vadd.f32 %v2078_v4, %v3894_v13 }
 0x1e9   :  { %v4092_v20 = vpop.f32.mrf.mxu1  ;;  %v2694_v12 = vpop.f32.mrf.mxu0 }
 0x1ea   :  { %2350 = vst.msk [vmem:[%s4406_s3 + $0x98] sm:$0xff] %vm2330_vm1, %v2285_v19  ;;  %v2283_v46 = vmax.f32 %v2079_v54, 0.0  ;;  %v2100_v50 = vadd.f32 %v2694_v12, %v3924_v53  ;;  %v1554_v19 = vadd.f32 %v3677_v49, %v3873_v61 }
 0x1eb   :  { %v1892_v11 = vpop.f32.mrf.mxu1  ;;  %v2091_v23 = vpop.f32.mrf.mxu0 }
 0x1ec   :  { %2348 = vst.msk [vmem:[%s4406_s3 + $0x88] sm:$0xff] %vm2330_vm1, %v2283_v46  ;;  %v2288_v17 = vmax.f32 %v2100_v50, 0.0  ;;  %v2092_v13 = vadd.f32 %v2091_v23, %v3912_v2  ;;  %v1843_v50 = vadd.f32 %v3970_v59, %v1554_v19 }
 0x1ed   :  { %v4104_v48 = vpop.f32.mrf.mxu1  ;;  %v2695_v21 = vpop.f32.mrf.mxu0 }
 0x1ee   :  { %2353 = vst.msk [vmem:[%s4406_s3 + $0xb0] sm:$0xff] %vm2330_vm1, %v2288_v17  ;;  %v2286_v47 = vmax.f32 %v2092_v13, 0.0  ;;  %v2103_v53 = vadd.f32 %v2695_v21, %v3930_v32  ;;  %v1557_v17 = vadd.f32 %v3677_v49, %v3880_v39 }
 0x1ef   :  { %v1895_v22 = vpop.f32.mrf.mxu1  ;;  %v2094_v63 = vpop.f32.mrf.mxu0 }
 0x1f0   :  { %2351 = vst.msk [vmem:[%s4406_s3 + $0xa0] sm:$0xff] %vm2330_vm1, %v2286_v47  ;;  %v2289_v16 = vmax.f32 %v2103_v53, 0.0  ;;  %v2095_v2 = vadd.f32 %v2094_v63, %v3918_v10  ;;  %v1846_v47 = vadd.f32 %v3974_v42, %v1557_v17  ;;  %v1570_v63 = vadd.f32 %v3677_v49, %v3898_v15 }
 0x1f1   :  { %v4116_v34 = vpop.f32.mrf.mxu1  ;;  %v2698_v6 = vpop.f32.mrf.mxu0 }
 0x1f2   :  { %2354 = vst.msk [vmem:[%s4406_s3 + $0xb8] sm:$0xff] %vm2330_vm1, %v2289_v16  ;;  %v2287_v55 = vmax.f32 %v2095_v2, 0.0  ;;  %v2116_v32 = vadd.f32 %v2698_v6, %v3948_v1 }
 0x1f3   :  { %v1900_v52 = vpop.f32.mrf.mxu1  ;;  %v2107_v5 = vpop.f32.mrf.mxu0 }
 0x1f4   :  { %2352 = vst.msk [vmem:[%s4406_s3 + $0xa8] sm:$0xff] %vm2330_vm1, %v2287_v55  ;;  %v2292_v43 = vmax.f32 %v2116_v32, 0.0  ;;  %v2108_v10 = vadd.f32 %v2107_v5, %v3936_v44  ;;  %v1859_v55 = vadd.f32 %v3996_v8, %v1570_v63  ;;  %v1573_v5 = vadd.f32 %v3677_v49, %v3904_v51 }
 0x1f5   :  { %v4128_v62 = vpop.f32.mrf.mxu1  ;;  %v2699_v4 = vpop.f32.mrf.mxu0  ;;  %v1602_v63 = vadd.f32 %v3677_v49, %v3946_v57 }
 0x1f6   :  { %2357 = vst.msk [vmem:[%s4406_s3 + $0xd0] sm:$0xff] %vm2330_vm1, %v2292_v43  ;;  %v2290_v1 = vmax.f32 %v2108_v10, 0.0  ;;  %v2119_v54 = vadd.f32 %v2699_v4, %v3954_v14  ;;  %v1862_v19 = vadd.f32 %v4008_v3, %v1573_v5 }
 0x1f7   :  { %v1903_v12 = vpop.f32.mrf.mxu1  ;;  %v2110_v46 = vpop.f32.mrf.mxu0 }
 0x1f8   :  { %2355 = vst.msk [vmem:[%s4406_s3 + $0xc0] sm:$0xff] %vm2330_vm1, %v2290_v1  ;;  %v2293_v44 = vmax.f32 %v2119_v54, 0.0  ;;  %v2111_v61 = vadd.f32 %v2110_v46, %v3942_v26  ;;  %v1586_v12 = vadd.f32 %v3677_v49, %v3922_v35 }
 0x1f9   :  { %v4143_v11 = vpop.f32.mrf.mxu1  ;;  %v2702_v23 = vpop.f32.mrf.mxu0 }
 0x1fa   :  { %2358 = vst.msk [vmem:[%s4406_s3 + $0xd8] sm:$0xff] %vm2330_vm1, %v2293_v44  ;;  %v2291_v14 = vmax.f32 %v2111_v61, 0.0  ;;  %v2132_v59 = vadd.f32 %v2702_v23, %v1843_v50  ;;  %v1578_v61 = vadd.f32 %v3677_v49, %v3910_v0 }
 0x1fb   :  { %v1908_v13 = vpop.f32.mrf.mxu1  ;;  %v2123_v21 = vpop.f32.mrf.mxu0 }
 0x1fc   :  { %2356 = vst.msk [vmem:[%s4406_s3 + $0xc8] sm:$0xff] %vm2330_vm1, %v2291_v14  ;;  %v2296_v26 = vmax.f32 %v2132_v59, 0.0  ;;  %v2124_v53 = vadd.f32 %v2123_v21, %v3960_v60  ;;  %v1589_v59 = vadd.f32 %v3677_v49, %v3928_v37  ;;  %v1867_v13 = vadd.f32 %v4020_v28, %v1578_v61 }
 0x1fd   :  { %v4157_v39 = vpop.f32.mrf.mxu1  ;;  %v2703_v22 = vpop.f32.mrf.mxu0 }
 0x1fe   :  { %2361 = vst.msk [vmem:[%s4406_s3 + $0xf0] sm:$0xff] %vm2330_vm1, %v2296_v26  ;;  %v2294_v42 = vmax.f32 %v2124_v53, 0.0  ;;  %v2135_v16 = vadd.f32 %v2703_v22, %v1846_v47  ;;  %v1878_v26 = vadd.f32 %v4056_v27, %v1589_v59  ;;  %v4275_v59 = vld [vmem:[%s4405_s2] ss:$0 sm:$0xff] }
 0x1ff   :  { %v1911_v2 = vpop.f32.mrf.mxu1  ;;  %v2126_v6 = vpop.f32.mrf.mxu0 }
 0x200   :  { %2359 = vst.msk [vmem:[%s4406_s3 + $0xe0] sm:$0xff] %vm2330_vm1, %v2294_v42  ;;  %v2297_v60 = vmax.f32 %v2135_v16, 0.0  ;;  %v2127_v32 = vadd.f32 %v2126_v6, %v3966_v9  ;;  %v1594_v6 = vadd.f32 %v3677_v49, %v3934_v31 }
 0x201   :  { %v4171_v15 = vpop.f32.mrf.mxu1  ;;  %v2706_v52 = vpop.f32.mrf.mxu0 }
 0x202   :  { %2362 = vst.msk [vmem:[%s4406_s3 + $0xf8] sm:$0xff] %vm2330_vm1, %v2297_v60  ;;  %v2295_v8 = vmax.f32 %v2127_v32, 0.0  ;;  %v2148_v43 = vadd.f32 %v2706_v52, %v1859_v55  ;;  %v1891_v55 = vadd.f32 %v4092_v20, %v1602_v63  ;;  %v1605_v52 = vadd.f32 %v3677_v49, %v3952_v29 }
 0x203   :  { %v1916_v10 = vpop.f32.mrf.mxu1  ;;  %v2139_v4 = vpop.f32.mrf.mxu0  ;;  %v1883_v5 = vadd.f32 %v4068_v18, %v1594_v6 }
 0x204   :  { %2360 = vst.msk [vmem:[%s4406_s3 + $0xe8] sm:$0xff] %vm2330_vm1, %v2295_v8  ;;  %v2300_v9 = vmax.f32 %v2148_v43, 0.0  ;;  %v2140_v1 = vadd.f32 %v2139_v4, %v3978_v56  ;;  %v1875_v56 = vadd.f32 %v4044_v33, %v1586_v12  ;;  %v1597_v10 = vadd.f32 %v3677_v49, %v3940_v30 }
 0x205   :  { %v4185_v51 = vpop.f32.mrf.mxu1  ;;  %v2707_v54 = vpop.f32.mrf.mxu0  ;;  %v1894_v4 = vadd.f32 %v4104_v48, %v1605_v52 }
 0x206   :  { %2365 = vst.msk [vmem:[%s4406_s3 + $0x110] sm:$0xff] %vm2330_vm1, %v2300_v9  ;;  %v2298_v3 = vmax.f32 %v2140_v1, 0.0  ;;  %v2151_v46 = vadd.f32 %v2707_v54, %v1862_v19  ;;  %v1618_v1 = vadd.f32 %v3677_v49, %v3968_v7  ;;  %v1886_v54 = vadd.f32 %v4080_v38, %v1597_v10 }
 0x207   :  { %v1919_v50 = vpop.f32.mrf.mxu1  ;;  %v2142_v44 = vpop.f32.mrf.mxu0 }
 0x208   :  { %2363 = vst.msk [vmem:[%s4406_s3 + $0x100] sm:$0xff] %vm2330_vm1, %v2298_v3  ;;  %v2301_v35 = vmax.f32 %v2151_v46, 0.0  ;;  %v2143_v23 = vadd.f32 %v2142_v44, %v3988_v45  ;;  %v1581_v45 = vadd.f32 %v3677_v49, %v3916_v25  ;;  %v1610_v46 = vadd.f32 %v3677_v49, %v3958_v41 }
 0x209   :  { %v4201_v17 = vpop.f32.mrf.mxu1  ;;  %v2710_v14 = vpop.f32.mrf.mxu0  ;;  %v1907_v50 = vadd.f32 %v4143_v11, %v1618_v1 }
 0x20a   :  { %2366 = vst.msk [vmem:[%s4406_s3 + $0x118] sm:$0xff] %vm2330_vm1, %v2301_v35  ;;  %v2299_v0 = vmax.f32 %v2143_v23, 0.0  ;;  %v2164_v33 = vadd.f32 %v2710_v14, %v1875_v56  ;;  %v1870_v42 = vadd.f32 %v4032_v36, %v1581_v45  ;;  %v1621_v56 = vadd.f32 %v3677_v49, %v3972_v40 }
 0x20b   :  { %v1924_v21 = vpop.f32.mrf.mxu1  ;;  %v2155_v47 = vpop.f32.mrf.mxu0  ;;  %v1899_v35 = vadd.f32 %v4116_v34, %v1610_v46 }
 0x20c   :  { %2364 = vst.msk [vmem:[%s4406_s3 + $0x108] sm:$0xff] %vm2330_vm1, %v2299_v0  ;;  %v2304_v37 = vmax.f32 %v2164_v33, 0.0  ;;  %v2156_v28 = vadd.f32 %v2155_v47, %v1867_v13  ;;  %v1613_v13 = vadd.f32 %v4275_v59, %v3964_v58  ;;  %v1910_v49 = vadd.f32 %v4157_v39, %v1621_v56 }
 0x20d   :  { %v4217_v53 = vpop.f32.mrf.mxu1  ;;  %v2711_v22 = vpop.f32.mrf.mxu0  ;;  %v1634_v21 = vadd.f32 %v4275_v59, %v3538_v24 }
 0x20e   :  { %2369 = vst.msk [vmem:[%s4406_s3 + $0x130] sm:$0xff] %vm2330_vm1, %v2304_v37  ;;  %v2302_v25 = vmax.f32 %v2156_v28, 0.0  ;;  %v2167_v27 = vadd.f32 %v2711_v22, %v1878_v26  ;;  %v1902_v47 = vadd.f32 %v4128_v62, %v1613_v13  ;;  %v4422_v37 = vld [vmem:[#allocation2_spill] sm:$0xff] }
 0x20f   :  { %v1927_v16 = vpop.f32.mrf.mxu1  ;;  %v2158_v2 = vpop.f32.mrf.mxu0  ;;  %v1626_v28 = vadd.f32 %v4275_v59, %v4422_v37  ;;  %v1923_v22 = vadd.f32 %v4201_v17, %v1634_v21  ;;  %v4430_v21 = vld [vmem:[#allocation9_spill] sm:$0xff]  ;;  %v4431_v37 = vld [vmem:[#allocation12_spill] sm:$0xff] }
 0x210   :  { %2367 = vst.msk [vmem:[%s4406_s3 + $0x120] sm:$0xff] %vm2330_vm1, %v2302_v25  ;;  %v2305_v57 = vmax.f32 %v2167_v27, 0.0  ;;  %v2159_v36 = vadd.f32 %v2158_v2, %v1870_v42  ;;  %v4423_v25 = vld [vmem:[#allocation4_spill] sm:$0xff] }
 0x211   :  { %v4233_v60 = vpop.f32.mrf.mxu1  ;;  %v2714_v32 = vpop.f32.mrf.mxu0  ;;  %v1637_v27 = vadd.f32 %v4275_v59, %v4423_v25  ;;  %v1915_v16 = vadd.f32 %v4171_v15, %v1626_v28  ;;  %v1669_v28 = vadd.f32 %v4275_v59, %v4431_v37 }
 0x212   :  { %2370 = vst.msk [vmem:[%s4406_s3 + $0x138] sm:$0xff] %vm2330_vm1, %v2305_v57  ;;  %v2303_v31 = vmax.f32 %v2159_v36, 0.0  ;;  %v2180_v20 = vadd.f32 %v2714_v32, %v1891_v55  ;;  %v4424_v57 = vld [vmem:[#allocation3_spill] sm:$0xff] }
 0x213   :  { %v1932_v8 = vpop.f32.mrf.mxu1  ;;  %v2171_v43 = vpop.f32.mrf.mxu0  ;;  %v1629_v36 = vadd.f32 %v4275_v59, %v4424_v57  ;;  %v1926_v32 = vadd.f32 %v4217_v53, %v1637_v27  ;;  %v4432_v27 = vld [vmem:[#allocation10_spill] sm:$0xff] }
 0x214   :  { %2368 = vst.msk [vmem:[%s4406_s3 + $0x128] sm:$0xff] %vm2330_vm1, %v2303_v31  ;;  %v2308_v29 = vmax.f32 %v2180_v20, 0.0  ;;  %v2172_v18 = vadd.f32 %v2171_v43, %v1883_v5  ;;  %v4425_v20 = vld [vmem:[#allocation7_spill] sm:$0xff] }
 0x215   :  { %v4249_v19 = vpop.f32.mrf.mxu1  ;;  %v2715_v9 = vpop.f32.mrf.mxu0  ;;  %v1650_v8 = vadd.f32 %v4275_v59, %v4425_v20  ;;  %v1918_v43 = vadd.f32 %v4185_v51, %v1629_v36 }
 0x216   :  { %2373 = vst.msk [vmem:[%s4406_s3 + $0x150] sm:$0xff] %vm2330_vm1, %v2308_v29  ;;  %v2306_v30 = vmax.f32 %v2172_v18, 0.0  ;;  %v2183_v48 = vadd.f32 %v2715_v9, %v1894_v4  ;;  %v4426_v18 = vld [vmem:[#allocation5_spill] sm:$0xff] }
 0x217   :  { %v1935_v12 = vpop.f32.mrf.mxu1  ;;  %v2174_v3 = vpop.f32.mrf.mxu0  ;;  %v1642_v9 = vadd.f32 %v4275_v59, %v4426_v18 }
 0x218   :  { %2371 = vst.msk [vmem:[%s4406_s3 + $0x140] sm:$0xff] %vm2330_vm1, %v2306_v30  ;;  %v2309_v7 = vmax.f32 %v2183_v48, 0.0  ;;  %v2175_v38 = vadd.f32 %v2174_v3, %v1886_v54  ;;  %v4427_v12 = vld [vmem:[#allocation8_spill] sm:$0xff] }
 0x219   :  { %v1938_v44 = vpop.f32.mrf.mxu1  ;;  %v2718_v61 = vpop.f32.mrf.mxu0  ;;  %v1653_v3 = vadd.f32 %v4275_v59, %v4427_v12  ;;  %v1931_v46 = vadd.f32 %v4233_v60, %v1642_v9 }
 0x21a   :  { %2374 = vst.msk [vmem:[%s4406_s3 + $0x158] sm:$0xff] %vm2330_vm1, %v2309_v7  ;;  %v2307_v41 = vmax.f32 %v2175_v38, 0.0  ;;  %v2196_v11 = vadd.f32 %v2718_v61, %v1907_v50  ;;  %v1939_v1 = vadd.f32 %v1938_v44, %v1650_v8  ;;  %v4428_v61 = vld [vmem:[#allocation6_spill] sm:$0xff]  ;;  %v4434_v8 = vld [vmem:[#allocation15_spill] sm:$0xff] }
 0x21b   :  { %v1940_v23 = vpop.f32.mrf.mxu1  ;;  %v2187_v14 = vpop.f32.mrf.mxu0  ;;  %v1645_v56 = vadd.f32 %v4275_v59, %v4428_v61 }
 0x21c   :  { %2372 = vst.msk [vmem:[%s4406_s3 + $0x148] sm:$0xff] %vm2330_vm1, %v2307_v41  ;;  %v2312_v40 = vmax.f32 %v2196_v11, 0.0  ;;  %v2188_v34 = vadd.f32 %v2187_v14, %v1899_v35  ;;  %v4429_v14 = vld [vmem:[#allocation11_spill] sm:$0xff] }
 0x21d   :  { %v1941_v0 = vpop.f32.mrf.mxu1  ;;  %v2719_v33 = vpop.f32.mrf.mxu0  ;;  %v1666_v13 = vadd.f32 %v4275_v59, %v4429_v14 }
 0x21e   :  { %2377 = vst.msk [vmem:[%s4406_s3 + $0x170] sm:$0xff] %vm2330_vm1, %v2312_v40  ;;  %v2310_v58 = vmax.f32 %v2188_v34, 0.0  ;;  %v2199_v39 = vadd.f32 %v2719_v33, %v1910_v49  ;;  %v1942_v35 = vadd.f32 %v1941_v0, %v1653_v3  ;;  %v1934_v49 = vadd.f32 %v4249_v19, %v1645_v56 }
 0x21f   :  { %v1943_v45 = vpop.f32.mrf.mxu1  ;;  %v2190_v26 = vpop.f32.mrf.mxu0 }
 0x220   :  { %2375 = vst.msk [vmem:[%s4406_s3 + $0x160] sm:$0xff] %vm2330_vm1, %v2310_v58  ;;  %v2313_v24 = vmax.f32 %v2199_v39, 0.0  ;;  %v2191_v62 = vadd.f32 %v2190_v26, %v1902_v47  ;;  %v1658_v47 = vadd.f32 %v4275_v59, %v4430_v21 }
 0x221   :  { %v1946_v63 = vpop.f32.mrf.mxu1  ;;  %v2722_v42 = vpop.f32.mrf.mxu0 }
 0x222   :  { %2378 = vst.msk [vmem:[%s4406_s3 + $0x178] sm:$0xff] %vm2330_vm1, %v2313_v24  ;;  %v2311_v17 = vmax.f32 %v2191_v62, 0.0  ;;  %v2212_v2 = vadd.f32 %v2722_v42, %v1923_v22  ;;  %v1947_v22 = vadd.f32 %v1946_v63, %v1658_v47 }
 0x223   :  { %v1948_v6 = vpop.f32.mrf.mxu1  ;;  %v2203_v55 = vpop.f32.mrf.mxu0 }
 0x224   :  { %2376 = vst.msk [vmem:[%s4406_s3 + $0x168] sm:$0xff] %vm2330_vm1, %v2311_v17  ;;  %v2316_v15 = vmax.f32 %v2212_v2, 0.0  ;;  %v2204_v52 = vadd.f32 %v2203_v55, %v1915_v16  ;;  %v1661_v16 = vadd.f32 %v4275_v59, %v4432_v27 }
 0x225   :  { %v1949_v5 = vpop.f32.mrf.mxu1  ;;  %v2723_v31 = vpop.f32.mrf.mxu0 }
 0x226   :  { %2381 = vst.msk [vmem:[%s4406_s3 + $0x190] sm:$0xff] %vm2330_vm1, %v2316_v15  ;;  %v2314_v53 = vmax.f32 %v2204_v52, 0.0  ;;  %v2215_v10 = vadd.f32 %v2723_v31, %v1926_v32  ;;  %v1950_v57 = vadd.f32 %v1949_v5, %v1661_v16  ;;  %v4433_v31 = vld [vmem:[#allocation13_spill] sm:$0xff] }
 0x227   :  { %v1951_v4 = vpop.f32.mrf.mxu1  ;;  %v2206_v29 = vpop.f32.mrf.mxu0  ;;  %v1674_v20 = vadd.f32 %v4275_v59, %v4433_v31 }
 0x228   :  { %2379 = vst.msk [vmem:[%s4406_s3 + $0x180] sm:$0xff] %vm2330_vm1, %v2314_v53  ;;  %v2317_v54 = vmax.f32 %v2215_v10, 0.0  ;;  %v2207_v51 = vadd.f32 %v2206_v29, %v1918_v43  ;;  %v1682_v43 = vadd.f32 %v4275_v59, %v4434_v8 }
 0x229   :  { %v1954_v30 = vpop.f32.mrf.mxu1  ;;  %v2726_v48 = vpop.f32.mrf.mxu0 }
 0x22a   :  { %2382 = vst.msk [vmem:[%s4406_s3 + $0x198] sm:$0xff] %vm2330_vm1, %v2317_v54  ;;  %v2315_v50 = vmax.f32 %v2207_v51, 0.0  ;;  %v2228_v7 = vadd.f32 %v2726_v48, %v1939_v1  ;;  %v1955_v58 = vadd.f32 %v1954_v30, %v1666_v13  ;;  %v4435_v51 = vld [vmem:[#allocation14_spill] sm:$0xff]  ;;  %v4436_v48 = vld [vmem:[#allocation16_spill] sm:$0xff] }
 0x22b   :  { %v1956_v38 = vpop.f32.mrf.mxu1  ;;  %v2219_v44 = vpop.f32.mrf.mxu0  ;;  %v1677_v30 = vadd.f32 %v4275_v59, %v4435_v51  ;;  %v1685_v12 = vadd.f32 %v4275_v59, %v4436_v48 }
 0x22c   :  { %2380 = vst.msk [vmem:[%s4406_s3 + $0x188] sm:$0xff] %vm2330_vm1, %v2315_v50  ;;  %v2320_v41 = vmax.f32 %v2228_v7, 0.0  ;;  %v2220_v60 = vadd.f32 %v2219_v44, %v1931_v46 }
 0x22d   :  { %v1957_v11 = vpop.f32.mrf.mxu1  ;;  %v2727_v23 = vpop.f32.mrf.mxu0 }
 0x22e   :  { %2385 = vst.msk [vmem:[%s4406_s3 + $0x1b0] sm:$0xff] %vm2330_vm1, %v2320_v41  ;;  %v2318_v40 = vmax.f32 %v2220_v60, 0.0  ;;  %v2231_v34 = vadd.f32 %v2727_v23, %v1942_v35  ;;  %v1958_v17 = vadd.f32 %v1957_v11, %v1669_v28 }
 0x22f   :  { %v1959_v0 = vpop.f32.mrf.mxu1  ;;  %v2222_v33 = vpop.f32.mrf.mxu0 }
 0x230   :  { %2383 = vst.msk [vmem:[%s4406_s3 + $0x1a0] sm:$0xff] %vm2330_vm1, %v2318_v40  ;;  %v2321_v39 = vmax.f32 %v2231_v34, 0.0  ;;  %v2223_v19 = vadd.f32 %v2222_v33, %v1934_v49 }
 0x231   :  { %v1962_v45 = vpop.f32.mrf.mxu1  ;;  %v2730_v26 = vpop.f32.mrf.mxu0 }
 0x232   :  { %2386 = vst.msk [vmem:[%s4406_s3 + $0x1b8] sm:$0xff] %vm2330_vm1, %v2321_v39  ;;  %v2319_v24 = vmax.f32 %v2223_v19, 0.0  ;;  %v2244_v62 = vadd.f32 %v2730_v26, %v1955_v58  ;;  %v1963_v29 = vadd.f32 %v1962_v45, %v1674_v20 }
 0x233   :  { %v1964_v42 = vpop.f32.mrf.mxu1  ;;  %v2235_v25 = vpop.f32.mrf.mxu0 }
 0x234   :  { %2384 = vst.msk [vmem:[%s4406_s3 + $0x1a8] sm:$0xff] %vm2330_vm1, %v2319_v24  ;;  %v2324_v2 = vmax.f32 %v2244_v62, 0.0  ;;  %v2236_v63 = vadd.f32 %v2235_v25, %v1947_v22 }
 0x235   :  { %v1965_v6 = vpop.f32.mrf.mxu1  ;;  %v2731_v55 = vpop.f32.mrf.mxu0 }
 0x236   :  { %2389 = vst.msk [vmem:[%s4406_s3 + $0x1d0] sm:$0xff] %vm2330_vm1, %v2324_v2  ;;  %v2322_v36 = vmax.f32 %v2236_v63, 0.0  ;;  %v2247_v32 = vadd.f32 %v2731_v55, %v1958_v17  ;;  %v1966_v38 = vadd.f32 %v1965_v6, %v1677_v30 }
 0x237   :  { %v1967_v15 = vpop.f32.mrf.mxu1  ;;  %v2238_v52 = vpop.f32.mrf.mxu0 }
 0x238   :  { %2387 = vst.msk [vmem:[%s4406_s3 + $0x1c0] sm:$0xff] %vm2330_vm1, %v2322_v36  ;;  %v2325_v5 = vmax.f32 %v2247_v32, 0.0  ;;  %v2239_v53 = vadd.f32 %v2238_v52, %v1950_v57 }
 0x239   :  { %v1970_v10 = vpop.f32.mrf.mxu1  ;;  %v2734_v4 = vpop.f32.mrf.mxu0 }
 0x23a   :  { %2390 = vst.msk [vmem:[%s4406_s3 + $0x1d8] sm:$0xff] %vm2330_vm1, %v2325_v5  ;;  %v2323_v18 = vmax.f32 %v2239_v53, 0.0  ;;  %v1971_v9 = vadd.f32 %v1970_v10, %v1682_v43 }
 0x23b   :  { %v1972_v1 = vpop.f32.mrf.mxu1  ;;  %v2251_v54 = vpop.f32.mrf.mxu0 }
 0x23c   :  { %2388 = vst.msk [vmem:[%s4406_s3 + $0x1c8] sm:$0xff] %vm2330_vm1, %v2323_v18  ;;  %v2260_v3 = vadd.f32 %v2734_v4, %v1971_v9  ;;  %v2252_v46 = vadd.f32 %v2251_v54, %v1963_v29 }
 0x23d   :  { %v1973_v50 = vpop.f32.mrf.mxu1  ;;  %v2735_v7 = vpop.f32.mrf.mxu0 }
 0x23e   :  { %v2328_v44 = vmax.f32 %v2260_v3, 0.0  ;;  %v2326_v61 = vmax.f32 %v2252_v46, 0.0  ;;  %v1974_v56 = vadd.f32 %v1973_v50, %v1685_v12 }
 0x23f   :  { %v1975_v35 = vpop.f32.mrf.mxu1  ;;  %v2254_v41 = vpop.f32.mrf.mxu0 }
 0x240   :  { %2393 = vst.msk [vmem:[%s4406_s3 + $0x1f0] sm:$0xff] %vm2330_vm1, %v2328_v44  ;;  %2391 = vst.msk [vmem:[%s4406_s3 + $0x1e0] sm:$0xff] %vm2330_vm1, %v2326_v61  ;;  %v2263_v59 = vadd.f32 %v2735_v7, %v1974_v56  ;;  %v2255_v60 = vadd.f32 %v2254_v41, %v1966_v38 }
 0x242   :  { %v2329_v11 = vmax.f32 %v2263_v59, 0.0  ;;  %v2327_v23 = vmax.f32 %v2255_v60, 0.0 }
 0x244   :  { %2394 = vst.msk [vmem:[%s4406_s3 + $0x1f8] sm:$0xff] %vm2330_vm1, %v2329_v11  ;;  %2392 = vst.msk [vmem:[%s4406_s3 + $0x1e8] sm:$0xff] %vm2330_vm1, %v2327_v23 }

// kernel: espcn_forward.7
= control target key start
LH: loop header
LB: loop body
LE: loop exit
PB: predicated region body
PF: predicated region fallthrough
CT: control target
= control target key end

     0   :  { %v1945_v0 = vmov 0   ;;  %vm774_vm0 = vcmask 261120   ;;  %s2808_s1 = inlined_call_operand.vmem [shape: bf16[288,32], index: 1, kind: input, shape index: {}]   ;;  %s2809_s0 = inlined_call_operand.vmem [shape: bf16[512,288], index: 0, kind: input, shape index: {}]   ;;  %s2810_s2 = inlined_call_operand.vmem [shape: f32[1,32], index: 2, kind: input, shape index: {}]   ;;  %s2811_s3 = inlined_call_operand.vmem [shape: f32[512,32], index: 3, kind: output, shape index: {}]  }
   0x1   :  { %871 = vmatprep.subr.bf16.mxu0 %v1945_v0  ;;  %1766 = vmatprep.subr.bf16.mxu1 %v1945_v0  ;;  %v1799_v1 = vld [vmem:[%s2808_s1 + $0x38] sm:$0xff]   ;;  %v1800_v2 = vld [vmem:[%s2808_s1 + $0x30] sm:$0xff]   ;;  %v1801_v3 = vld [vmem:[%s2808_s1 + $0x28] sm:$0xff]  }
   0x2   :  { %872 = vmatpush1.bf16.msra.mxu0 %v1799_v1  ;;  %1782 = vmatpush1.bf16.msra.mxu1 %v1799_v1  ;;  %v1802_v4 = vld [vmem:[%s2808_s1 + $0x20] sm:$0xff]   ;;  %v1803_v5 = vld [vmem:[%s2808_s1 + $0x18] sm:$0xff]   ;;  %v1804_v7 = vld [vmem:[%s2808_s1 + $0x10] sm:$0xff]  }
   0x3   :  { %873 = vmatprep.subr.bf16.mxu0 %v1945_v0  ;;  %1767 = vmatprep.subr.bf16.mxu1 %v1945_v0  ;;  %v1817_v6 = vld [vmem:[%s2809_s0 + $0x4] ss:$12 sps:$4 sm:$0xff]   ;;  %v1805_v9 = vld [vmem:[%s2808_s1 + $0x8] sm:$0xff]   ;;  %v1807_v11 = vld [vmem:[%s2808_s1 + $0x78] sm:$0xff]  }
   0x4   :  { %v1820_v8 = vld [vmem:[%s2809_s0 + $0x244] ss:$12 sps:$4 sm:$0xff]   ;;  %903 = vmatprep.mubr.bf16.mxu0 %v1817_v6  ;;  %v1809_v13 = vld [vmem:[%s2808_s1 + $0x68] sm:$0xff]   ;;  %v1811_v15 = vld [vmem:[%s2808_s1 + $0x58] sm:$0xff]  }
   0x5   :  { %1095 = vmatprep.mubr.bf16.mxu1 %v1820_v8  ;;  %v1806_v10 = vld [vmem:[%s2808_s1] sm:$0xff]   ;;  %v1808_v12 = vld [vmem:[%s2808_s1 + $0x70] sm:$0xff]   ;;  %v1813_v17 = vld [vmem:[%s2808_s1 + $0x48] sm:$0xff]  }
   0x6   :  { %874 = vmatpush1.bf16.msra.mxu0 %v1800_v2  ;;  %1783 = vmatpush1.bf16.msra.mxu1 %v1800_v2  ;;  %v1810_v14 = vld [vmem:[%s2808_s1 + $0x60] sm:$0xff]   ;;  %v1812_v16 = vld [vmem:[%s2808_s1 + $0x50] sm:$0xff]   ;;  %v1821_v19 = vld [vmem:[%s2808_s1 + $0x88] sm:$0xff]  }
   0x7   :  { %875 = vmatprep.subr.bf16.mxu0 %v1945_v0  ;;  %1768 = vmatprep.subr.bf16.mxu1 %v1945_v0  ;;  %v1814_v18 = vld [vmem:[%s2808_s1 + $0x40] sm:$0xff]   ;;  %v1822_v22 = vld [vmem:[%s2809_s0 + $0x1c] ss:$12 sps:$4 sm:$0xff]   ;;  %v1834_v31 = vld [vmem:[%s2809_s0 + $0x4c] ss:$12 sps:$4 sm:$0xff]  }
   0x8   :  { %v1815_v20 = vld [vmem:[%s2809_s0] ss:$12 sps:$4 sm:$0xff]   ;;  %v1824_v23 = vld [vmem:[%s2809_s0 + $0x25c] ss:$12 sps:$4 sm:$0xff]   ;;  %v1826_v25 = vld [vmem:[%s2809_s0 + $0x18] ss:$12 sps:$4 sm:$0xff]  }
   0x9   :  { %v1818_v21 = vld [vmem:[%s2809_s0 + $0x240] ss:$12 sps:$4 sm:$0xff]   ;;  %v1827_v26 = vld [vmem:[%s2809_s0 + $0x258] ss:$12 sps:$4 sm:$0xff]   ;;  %v1832_v29 = vld [vmem:[%s2809_s0 + $0x30] ss:$12 sps:$4 sm:$0xff]  }
   0xa   :  { %876 = vmatpush1.bf16.msra.mxu0 %v1801_v3  ;;  %1784 = vmatpush1.bf16.msra.mxu1 %v1801_v3  ;;  %v1846_v24 = vld [vmem:[%s2808_s1 + $0x80] sm:$0xff]   ;;  %v1833_v30 = vld [vmem:[%s2809_s0 + $0x270] ss:$12 sps:$4 sm:$0xff]   ;;  %v1836_v32 = vld [vmem:[%s2809_s0 + $0x28c] ss:$12 sps:$4 sm:$0xff]  }
   0xb   :  { %877 = vmatprep.subr.bf16.mxu0 %v1945_v0  ;;  %1769 = vmatprep.subr.bf16.mxu1 %v1945_v0  ;;  %v1828_v27 = vld [vmem:[%s2809_s0 + $0x34] ss:$12 sps:$4 sm:$0xff]   ;;  %v1840_v35 = vld [vmem:[%s2809_s0 + $0x64] ss:$12 sps:$4 sm:$0xff]   ;;  %v1847_v39 = vld [vmem:[%s2809_s0 + $0x7c] ss:$12 sps:$4 sm:$0xff]  }
   0xc   :  { %v1830_v28 = vld [vmem:[%s2809_s0 + $0x274] ss:$12 sps:$4 sm:$0xff]   ;;  %v1842_v36 = vld [vmem:[%s2809_s0 + $0x2a4] ss:$12 sps:$4 sm:$0xff]   ;;  %v1849_v40 = vld [vmem:[%s2809_s0 + $0x2bc] ss:$12 sps:$4 sm:$0xff]  }
   0xd   :  { %v1838_v33 = vld [vmem:[%s2809_s0 + $0x48] ss:$12 sps:$4 sm:$0xff]   ;;  %v1844_v37 = vld [vmem:[%s2809_s0 + $0x60] ss:$12 sps:$4 sm:$0xff]   ;;  %v1851_v41 = vld [vmem:[%s2809_s0 + $0x78] ss:$12 sps:$4 sm:$0xff]  }
   0xe   :  { %878 = vmatpush1.bf16.msra.mxu0 %v1802_v4  ;;  %1785 = vmatpush1.bf16.msra.mxu1 %v1802_v4  ;;  %v1839_v34 = vld [vmem:[%s2809_s0 + $0x288] ss:$12 sps:$4 sm:$0xff]   ;;  %v1845_v38 = vld [vmem:[%s2809_s0 + $0x2a0] ss:$12 sps:$4 sm:$0xff]   ;;  %v1852_v42 = vld [vmem:[%s2809_s0 + $0x2b8] ss:$12 sps:$4 sm:$0xff]  }
   0xf   :  { %879 = vmatprep.subr.bf16.mxu0 %v1945_v0  ;;  %1770 = vmatprep.subr.bf16.mxu1 %v1945_v0  ;;  %v1853_v43 = vld [vmem:[%s2809_s0 + $0x94] ss:$12 sps:$4 sm:$0xff]   ;;  %v1857_v45 = vld [vmem:[%s2809_s0 + $0x90] ss:$12 sps:$4 sm:$0xff]   ;;  %v1859_v47 = vld [vmem:[%s2809_s0 + $0xac] ss:$12 sps:$4 sm:$0xff]  }
  0x10   :  { %v1855_v44 = vld [vmem:[%s2809_s0 + $0x2d4] ss:$12 sps:$4 sm:$0xff]   ;;  %v1858_v46 = vld [vmem:[%s2809_s0 + $0x2d0] ss:$12 sps:$4 sm:$0xff]   ;;  %v1861_v48 = vld [vmem:[%s2809_s0 + $0x2ec] ss:$12 sps:$4 sm:$0xff]  }
  0x11   :  { %v1863_v49 = vld [vmem:[%s2809_s0 + $0xa8] ss:$12 sps:$4 sm:$0xff]   ;;  %v1865_v51 = vld [vmem:[%s2809_s0 + $0xc4] ss:$12 sps:$4 sm:$0xff]   ;;  %v1868_v53 = vld [vmem:[%s2809_s0 + $0xc0] ss:$12 sps:$4 sm:$0xff]  }
  0x12   :  { %880 = vmatpush1.bf16.msra.mxu0 %v1803_v5  ;;  %1786 = vmatpush1.bf16.msra.mxu1 %v1803_v5  ;;  %v1864_v50 = vld [vmem:[%s2809_s0 + $0x2e8] ss:$12 sps:$4 sm:$0xff]   ;;  %v1869_v54 = vld [vmem:[%s2809_s0 + $0x20] ss:$12 sps:$4 sm:$0xff]   ;;  %v1872_v56 = vld [vmem:[%s2809_s0 + $0x38] ss:$12 sps:$4 sm:$0xff]  }
  0x13   :  { %881 = vmatprep.subr.bf16.mxu0 %v1945_v0  ;;  %1771 = vmatprep.subr.bf16.mxu1 %v1945_v0  ;;  %v1867_v52 = vld [vmem:[%s2809_s0 + $0x8] ss:$12 sps:$4 sm:$0xff]   ;;  %v1873_v57 = vld [vmem:[%s2809_s0 + $0xd8] ss:$12 sps:$4 sm:$0xff]   ;;  %v1874_v58 = vld [vmem:[%s2809_s0 + $0x50] ss:$12 sps:$4 sm:$0xff]  }
  0x14   :  { %v1870_v55 = vld [vmem:[%s2809_s0 + $0xdc] ss:$12 sps:$4 sm:$0xff]   ;;  %v1875_v59 = vld [vmem:[%s2809_s0 + $0xf4] ss:$12 sps:$4 sm:$0xff]   ;;  %v1880_v63 = vld [vmem:[%s2809_s0 + $0x10c] ss:$12 sps:$4 sm:$0xff]  }
  0x15   :  { %v1877_v60 = vld [vmem:[%s2809_s0 + $0x68] ss:$12 sps:$4 sm:$0xff]   ;;  %v1878_v61 = vld [vmem:[%s2809_s0 + $0xf0] ss:$12 sps:$4 sm:$0xff]   ;;  %v1879_v62 = vld [vmem:[%s2809_s0 + $0x80] ss:$12 sps:$4 sm:$0xff]  }
  0x16   :  { %882 = vmatpush1.bf16.msra.mxu0 %v1804_v7  ;;  %1787 = vmatpush1.bf16.msra.mxu1 %v1804_v7  ;;  %v1883_v1 = vld [vmem:[%s2809_s0 + $0x108] ss:$12 sps:$4 sm:$0xff]   ;;  %v1884_v2 = vld [vmem:[%s2809_s0 + $0xb0] ss:$12 sps:$4 sm:$0xff]   ;;  %v1888_v5 = vld [vmem:[%s2809_s0 + $0x120] ss:$12 sps:$4 sm:$0xff]  }
  0x17   :  { %883 = vmatprep.subr.bf16.mxu0 %v1945_v0  ;;  %1772 = vmatprep.subr.bf16.mxu1 %v1945_v0  ;;  %v1885_v3 = vld [vmem:[%s2809_s0 + $0x124] ss:$12 sps:$4 sm:$0xff]   ;;  %v1887_v4 = vld [vmem:[%s2809_s0 + $0xc8] ss:$12 sps:$4 sm:$0xff]   ;;  %v1889_v6 = vld [vmem:[%s2809_s0 + $0xe0] ss:$12 sps:$4 sm:$0xff]  }
  0x18   :  { %v1890_v7 = vld [vmem:[%s2809_s0 + $0x13c] ss:$12 sps:$4 sm:$0xff]   ;;  %v1892_v8 = vld [vmem:[%s2809_s0 + $0xf8] ss:$12 sps:$4 sm:$0xff]  }
  0x1a   :  { %884 = vmatpush1.bf16.msra.mxu0 %v1805_v9  ;;  %1788 = vmatpush1.bf16.msra.mxu1 %v1805_v9  ;;  %v1893_v9 = vld [vmem:[%s2809_s0 + $0x138] ss:$12 sps:$4 sm:$0xff]  }
  0x1b   :  { %885 = vmatprep.subr.bf16.mxu0 %v1945_v0  ;;  %1773 = vmatprep.subr.bf16.mxu1 %v1945_v0 }
  0x1e   :  { %886 = vmatpush1.bf16.msra.mxu0 %v1806_v10  ;;  %1789 = vmatpush1.bf16.msra.mxu1 %v1806_v10  ;;  %v1894_v10 = vld [vmem:[%s2809_s0 + $0x110] ss:$12 sps:$4 sm:$0xff]  }
  0x1f   :  { %887 = vmatprep.subr.bf16.mxu0 %v1945_v0  ;;  %1774 = vmatprep.subr.bf16.mxu1 %v1945_v0 }
  0x22   :  { %888 = vmatpush2.bf16.msra.mxu0 %v1807_v11  ;;  %1790 = vmatpush2.bf16.msra.mxu1 %v1807_v11  ;;  %v1895_v11 = vld [vmem:[%s2809_s0 + $0x154] ss:$12 sps:$4 sm:$0xff]  }
  0x23   :  { %889 = vmatprep.subr.bf16.mxu0 %v1945_v0  ;;  %1775 = vmatprep.subr.bf16.mxu1 %v1945_v0 }
  0x26   :  { %890 = vmatpush2.bf16.msra.mxu0 %v1808_v12  ;;  %1791 = vmatpush2.bf16.msra.mxu1 %v1808_v12  ;;  %v1897_v12 = vld [vmem:[%s2809_s0 + $0x128] ss:$12 sps:$4 sm:$0xff]  }
  0x27   :  { %891 = vmatprep.subr.bf16.mxu0 %v1945_v0  ;;  %1776 = vmatprep.subr.bf16.mxu1 %v1945_v0 }
  0x2a   :  { %892 = vmatpush2.bf16.msra.mxu0 %v1809_v13  ;;  %1792 = vmatpush2.bf16.msra.mxu1 %v1809_v13  ;;  %v1898_v13 = vld [vmem:[%s2809_s0 + $0x150] ss:$12 sps:$4 sm:$0xff]  }
  0x2b   :  { %893 = vmatprep.subr.bf16.mxu0 %v1945_v0  ;;  %1777 = vmatprep.subr.bf16.mxu1 %v1945_v0 }
  0x2e   :  { %894 = vmatpush2.bf16.msra.mxu0 %v1810_v14  ;;  %1793 = vmatpush2.bf16.msra.mxu1 %v1810_v14  ;;  %v1899_v14 = vld [vmem:[%s2809_s0 + $0x140] ss:$12 sps:$4 sm:$0xff]  }
  0x2f   :  { %895 = vmatprep.subr.bf16.mxu0 %v1945_v0  ;;  %1778 = vmatprep.subr.bf16.mxu1 %v1945_v0 }
  0x32   :  { %896 = vmatpush2.bf16.msra.mxu0 %v1811_v15  ;;  %1794 = vmatpush2.bf16.msra.mxu1 %v1811_v15  ;;  %v1900_v15 = vld [vmem:[%s2809_s0 + $0x16c] ss:$12 sps:$4 sm:$0xff]  }
  0x33   :  { %897 = vmatprep.subr.bf16.mxu0 %v1945_v0  ;;  %1779 = vmatprep.subr.bf16.mxu1 %v1945_v0 }
  0x36   :  { %898 = vmatpush2.bf16.msra.mxu0 %v1812_v16  ;;  %1795 = vmatpush2.bf16.msra.mxu1 %v1812_v16  ;;  %v1902_v16 = vld [vmem:[%s2809_s0 + $0x158] ss:$12 sps:$4 sm:$0xff]  }
  0x37   :  { %899 = vmatprep.subr.bf16.mxu0 %v1945_v0  ;;  %1780 = vmatprep.subr.bf16.mxu1 %v1945_v0 }
  0x3a   :  { %900 = vmatpush2.bf16.msra.mxu0 %v1813_v17  ;;  %1796 = vmatpush2.bf16.msra.mxu1 %v1813_v17  ;;  %v1903_v17 = vld [vmem:[%s2809_s0 + $0x168] ss:$12 sps:$4 sm:$0xff]  }
  0x3b   :  { %901 = vmatprep.subr.bf16.mxu0 %v1945_v0  ;;  %1781 = vmatprep.subr.bf16.mxu1 %v1945_v0  ;;  %v1882_v0 = vld [vmem:[%s2809_s0 + $0x98] ss:$12 sps:$4 sm:$0xff]  }
  0x3e   :  { %902 = vmatpush2.bf16.msra.mxu0 %v1814_v18  ;;  %1797 = vmatpush2.bf16.msra.mxu1 %v1814_v18  ;;  %v1904_v18 = vld [vmem:[%s2809_s0 + $0x170] ss:$12 sps:$4 sm:$0xff]  }
  0x3f   :  { %1698 = vmatprep.subr.bf16.mxu1 %v1821_v19 }
  0x41   :  { %904 = vmatmul.mubr.bf16.vlgmr.msra.gmra.mxu0 %v1815_v20  ;;  %1096 = vmatmul.mubr.bf16.vlgmr.msra.gmra.mxu1 %v1818_v21  ;;  %v1907_v20 = vld [vmem:[%s2809_s0 + $0x188] ss:$12 sps:$4 sm:$0xff]   ;;  %v1908_v21 = vld [vmem:[%s2809_s0 + $0x180] ss:$12 sps:$4 sm:$0xff]  }
  0x42   :  { %1699 = vmatpush3.bf16.msra.mxu1 %v1821_v19  ;;  %911 = vmatprep.mubr.bf16.mxu0 %v1822_v22  ;;  %v1905_v19 = vld [vmem:[%s2809_s0 + $0x184] ss:$12 sps:$4 sm:$0xff]   ;;  %v1909_v22 = vld [vmem:[%s2809_s0 + $0x1a0] ss:$12 sps:$4 sm:$0xff]  }
  0x43   :  { %1103 = vmatprep.mubr.bf16.mxu1 %v1824_v23  ;;  %1700 = vmatprep.subr.bf16.mxu1 %v1846_v24  ;;  %v1910_v23 = vld [vmem:[%s2809_s0 + $0x19c] ss:$12 sps:$4 sm:$0xff]  }
  0x46   :  { %1701 = vmatpush3.bf16.msra.mxu1 %v1846_v24  ;;  %v1912_v24 = vld [vmem:[%s2809_s0 + $0x1b8] ss:$12 sps:$4 sm:$0xff]  }
  0x49   :  { %912 = vmatmul.mubr.bf16.gmra.mxu0 %v1826_v25  ;;  %1104 = vmatmul.mubr.bf16.gmra.mxu1 %v1827_v26  ;;  %v1913_v25 = vld [vmem:[%s2809_s0 + $0x198] ss:$12 sps:$4 sm:$0xff]   ;;  %v1914_v26 = vld [vmem:[%s2809_s0 + $0x1d0] ss:$12 sps:$4 sm:$0xff]  }
  0x4a   :  { %919 = vmatprep.mubr.bf16.mxu0 %v1828_v27  ;;  %1111 = vmatprep.mubr.bf16.mxu1 %v1830_v28  ;;  %v1915_v27 = vld [vmem:[%s2809_s0 + $0x1b4] ss:$12 sps:$4 sm:$0xff]  }
  0x4b   :  { %v1917_v28 = vld [vmem:[%s2809_s0 + $0x1e8] ss:$12 sps:$4 sm:$0xff]  }
  0x51   :  { %920 = vmatmul.mubr.bf16.gmra.mxu0 %v1832_v29  ;;  %1112 = vmatmul.mubr.bf16.gmra.mxu1 %v1833_v30  ;;  %v1918_v29 = vld [vmem:[%s2809_s0 + $0x1b0] ss:$12 sps:$4 sm:$0xff]   ;;  %v1919_v30 = vld [vmem:[%s2809_s0 + $0x200] ss:$12 sps:$4 sm:$0xff]  }
  0x52   :  { %927 = vmatprep.mubr.bf16.mxu0 %v1834_v31  ;;  %1119 = vmatprep.mubr.bf16.mxu1 %v1836_v32  ;;  %v1920_v31 = vld [vmem:[%s2809_s0 + $0x1cc] ss:$12 sps:$4 sm:$0xff]  }
  0x53   :  { %v1922_v32 = vld [vmem:[%s2809_s0 + $0x218] ss:$12 sps:$4 sm:$0xff]  }
  0x59   :  { %928 = vmatmul.mubr.bf16.gmra.mxu0 %v1838_v33  ;;  %1120 = vmatmul.mubr.bf16.gmra.mxu1 %v1839_v34  ;;  %v1923_v33 = vld [vmem:[%s2809_s0 + $0x1c8] ss:$12 sps:$4 sm:$0xff]   ;;  %v1924_v34 = vld [vmem:[%s2809_s0 + $0x230] ss:$12 sps:$4 sm:$0xff]  }
  0x5a   :  { %935 = vmatprep.mubr.bf16.mxu0 %v1840_v35  ;;  %1127 = vmatprep.mubr.bf16.mxu1 %v1842_v36  ;;  %v1925_v35 = vld [vmem:[%s2809_s0 + $0x1e4] ss:$12 sps:$4 sm:$0xff]   ;;  %v1927_v36 = vld [vmem:[%s2809_s0 + $0x248] ss:$12 sps:$4 sm:$0xff]  }
  0x61   :  { %936 = vmatmul.mubr.bf16.gmra.mxu0 %v1844_v37  ;;  %1128 = vmatmul.mubr.bf16.gmra.mxu1 %v1845_v38  ;;  %v1928_v37 = vld [vmem:[%s2809_s0 + $0x1e0] ss:$12 sps:$4 sm:$0xff]  }
  0x62   :  { %943 = vmatprep.mubr.bf16.mxu0 %v1847_v39  ;;  %1135 = vmatprep.mubr.bf16.mxu1 %v1849_v40  ;;  %v1929_v38 = vld [vmem:[%s2809_s0 + $0x260] ss:$12 sps:$4 sm:$0xff]   ;;  %v1930_v39 = vld [vmem:[%s2809_s0 + $0x1fc] ss:$12 sps:$4 sm:$0xff]   ;;  %v1932_v40 = vld [vmem:[%s2809_s0 + $0x278] ss:$12 sps:$4 sm:$0xff]  }
  0x69   :  { %944 = vmatmul.mubr.bf16.gmra.mxu0 %v1851_v41  ;;  %1136 = vmatmul.mubr.bf16.gmra.mxu1 %v1852_v42  ;;  %v1933_v41 = vld [vmem:[%s2809_s0 + $0x1f8] ss:$12 sps:$4 sm:$0xff]   ;;  %v1934_v42 = vld [vmem:[%s2809_s0 + $0x290] ss:$12 sps:$4 sm:$0xff]  }
  0x6a   :  { %951 = vmatprep.mubr.bf16.mxu0 %v1853_v43  ;;  %1143 = vmatprep.mubr.bf16.mxu1 %v1855_v44  ;;  %v1935_v43 = vld [vmem:[%s2809_s0 + $0x214] ss:$12 sps:$4 sm:$0xff]  }
  0x6b   :  { %v1937_v44 = vld [vmem:[%s2809_s0 + $0x2a8] ss:$12 sps:$4 sm:$0xff]  }
  0x71   :  { %952 = vmatmul.mubr.bf16.gmra.mxu0 %v1857_v45  ;;  %1144 = vmatmul.mubr.bf16.gmra.mxu1 %v1858_v46  ;;  %v1938_v45 = vld [vmem:[%s2809_s0 + $0x210] ss:$12 sps:$4 sm:$0xff]   ;;  %v1939_v46 = vld [vmem:[%s2809_s0 + $0x2c0] ss:$12 sps:$4 sm:$0xff]  }
  0x72   :  { %959 = vmatprep.mubr.bf16.mxu0 %v1859_v47  ;;  %1151 = vmatprep.mubr.bf16.mxu1 %v1861_v48  ;;  %v1940_v47 = vld [vmem:[%s2809_s0 + $0x22c] ss:$12 sps:$4 sm:$0xff]  }
  0x73   :  { %v1942_v48 = vld [vmem:[%s2809_s0 + $0x2d8] ss:$12 sps:$4 sm:$0xff]  }
  0x79   :  { %960 = vmatmul.mubr.bf16.gmra.mxu0 %v1863_v49  ;;  %1152 = vmatmul.mubr.bf16.gmra.mxu1 %v1864_v50  ;;  %v1943_v49 = vld [vmem:[%s2809_s0 + $0x228] ss:$12 sps:$4 sm:$0xff]   ;;  %v1944_v50 = vld [vmem:[%s2809_s0 + $0x2f0] ss:$12 sps:$4 sm:$0xff]  }
  0x7a   :  { %967 = vmatprep.mubr.bf16.mxu0 %v1865_v51  ;;  %1702 = vmatprep.mubr.msk.bf16.mxu1 %vm774_vm0, %v1867_v52 }
  0x81   :  { %968 = vmatmul.mubr.bf16.gmra.mxu0 %v1868_v53  ;;  %1703 = vmatmul.mubr.msk.bf16.vlgmr.msra.gmra.mxu1 %vm774_vm0, %v1869_v54 }
  0x82   :  { %975 = vmatprep.mubr.bf16.mxu0 %v1870_v55  ;;  %1706 = vmatprep.mubr.msk.bf16.mxu1 %vm774_vm0, %v1872_v56 }
  0x89   :  { %976 = vmatmul.mubr.bf16.gmra.mxu0 %v1873_v57  ;;  %1707 = vmatmul.mubr.msk.bf16.gmra.mxu1 %vm774_vm0, %v1874_v58 }
  0x8a   :  { %983 = vmatprep.mubr.bf16.mxu0 %v1875_v59  ;;  %1710 = vmatprep.mubr.msk.bf16.mxu1 %vm774_vm0, %v1877_v60 }
  0x91   :  { %984 = vmatmul.mubr.bf16.gmra.mxu0 %v1878_v61  ;;  %1711 = vmatmul.mubr.msk.bf16.gmra.mxu1 %vm774_vm0, %v1879_v62 }
  0x92   :  { %991 = vmatprep.mubr.bf16.mxu0 %v1880_v63  ;;  %1714 = vmatprep.mubr.msk.bf16.mxu1 %vm774_vm0, %v1882_v0 }
  0x99   :  { %992 = vmatmul.mubr.bf16.gmra.mxu0 %v1883_v1  ;;  %1715 = vmatmul.mubr.msk.bf16.gmra.mxu1 %vm774_vm0, %v1884_v2 }
  0x9a   :  { %999 = vmatprep.mubr.bf16.mxu0 %v1885_v3  ;;  %1718 = vmatprep.mubr.msk.bf16.mxu1 %vm774_vm0, %v1887_v4 }
  0xa1   :  { %1000 = vmatmul.mubr.bf16.gmra.mxu0 %v1888_v5  ;;  %1719 = vmatmul.mubr.msk.bf16.gmra.mxu1 %vm774_vm0, %v1889_v6 }
  0xa2   :  { %1007 = vmatprep.mubr.bf16.mxu0 %v1890_v7  ;;  %1722 = vmatprep.mubr.msk.bf16.mxu1 %vm774_vm0, %v1892_v8 }
  0xa9   :  { %1008 = vmatmul.mubr.bf16.gmra.mxu0 %v1893_v9  ;;  %1723 = vmatmul.mubr.msk.bf16.gmra.mxu1 %vm774_vm0, %v1894_v10 }
  0xaa   :  { %1015 = vmatprep.mubr.bf16.mxu0 %v1895_v11  ;;  %1726 = vmatprep.mubr.msk.bf16.mxu1 %vm774_vm0, %v1897_v12 }
  0xb1   :  { %1016 = vmatmul.mubr.bf16.gmra.mxu0 %v1898_v13  ;;  %1727 = vmatmul.mubr.msk.bf16.gmra.mxu1 %vm774_vm0, %v1899_v14 }
  0xb2   :  { %1023 = vmatprep.mubr.bf16.mxu0 %v1900_v15  ;;  %1730 = vmatprep.mubr.msk.bf16.mxu1 %vm774_vm0, %v1902_v16 }
  0xb9   :  { %1024 = vmatmul.mubr.bf16.gmra.mxu0 %v1903_v17  ;;  %1731 = vmatmul.mubr.msk.bf16.gmra.mxu1 %vm774_vm0, %v1904_v18 }
  0xba   :  { %1031 = vmatprep.mubr.bf16.mxu0 %v1905_v19  ;;  %1734 = vmatprep.mubr.msk.bf16.mxu1 %vm774_vm0, %v1907_v20 }
  0xc1   :  { %1032 = vmatmul.mubr.bf16.gmra.mxu0 %v1908_v21  ;;  %1735 = vmatmul.mubr.msk.bf16.gmra.mxu1 %vm774_vm0, %v1909_v22 }
  0xc2   :  { %1039 = vmatprep.mubr.bf16.mxu0 %v1910_v23  ;;  %1738 = vmatprep.mubr.msk.bf16.mxu1 %vm774_vm0, %v1912_v24 }
  0xc9   :  { %1040 = vmatmul.mubr.bf16.gmra.mxu0 %v1913_v25  ;;  %1739 = vmatmul.mubr.msk.bf16.gmra.mxu1 %vm774_vm0, %v1914_v26 }
  0xca   :  { %1047 = vmatprep.mubr.bf16.mxu0 %v1915_v27  ;;  %1742 = vmatprep.mubr.msk.bf16.mxu1 %vm774_vm0, %v1917_v28 }
  0xd1   :  { %1048 = vmatmul.mubr.bf16.gmra.mxu0 %v1918_v29  ;;  %1743 = vmatmul.mubr.msk.bf16.gmra.mxu1 %vm774_vm0, %v1919_v30 }
  0xd2   :  { %1055 = vmatprep.mubr.bf16.mxu0 %v1920_v31  ;;  %1746 = vmatprep.mubr.msk.bf16.mxu1 %vm774_vm0, %v1922_v32 }
  0xd9   :  { %1056 = vmatmul.mubr.bf16.gmra.mxu0 %v1923_v33  ;;  %1747 = vmatmul.mubr.msk.bf16.gmra.mxu1 %vm774_vm0, %v1924_v34 }
  0xda   :  { %1063 = vmatprep.mubr.bf16.mxu0 %v1925_v35  ;;  %1750 = vmatprep.mubr.msk.bf16.mxu1 %vm774_vm0, %v1927_v36 }
  0xe1   :  { %1064 = vmatmul.mubr.bf16.gmra.mxu0 %v1928_v37  ;;  %1751 = vmatmul.mubr.msk.bf16.gmra.mxu1 %vm774_vm0, %v1929_v38 }
  0xe2   :  { %1071 = vmatprep.mubr.bf16.mxu0 %v1930_v39  ;;  %1754 = vmatprep.mubr.msk.bf16.mxu1 %vm774_vm0, %v1932_v40 }
  0xe9   :  { %1072 = vmatmul.mubr.bf16.gmra.mxu0 %v1933_v41  ;;  %1755 = vmatmul.mubr.msk.bf16.gmra.mxu1 %vm774_vm0, %v1934_v42 }
  0xea   :  { %1079 = vmatprep.mubr.bf16.mxu0 %v1935_v43  ;;  %1758 = vmatprep.mubr.msk.bf16.mxu1 %vm774_vm0, %v1937_v44 }
  0xf1   :  { %1080 = vmatmul.mubr.bf16.gmra.mxu0 %v1938_v45  ;;  %1759 = vmatmul.mubr.msk.bf16.gmra.mxu1 %vm774_vm0, %v1939_v46 }
  0xf2   :  { %1087 = vmatprep.mubr.bf16.mxu0 %v1940_v47  ;;  %1762 = vmatprep.mubr.msk.bf16.mxu1 %vm774_vm0, %v1942_v48 }
  0xf9   :  { %1088 = vmatmul.mubr.bf16.gmra.mxu0 %v1943_v49  ;;  %1763 = vmatmul.mubr.msk.bf16.gmra.mxu1 %vm774_vm0, %v1944_v50  ;;  %v2433_v49 = vld [vmem:[%s2810_s2] ss:$0 sm:$0xff] }
 0x101   :  { %v2372_v51 = vpop.f32.mrf.mxu0  ;;  %v2374_v52 = vpop.f32.mrf.mxu1 }
 0x103   :  { %v907_v53 = vpop.f32.mrf.mxu0  ;;  %v1099_v54 = vpop.f32.mrf.mxu1 }
 0x105   :  { %v2376_v55 = vpop.f32.mrf.mxu0  ;;  %v2378_v56 = vpop.f32.mrf.mxu1 }
 0x107   :  { %v910_v57 = vpop.f32.mrf.mxu0  ;;  %v1102_v58 = vpop.f32.mrf.mxu1 }
 0x109   :  { %v913_v59 = vpop.f32.mrf.mxu0  ;;  %v2380_v60 = vpop.f32.mrf.mxu1 }
 0x10a   :  { %v914_v54 = vadd.f32 %v2433_v49, %v913_v59 }
 0x10b   :  { %v915_v61 = vpop.f32.mrf.mxu0  ;;  %v1107_v62 = vpop.f32.mrf.mxu1 }
 0x10c   :  { %v906_v61 = vadd.f32 %v2433_v49, %v2372_v51 }
 0x10d   :  { %v916_v63 = vpop.f32.mrf.mxu0  ;;  %v2382_v0 = vpop.f32.mrf.mxu1 }
 0x10f   :  { %v918_v1 = vpop.f32.mrf.mxu0  ;;  %v1110_v2 = vpop.f32.mrf.mxu1 }
 0x111   :  { %v2384_v3 = vpop.f32.mrf.mxu0  ;;  %v2386_v4 = vpop.f32.mrf.mxu1 }
 0x113   :  { %v923_v5 = vpop.f32.mrf.mxu0  ;;  %v1115_v6 = vpop.f32.mrf.mxu1 }
 0x114   :  { %v917_v5 = vadd.f32 %v2433_v49, %v916_v63 }
 0x115   :  { %v2388_v7 = vpop.f32.mrf.mxu0  ;;  %v2390_v8 = vpop.f32.mrf.mxu1 }
 0x117   :  { %v926_v9 = vpop.f32.mrf.mxu0  ;;  %v1118_v10 = vpop.f32.mrf.mxu1 }
 0x118   :  { %v909_v10 = vadd.f32 %v2433_v49, %v2376_v55  ;;  %v922_v55 = vadd.f32 %v2433_v49, %v2384_v3  ;;  %v925_v3 = vadd.f32 %v2433_v49, %v2388_v7 }
 0x119   :  { %v929_v11 = vpop.f32.mrf.mxu0  ;;  %v2392_v12 = vpop.f32.mrf.mxu1 }
 0x11b   :  { %v931_v13 = vpop.f32.mrf.mxu0  ;;  %v1123_v14 = vpop.f32.mrf.mxu1 }
 0x11c   :  { %v930_v14 = vadd.f32 %v2433_v49, %v929_v11 }
 0x11d   :  { %v2394_v15 = vpop.f32.mrf.mxu0  ;;  %v2396_v16 = vpop.f32.mrf.mxu1 }
 0x11e   :  { %v933_v11 = vadd.f32 %v2433_v49, %v2394_v15 }
 0x11f   :  { %v934_v17 = vpop.f32.mrf.mxu0  ;;  %v1126_v18 = vpop.f32.mrf.mxu1 }
 0x121   :  { %v2398_v19 = vpop.f32.mrf.mxu0  ;;  %v2400_v20 = vpop.f32.mrf.mxu1 }
 0x122   :  { %v938_v7 = vadd.f32 %v2433_v49, %v2398_v19 }
 0x123   :  { %v939_v21 = vpop.f32.mrf.mxu0  ;;  %v1131_v22 = vpop.f32.mrf.mxu1 }
 0x125   :  { %v2402_v23 = vpop.f32.mrf.mxu0  ;;  %v2404_v24 = vpop.f32.mrf.mxu1 }
 0x126   :  { %v941_v19 = vadd.f32 %v2433_v49, %v2402_v23 }
 0x127   :  { %v942_v25 = vpop.f32.mrf.mxu0  ;;  %v1134_v26 = vpop.f32.mrf.mxu1 }
 0x129   :  { %v2406_v27 = vpop.f32.mrf.mxu0  ;;  %v2408_v28 = vpop.f32.mrf.mxu1 }
 0x12a   :  { %v946_v15 = vadd.f32 %v2433_v49, %v2406_v27 }
 0x12b   :  { %v947_v29 = vpop.f32.mrf.mxu0  ;;  %v1139_v30 = vpop.f32.mrf.mxu1 }
 0x12d   :  { %v2410_v31 = vpop.f32.mrf.mxu0  ;;  %v2412_v32 = vpop.f32.mrf.mxu1 }
 0x12e   :  { %v949_v27 = vadd.f32 %v2433_v49, %v2410_v31 }
 0x12f   :  { %v950_v33 = vpop.f32.mrf.mxu0  ;;  %v1142_v34 = vpop.f32.mrf.mxu1 }
 0x131   :  { %v2414_v35 = vpop.f32.mrf.mxu0  ;;  %v2416_v36 = vpop.f32.mrf.mxu1 }
 0x132   :  { %v954_v23 = vadd.f32 %v2433_v49, %v2414_v35 }
 0x133   :  { %v955_v37 = vpop.f32.mrf.mxu0  ;;  %v1147_v38 = vpop.f32.mrf.mxu1 }
 0x135   :  { %v2418_v39 = vpop.f32.mrf.mxu0  ;;  %v2420_v40 = vpop.f32.mrf.mxu1 }
 0x136   :  { %v957_v35 = vadd.f32 %v2433_v49, %v2418_v39 }
 0x137   :  { %v958_v41 = vpop.f32.mrf.mxu0  ;;  %v1150_v42 = vpop.f32.mrf.mxu1 }
 0x139   :  { %v2422_v43 = vpop.f32.mrf.mxu0  ;;  %v2424_v44 = vpop.f32.mrf.mxu1 }
 0x13a   :  { %v962_v31 = vadd.f32 %v2433_v49, %v2422_v43 }
 0x13b   :  { %v963_v45 = vpop.f32.mrf.mxu0  ;;  %v1155_v46 = vpop.f32.mrf.mxu1 }
 0x13d   :  { %v2426_v47 = vpop.f32.mrf.mxu0  ;;  %v2428_v48 = vpop.f32.mrf.mxu1 }
 0x13e   :  { %v965_v43 = vadd.f32 %v2433_v49, %v2426_v47 }
 0x13f   :  { %v966_v50 = vpop.f32.mrf.mxu0  ;;  %v1158_v53 = vpop.f32.mrf.mxu1 }
 0x141   :  { %v2436_v57 = vpop.f32.mrf.mxu0  ;;  %v1704_v58 = vpop.f32.mrf.mxu1 }
 0x142   :  { %v1203_v62 = vadd.f32 %v1704_v58, %v914_v54  ;;  %v970_v39 = vadd.f32 %v2433_v49, %v2436_v57 }
 0x143   :  { %v971_v1 = vpop.f32.mrf.mxu0  ;;  %v1194_v2 = vpop.f32.mrf.mxu1 }
 0x144   :  { %1451 = vst.msk [vmem:[%s2811_s3 + $0x10] sm:$0xff] %vm774_vm0, %v1203_v62  ;;  %v1195_v6 = vadd.f32 %v1194_v2, %v906_v61 }
 0x145   :  { %v2445_v9 = vpop.f32.mrf.mxu0  ;;  %v1705_v59 = vpop.f32.mrf.mxu1 }
 0x146   :  { %1449 = vst.msk [vmem:[%s2811_s3] sm:$0xff] %vm774_vm0, %v1195_v6  ;;  %v1206_v51 = vadd.f32 %v1705_v59, %v917_v5  ;;  %v973_v57 = vadd.f32 %v2433_v49, %v2445_v9 }
 0x147   :  { %v974_v13 = vpop.f32.mrf.mxu0  ;;  %v1197_v63 = vpop.f32.mrf.mxu1 }
 0x148   :  { %1452 = vst.msk [vmem:[%s2811_s3 + $0x18] sm:$0xff] %vm774_vm0, %v1206_v51  ;;  %v1198_v17 = vadd.f32 %v1197_v63, %v909_v10 }
 0x149   :  { %v977_v18 = vpop.f32.mrf.mxu0  ;;  %v1708_v21 = vpop.f32.mrf.mxu1 }
 0x14a   :  { %1450 = vst.msk [vmem:[%s2811_s3 + $0x8] sm:$0xff] %vm774_vm0, %v1198_v17  ;;  %v1219_v22 = vadd.f32 %v1708_v21, %v930_v14  ;;  %v978_v47 = vadd.f32 %v2433_v49, %v977_v18 }
 0x14b   :  { %v979_v25 = vpop.f32.mrf.mxu0  ;;  %v1210_v26 = vpop.f32.mrf.mxu1 }
 0x14c   :  { %1455 = vst.msk [vmem:[%s2811_s3 + $0x30] sm:$0xff] %vm774_vm0, %v1219_v22  ;;  %v1211_v29 = vadd.f32 %v1210_v26, %v922_v55 }
 0x14d   :  { %v980_v30 = vpop.f32.mrf.mxu0  ;;  %v1709_v33 = vpop.f32.mrf.mxu1 }
 0x14e   :  { %1453 = vst.msk [vmem:[%s2811_s3 + $0x20] sm:$0xff] %vm774_vm0, %v1211_v29  ;;  %v1222_v34 = vadd.f32 %v1709_v33, %v933_v11  ;;  %v981_v18 = vadd.f32 %v2433_v49, %v980_v30 }
 0x14f   :  { %v982_v37 = vpop.f32.mrf.mxu0  ;;  %v1213_v38 = vpop.f32.mrf.mxu1 }
 0x150   :  { %1456 = vst.msk [vmem:[%s2811_s3 + $0x38] sm:$0xff] %vm774_vm0, %v1222_v34  ;;  %v1214_v41 = vadd.f32 %v1213_v38, %v925_v3 }
 0x151   :  { %v985_v42 = vpop.f32.mrf.mxu0  ;;  %v1712_v45 = vpop.f32.mrf.mxu1 }
 0x152   :  { %1454 = vst.msk [vmem:[%s2811_s3 + $0x28] sm:$0xff] %vm774_vm0, %v1214_v41  ;;  %v1235_v46 = vadd.f32 %v1712_v45, %v946_v15  ;;  %v986_v9 = vadd.f32 %v2433_v49, %v985_v42 }
 0x153   :  { %v987_v50 = vpop.f32.mrf.mxu0  ;;  %v1226_v53 = vpop.f32.mrf.mxu1 }
 0x154   :  { %1459 = vst.msk [vmem:[%s2811_s3 + $0x50] sm:$0xff] %vm774_vm0, %v1235_v46  ;;  %v1227_v54 = vadd.f32 %v1226_v53, %v938_v7 }
 0x155   :  { %v988_v58 = vpop.f32.mrf.mxu0  ;;  %v1713_v61 = vpop.f32.mrf.mxu1 }
 0x156   :  { %1457 = vst.msk [vmem:[%s2811_s3 + $0x40] sm:$0xff] %vm774_vm0, %v1227_v54  ;;  %v1238_v62 = vadd.f32 %v1713_v61, %v949_v27  ;;  %v989_v42 = vadd.f32 %v2433_v49, %v988_v58 }
 0x157   :  { %v990_v1 = vpop.f32.mrf.mxu0  ;;  %v1229_v2 = vpop.f32.mrf.mxu1 }
 0x158   :  { %1460 = vst.msk [vmem:[%s2811_s3 + $0x58] sm:$0xff] %vm774_vm0, %v1238_v62  ;;  %v1230_v5 = vadd.f32 %v1229_v2, %v941_v19 }
 0x159   :  { %v993_v6 = vpop.f32.mrf.mxu0  ;;  %v1716_v59 = vpop.f32.mrf.mxu1 }
 0x15a   :  { %1458 = vst.msk [vmem:[%s2811_s3 + $0x48] sm:$0xff] %vm774_vm0, %v1230_v5  ;;  %v1251_v10 = vadd.f32 %v1716_v59, %v962_v31  ;;  %v994_v30 = vadd.f32 %v2433_v49, %v993_v6 }
 0x15b   :  { %v995_v51 = vpop.f32.mrf.mxu0  ;;  %v1242_v13 = vpop.f32.mrf.mxu1 }
 0x15c   :  { %1463 = vst.msk [vmem:[%s2811_s3 + $0x70] sm:$0xff] %vm774_vm0, %v1251_v10  ;;  %v1243_v63 = vadd.f32 %v1242_v13, %v954_v23 }
 0x15d   :  { %v996_v14 = vpop.f32.mrf.mxu0  ;;  %v1717_v17 = vpop.f32.mrf.mxu1 }
 0x15e   :  { %1461 = vst.msk [vmem:[%s2811_s3 + $0x60] sm:$0xff] %vm774_vm0, %v1243_v63  ;;  %v1254_v21 = vadd.f32 %v1717_v17, %v965_v43  ;;  %v997_v61 = vadd.f32 %v2433_v49, %v996_v14 }
 0x15f   :  { %v998_v55 = vpop.f32.mrf.mxu0  ;;  %v1245_v22 = vpop.f32.mrf.mxu1 }
 0x160   :  { %1464 = vst.msk [vmem:[%s2811_s3 + $0x78] sm:$0xff] %vm774_vm0, %v1254_v21  ;;  %v1246_v25 = vadd.f32 %v1245_v22, %v957_v35 }
 0x161   :  { %v1001_v26 = vpop.f32.mrf.mxu0  ;;  %v1720_v11 = vpop.f32.mrf.mxu1 }
 0x162   :  { %1462 = vst.msk [vmem:[%s2811_s3 + $0x68] sm:$0xff] %vm774_vm0, %v1246_v25  ;;  %v1267_v29 = vadd.f32 %v1720_v11, %v978_v47  ;;  %v1002_v58 = vadd.f32 %v2433_v49, %v1001_v26 }
 0x163   :  { %v1003_v33 = vpop.f32.mrf.mxu0  ;;  %v1258_v3 = vpop.f32.mrf.mxu1 }
 0x164   :  { %1467 = vst.msk [vmem:[%s2811_s3 + $0x90] sm:$0xff] %vm774_vm0, %v1267_v29  ;;  %v1259_v34 = vadd.f32 %v1258_v3, %v970_v39 }
 0x165   :  { %v1004_v37 = vpop.f32.mrf.mxu0  ;;  %v1721_v38 = vpop.f32.mrf.mxu1 }
 0x166   :  { %1465 = vst.msk [vmem:[%s2811_s3 + $0x80] sm:$0xff] %vm774_vm0, %v1259_v34  ;;  %v1270_v15 = vadd.f32 %v1721_v38, %v981_v18  ;;  %v1005_v21 = vadd.f32 %v2433_v49, %v1004_v37 }
 0x167   :  { %v1006_v41 = vpop.f32.mrf.mxu0  ;;  %v1261_v45 = vpop.f32.mrf.mxu1 }
 0x168   :  { %1468 = vst.msk [vmem:[%s2811_s3 + $0x98] sm:$0xff] %vm774_vm0, %v1270_v15  ;;  %v1262_v7 = vadd.f32 %v1261_v45, %v973_v57 }
 0x169   :  { %v1009_v46 = vpop.f32.mrf.mxu0  ;;  %v1724_v50 = vpop.f32.mrf.mxu1 }
 0x16a   :  { %1466 = vst.msk [vmem:[%s2811_s3 + $0x88] sm:$0xff] %vm774_vm0, %v1262_v7  ;;  %v1283_v53 = vadd.f32 %v1724_v50, %v994_v30  ;;  %v1010_v6 = vadd.f32 %v2433_v49, %v1009_v46 }
 0x16b   :  { %v1011_v27 = vpop.f32.mrf.mxu0  ;;  %v1274_v54 = vpop.f32.mrf.mxu1 }
 0x16c   :  { %1471 = vst.msk [vmem:[%s2811_s3 + $0xb0] sm:$0xff] %vm774_vm0, %v1283_v53  ;;  %v1275_v19 = vadd.f32 %v1274_v54, %v986_v9 }
 0x16d   :  { %v1012_v62 = vpop.f32.mrf.mxu0  ;;  %v1725_v1 = vpop.f32.mrf.mxu1 }
 0x16e   :  { %1469 = vst.msk [vmem:[%s2811_s3 + $0xa0] sm:$0xff] %vm774_vm0, %v1275_v19  ;;  %v1286_v2 = vadd.f32 %v1725_v1, %v997_v61  ;;  %v1013_v63 = vadd.f32 %v2433_v49, %v1012_v62 }
 0x16f   :  { %v1014_v31 = vpop.f32.mrf.mxu0  ;;  %v1277_v5 = vpop.f32.mrf.mxu1 }
 0x170   :  { %1472 = vst.msk [vmem:[%s2811_s3 + $0xb8] sm:$0xff] %vm774_vm0, %v1286_v2  ;;  %v1278_v59 = vadd.f32 %v1277_v5, %v989_v42 }
 0x171   :  { %v1017_v23 = vpop.f32.mrf.mxu0  ;;  %v1728_v10 = vpop.f32.mrf.mxu1 }
 0x172   :  { %1470 = vst.msk [vmem:[%s2811_s3 + $0xa8] sm:$0xff] %vm774_vm0, %v1278_v59  ;;  %v1299_v51 = vadd.f32 %v1728_v10, %v1010_v6  ;;  %v1018_v39 = vadd.f32 %v2433_v49, %v1017_v23 }
 0x173   :  { %v1019_v13 = vpop.f32.mrf.mxu0  ;;  %v1290_v43 = vpop.f32.mrf.mxu1 }
 0x174   :  { %1475 = vst.msk [vmem:[%s2811_s3 + $0xd0] sm:$0xff] %vm774_vm0, %v1299_v51  ;;  %v1291_v14 = vadd.f32 %v1290_v43, %v1002_v58 }
 0x175   :  { %v1020_v17 = vpop.f32.mrf.mxu0  ;;  %v1729_v35 = vpop.f32.mrf.mxu1 }
 0x176   :  { %1473 = vst.msk [vmem:[%s2811_s3 + $0xc0] sm:$0xff] %vm774_vm0, %v1291_v14  ;;  %v1302_v55 = vadd.f32 %v1729_v35, %v1013_v63  ;;  %v1021_v57 = vadd.f32 %v2433_v49, %v1020_v17 }
 0x177   :  { %v1022_v22 = vpop.f32.mrf.mxu0  ;;  %v1293_v47 = vpop.f32.mrf.mxu1 }
 0x178   :  { %1476 = vst.msk [vmem:[%s2811_s3 + $0xd8] sm:$0xff] %vm774_vm0, %v1302_v55  ;;  %v1294_v25 = vadd.f32 %v1293_v47, %v1005_v21 }
 0x179   :  { %v1025_v26 = vpop.f32.mrf.mxu0  ;;  %v1732_v11 = vpop.f32.mrf.mxu1 }
 0x17a   :  { %1474 = vst.msk [vmem:[%s2811_s3 + $0xc8] sm:$0xff] %vm774_vm0, %v1294_v25  ;;  %v1026_v29 = vadd.f32 %v2433_v49, %v1025_v26 }
 0x17b   :  { %v1027_v33 = vpop.f32.mrf.mxu0  ;;  %v1306_v3 = vpop.f32.mrf.mxu1 }
 0x17c   :  { %v1315_v18 = vadd.f32 %v1732_v11, %v1026_v29  ;;  %v1307_v34 = vadd.f32 %v1306_v3, %v1018_v39 }
 0x17d   :  { %v1028_v37 = vpop.f32.mrf.mxu0  ;;  %v1733_v38 = vpop.f32.mrf.mxu1 }
 0x17e   :  { %1479 = vst.msk [vmem:[%s2811_s3 + $0xf0] sm:$0xff] %vm774_vm0, %v1315_v18  ;;  %1477 = vst.msk [vmem:[%s2811_s3 + $0xe0] sm:$0xff] %vm774_vm0, %v1307_v34  ;;  %v1029_v15 = vadd.f32 %v2433_v49, %v1028_v37 }
 0x17f   :  { %v1030_v41 = vpop.f32.mrf.mxu0  ;;  %v1309_v45 = vpop.f32.mrf.mxu1 }
 0x180   :  { %v1318_v30 = vadd.f32 %v1733_v38, %v1029_v15  ;;  %v1310_v7 = vadd.f32 %v1309_v45, %v1021_v57 }
 0x181   :  { %v1033_v46 = vpop.f32.mrf.mxu0  ;;  %v1736_v50 = vpop.f32.mrf.mxu1 }
 0x182   :  { %1480 = vst.msk [vmem:[%s2811_s3 + $0xf8] sm:$0xff] %vm774_vm0, %v1318_v30  ;;  %1478 = vst.msk [vmem:[%s2811_s3 + $0xe8] sm:$0xff] %vm774_vm0, %v1310_v7  ;;  %v1034_v9 = vadd.f32 %v2433_v49, %v1033_v46  ;;  %v1106_v46 = vadd.f32 %v2433_v49, %v2380_v60 }
 0x183   :  { %v1035_v53 = vpop.f32.mrf.mxu0  ;;  %v1322_v27 = vpop.f32.mrf.mxu1 }
 0x184   :  { %v1323_v54 = vadd.f32 %v1322_v27, %v1034_v9  ;;  %v1098_v27 = vadd.f32 %v2433_v49, %v2374_v52 }
 0x185   :  { %v1036_v61 = vpop.f32.mrf.mxu0  ;;  %v1737_v19 = vpop.f32.mrf.mxu1 }
 0x186   :  { %1481 = vst.msk [vmem:[%s2811_s3 + $0x100] sm:$0xff] %vm774_vm0, %v1323_v54  ;;  %v1037_v62 = vadd.f32 %v2433_v49, %v1036_v61 }
 0x187   :  { %v1038_v1 = vpop.f32.mrf.mxu0  ;;  %v1325_v42 = vpop.f32.mrf.mxu1 }
 0x188   :  { %v1326_v2 = vadd.f32 %v1325_v42, %v1037_v62  ;;  %v1109_v1 = vadd.f32 %v2433_v49, %v2382_v0 }
 0x189   :  { %v1041_v31 = vpop.f32.mrf.mxu0  ;;  %v1740_v5 = vpop.f32.mrf.mxu1 }
 0x18a   :  { %1482 = vst.msk [vmem:[%s2811_s3 + $0x108] sm:$0xff] %vm774_vm0, %v1326_v2  ;;  %v1042_v6 = vadd.f32 %v2433_v49, %v1041_v31  ;;  %v1101_v31 = vadd.f32 %v2433_v49, %v2378_v56 }
 0x18b   :  { %v1043_v59 = vpop.f32.mrf.mxu0  ;;  %v1338_v23 = vpop.f32.mrf.mxu1 }
 0x18c   :  { %v1331_v10 = vadd.f32 %v1736_v50, %v1042_v6 }
 0x18d   :  { %v1044_v58 = vpop.f32.mrf.mxu0  ;;  %v1741_v51 = vpop.f32.mrf.mxu1 }
 0x18e   :  { %1483 = vst.msk [vmem:[%s2811_s3 + $0x110] sm:$0xff] %vm774_vm0, %v1331_v10  ;;  %v1045_v13 = vadd.f32 %v2433_v49, %v1044_v58 }
 0x18f   :  { %v1046_v43 = vpop.f32.mrf.mxu0  ;;  %v1341_v63 = vpop.f32.mrf.mxu1 }
 0x190   :  { %v1334_v14 = vadd.f32 %v1737_v19, %v1045_v13  ;;  %v1114_v13 = vadd.f32 %v2433_v49, %v2386_v4 }
 0x191   :  { %v1049_v17 = vpop.f32.mrf.mxu0  ;;  %v2630_v35 = vpop.f32.mrf.mxu1 }
 0x192   :  { %1484 = vst.msk [vmem:[%s2811_s3 + $0x118] sm:$0xff] %vm774_vm0, %v1334_v14  ;;  %v1050_v21 = vadd.f32 %v2433_v49, %v1049_v17  ;;  %v1125_v17 = vadd.f32 %v2433_v49, %v2396_v16 }
 0x193   :  { %v1051_v55 = vpop.f32.mrf.mxu0  ;;  %v1354_v22 = vpop.f32.mrf.mxu1 }
 0x194   :  { %v1339_v47 = vadd.f32 %v1338_v23, %v1050_v21  ;;  %v1122_v23 = vadd.f32 %v2433_v49, %v2392_v12 }
 0x195   :  { %v1052_v25 = vpop.f32.mrf.mxu0  ;;  %v2637_v26 = vpop.f32.mrf.mxu1 }
 0x196   :  { %1485 = vst.msk [vmem:[%s2811_s3 + $0x120] sm:$0xff] %vm774_vm0, %v1339_v47  ;;  %v1053_v11 = vadd.f32 %v2433_v49, %v1052_v25  ;;  %v1117_v47 = vadd.f32 %v2433_v49, %v2390_v8 }
 0x197   :  { %v1054_v39 = vpop.f32.mrf.mxu0  ;;  %v1357_v29 = vpop.f32.mrf.mxu1 }
 0x198   :  { %v1342_v33 = vadd.f32 %v1341_v63, %v1053_v11  ;;  %v1138_v39 = vadd.f32 %v2433_v49, %v2408_v28 }
 0x199   :  { %v1057_v3 = vpop.f32.mrf.mxu0  ;;  %v2644_v18 = vpop.f32.mrf.mxu1 }
 0x19a   :  { %1486 = vst.msk [vmem:[%s2811_s3 + $0x128] sm:$0xff] %vm774_vm0, %v1342_v33  ;;  %v1058_v34 = vadd.f32 %v2433_v49, %v1057_v3 }
 0x19b   :  { %v1059_v37 = vpop.f32.mrf.mxu0  ;;  %v2651_v38 = vpop.f32.mrf.mxu1 }
 0x19c   :  { %v1347_v57 = vadd.f32 %v1740_v5, %v1058_v34  ;;  %v1130_v34 = vadd.f32 %v2433_v49, %v2400_v20 }
 0x19d   :  { %v1060_v15 = vpop.f32.mrf.mxu0  ;;  %v2653_v41 = vpop.f32.mrf.mxu1 }
 0x19e   :  { %1487 = vst.msk [vmem:[%s2811_s3 + $0x130] sm:$0xff] %vm774_vm0, %v1347_v57  ;;  %v1061_v45 = vadd.f32 %v2433_v49, %v1060_v15  ;;  %v1141_v15 = vadd.f32 %v2433_v49, %v2412_v32 }
 0x19f   :  { %v1062_v30 = vpop.f32.mrf.mxu0  ;;  %v2660_v7 = vpop.f32.mrf.mxu1 }
 0x1a0   :  { %v1350_v50 = vadd.f32 %v1741_v51, %v1061_v45 }
 0x1a1   :  { %v1065_v9 = vpop.f32.mrf.mxu0  ;;  %v1752_v53 = vpop.f32.mrf.mxu1 }
 0x1a2   :  { %1488 = vst.msk [vmem:[%s2811_s3 + $0x138] sm:$0xff] %vm774_vm0, %v1350_v50  ;;  %v1066_v54 = vadd.f32 %v2433_v49, %v1065_v9  ;;  %v1395_v61 = vadd.f32 %v1752_v53, %v1106_v46  ;;  %v1133_v50 = vadd.f32 %v2433_v49, %v2404_v24 }
 0x1a3   :  { %v1067_v19 = vpop.f32.mrf.mxu0  ;;  %v1386_v62 = vpop.f32.mrf.mxu1 }
 0x1a4   :  { %v1355_v60 = vadd.f32 %v1354_v22, %v1066_v54  ;;  %1499 = vst.msk [vmem:[%s2811_s3 + $0x190] sm:$0xff] %vm774_vm0, %v1395_v61  ;;  %v1387_v52 = vadd.f32 %v1386_v62, %v1098_v27  ;;  %v1154_v27 = vadd.f32 %v2433_v49, %v2424_v44  ;;  %v1146_v62 = vadd.f32 %v2433_v49, %v2416_v36 }
 0x1a5   :  { %v1068_v42 = vpop.f32.mrf.mxu0  ;;  %v1753_v2 = vpop.f32.mrf.mxu1 }
 0x1a6   :  { %1489 = vst.msk [vmem:[%s2811_s3 + $0x140] sm:$0xff] %vm774_vm0, %v1355_v60  ;;  %1497 = vst.msk [vmem:[%s2811_s3 + $0x180] sm:$0xff] %vm774_vm0, %v1387_v52  ;;  %v1069_v0 = vadd.f32 %v2433_v49, %v1068_v42  ;;  %v1398_v5 = vadd.f32 %v1753_v2, %v1109_v1  ;;  %v1157_v52 = vadd.f32 %v2433_v49, %v2428_v48 }
 0x1a7   :  { %v1070_v6 = vpop.f32.mrf.mxu0  ;;  %v1389_v59 = vpop.f32.mrf.mxu1 }
 0x1a8   :  { %v1358_v10 = vadd.f32 %v1357_v29, %v1069_v0  ;;  %1500 = vst.msk [vmem:[%s2811_s3 + $0x198] sm:$0xff] %vm774_vm0, %v1398_v5  ;;  %v1390_v56 = vadd.f32 %v1389_v59, %v1101_v31  ;;  %v1149_v0 = vadd.f32 %v2433_v49, %v2420_v40 }
 0x1a9   :  { %v1073_v58 = vpop.f32.mrf.mxu0  ;;  %v1756_v51 = vpop.f32.mrf.mxu1 }
 0x1aa   :  { %1490 = vst.msk [vmem:[%s2811_s3 + $0x148] sm:$0xff] %vm774_vm0, %v1358_v10  ;;  %1498 = vst.msk [vmem:[%s2811_s3 + $0x188] sm:$0xff] %vm774_vm0, %v1390_v56  ;;  %v1074_v12 = vadd.f32 %v2433_v49, %v1073_v58  ;;  %v1411_v43 = vadd.f32 %v1756_v51, %v1122_v23 }
 0x1ab   :  { %v1075_v63 = vpop.f32.mrf.mxu0  ;;  %v1402_v14 = vpop.f32.mrf.mxu1 }
 0x1ac   :  { %v1363_v4 = vadd.f32 %v2630_v35, %v1074_v12  ;;  %1503 = vst.msk [vmem:[%s2811_s3 + $0x1b0] sm:$0xff] %vm774_vm0, %v1411_v43  ;;  %v1403_v21 = vadd.f32 %v1402_v14, %v1114_v13 }
 0x1ad   :  { %v1076_v55 = vpop.f32.mrf.mxu0  ;;  %v1757_v22 = vpop.f32.mrf.mxu1 }
 0x1ae   :  { %1491 = vst.msk [vmem:[%s2811_s3 + $0x150] sm:$0xff] %vm774_vm0, %v1363_v4  ;;  %1501 = vst.msk [vmem:[%s2811_s3 + $0x1a0] sm:$0xff] %vm774_vm0, %v1403_v21  ;;  %v1077_v16 = vadd.f32 %v2433_v49, %v1076_v55  ;;  %v1414_v35 = vadd.f32 %v1757_v22, %v1125_v17 }
 0x1af   :  { %v1078_v25 = vpop.f32.mrf.mxu0  ;;  %v1405_v11 = vpop.f32.mrf.mxu1 }
 0x1b0   :  { %v1366_v8 = vadd.f32 %v2637_v26, %v1077_v16  ;;  %1504 = vst.msk [vmem:[%s2811_s3 + $0x1b8] sm:$0xff] %vm774_vm0, %v1414_v35  ;;  %v1406_v29 = vadd.f32 %v1405_v11, %v1117_v47 }
 0x1b1   :  { %v1081_v33 = vpop.f32.mrf.mxu0  ;;  %v1760_v3 = vpop.f32.mrf.mxu1 }
 0x1b2   :  { %1492 = vst.msk [vmem:[%s2811_s3 + $0x158] sm:$0xff] %vm774_vm0, %v1366_v8  ;;  %1502 = vst.msk [vmem:[%s2811_s3 + $0x1a8] sm:$0xff] %vm774_vm0, %v1406_v29  ;;  %v1082_v28 = vadd.f32 %v2433_v49, %v1081_v33  ;;  %v1427_v26 = vadd.f32 %v1760_v3, %v1138_v39 }
 0x1b3   :  { %v1083_v37 = vpop.f32.mrf.mxu0  ;;  %v1418_v57 = vpop.f32.mrf.mxu1 }
 0x1b4   :  { %v1371_v20 = vadd.f32 %v2651_v38, %v1082_v28  ;;  %1507 = vst.msk [vmem:[%s2811_s3 + $0x1d0] sm:$0xff] %vm774_vm0, %v1427_v26  ;;  %v1419_v45 = vadd.f32 %v1418_v57, %v1130_v34 }
 0x1b5   :  { %v1084_v30 = vpop.f32.mrf.mxu0  ;;  %v1761_v46 = vpop.f32.mrf.mxu1 }
 0x1b6   :  { %1493 = vst.msk [vmem:[%s2811_s3 + $0x160] sm:$0xff] %vm774_vm0, %v1371_v20  ;;  %1505 = vst.msk [vmem:[%s2811_s3 + $0x1c0] sm:$0xff] %vm774_vm0, %v1419_v45  ;;  %v1085_v32 = vadd.f32 %v2433_v49, %v1084_v30  ;;  %v1430_v38 = vadd.f32 %v1761_v46, %v1141_v15 }
 0x1b7   :  { %v1086_v9 = vpop.f32.mrf.mxu0  ;;  %v1421_v53 = vpop.f32.mrf.mxu1 }
 0x1b8   :  { %v1374_v24 = vadd.f32 %v2660_v7, %v1085_v32  ;;  %1508 = vst.msk [vmem:[%s2811_s3 + $0x1d8] sm:$0xff] %vm774_vm0, %v1430_v38  ;;  %v1422_v54 = vadd.f32 %v1421_v53, %v1133_v50 }
 0x1b9   :  { %v1089_v61 = vpop.f32.mrf.mxu0  ;;  %v1764_v19 = vpop.f32.mrf.mxu1 }
 0x1ba   :  { %1494 = vst.msk [vmem:[%s2811_s3 + $0x168] sm:$0xff] %vm774_vm0, %v1374_v24  ;;  %1506 = vst.msk [vmem:[%s2811_s3 + $0x1c8] sm:$0xff] %vm774_vm0, %v1422_v54  ;;  %v1090_v44 = vadd.f32 %v2433_v49, %v1089_v61  ;;  %v1443_v7 = vadd.f32 %v1764_v19, %v1154_v27 }
 0x1bb   :  { %v1091_v1 = vpop.f32.mrf.mxu0  ;;  %v1434_v60 = vpop.f32.mrf.mxu1 }
 0x1bc   :  { %v1379_v36 = vadd.f32 %v2644_v18, %v1090_v44  ;;  %1511 = vst.msk [vmem:[%s2811_s3 + $0x1f0] sm:$0xff] %vm774_vm0, %v1443_v7  ;;  %v1435_v42 = vadd.f32 %v1434_v60, %v1146_v62 }
 0x1bd   :  { %v1092_v2 = vpop.f32.mrf.mxu0  ;;  %v1765_v31 = vpop.f32.mrf.mxu1 }
 0x1be   :  { %1495 = vst.msk [vmem:[%s2811_s3 + $0x170] sm:$0xff] %vm774_vm0, %v1379_v36  ;;  %1509 = vst.msk [vmem:[%s2811_s3 + $0x1e0] sm:$0xff] %vm774_vm0, %v1435_v42  ;;  %v1093_v48 = vadd.f32 %v2433_v49, %v1092_v2  ;;  %v1446_v18 = vadd.f32 %v1765_v31, %v1157_v52 }
 0x1bf   :  { %v1094_v5 = vpop.f32.mrf.mxu0  ;;  %v1437_v6 = vpop.f32.mrf.mxu1 }
 0x1c0   :  { %v1382_v59 = vadd.f32 %v2653_v41, %v1093_v48  ;;  %1512 = vst.msk [vmem:[%s2811_s3 + $0x1f8] sm:$0xff] %vm774_vm0, %v1446_v18  ;;  %v1438_v40 = vadd.f32 %v1437_v6, %v1149_v0 }
 0x1c2   :  { %1496 = vst.msk [vmem:[%s2811_s3 + $0x178] sm:$0xff] %vm774_vm0, %v1382_v59  ;;  %1510 = vst.msk [vmem:[%s2811_s3 + $0x1e8] sm:$0xff] %vm774_vm0, %v1438_v40 }

</bundles_post_ra>
